<compile_context>
chip_gen: v5e
topology: v5e:2x2
jax: 0.10.0
libtpu: 0.0.40
codegen_flags: <defaults>
</compile_context>

<pallas_src>
import jax
import jax.numpy as jnp
from jax.experimental import pallas as pl
from jax.experimental.pallas import tpu as pltpu


# ----------------------------------------------------------------------------------
# Fused whole-decode kernel (single invocation, statically unrolled timestep loop)
# ----------------------------------------------------------------------------------
def decode_kernel(tf_ref,        # SMEM  [T_dec] i32 teacher-forcing flags
                  sum_emb_ref,   # VMEM  [T_dec, B, E] bf16  teacher-forced embeddings
                  hid0_ref,      # VMEM  [B, HP] f32   initial hidden (lane-padded)
                  enc_ref,       # VMEM  [B, S, D2] bf16
                  encW_ref,      # VMEM  [B, S, HP] f32  hoisted enc @ attn_We + attn_b
                  mask_ref,      # VMEM  [B, S] f32
                  embtab_ref,    # VMEM  [V, E] bf16
                  hidW_ref,      # VMEM  [HP, 4*HP] bf16  [attn_Wh | W_hh(gate-aligned)]
                  embW_ref,      # VMEM  [E, 3*HP + V] bf16  [W_ih_emb | fcW_emb]
                  wW_ref,        # VMEM  [D2, 3*HP + V] bf16 [W_ih_w   | fcW_w]
                  fcWh_ref,      # VMEM  [HP, V] bf16
                  bias_ref,      # VMEM  [4, W] f32  packed: attn_v, b_ih, b_hh, fc_b
                  out_ref,       # VMEM  [T, B, V] f32 output logits
                  hout_ref,      # VMEM  [B, HP] f32  carried + final hidden
                  emb_scr):      # VMEM  [B, E] bf16  greedy-token embedding carry
    T_dec, B, E = sum_emb_ref.shape
    S = enc_ref.shape[1]
    HP = hidW_ref.shape[0]
    V = fcWh_ref.shape[1]
    HP3 = 3 * HP

    # Loop-invariant loads / slices, hoisted out of the unrolled loop.
    attn_v = bias_ref[0:1, 0:HP]                 # [1, HP]
    b_ih = bias_ref[1:2, 0:HP3]                  # [1, 3HP]
    b_hh = bias_ref[2:3, 0:HP3]                  # [1, 3HP]
    fc_b = bias_ref[3:4, 0:V]                    # [1, V]
    encW = encW_ref[...]                         # [B, S, HP] f32
    enc = enc_ref[...]                           # [B, S, D2] bf16
    mask_is_pad = mask_ref[...] == 0.0           # [B, S] bool
    hidW = hidW_ref[...]
    embW = embW_ref[...]
    wW = wW_ref[...]
    fcWh = fcWh_ref[...]

    out_ref[0] = jnp.zeros((B, V), jnp.float32)  # outputs[0] stays zero (PyTorch loop)
    hout_ref[...] = hid0_ref[...]                # carried hidden lives in the output ref
    emb_scr[...] = sum_emb_ref[0]                # valid init; overwritten before any use

    for t in range(T_dec):                       # statically unrolled decode loop
        hid = hout_ref[...]                      # [B, HP] f32 (padded cols stay zero)
        hid_bf = hid.astype(jnp.bfloat16)

        # ---- input token embedding: teacher-forced sum[t] or previous greedy token ----
        if t == 0:
            emb = sum_emb_ref[0]
        else:
            emb = jnp.where(tf_ref[t] != 0, sum_emb_ref[t], emb_scr[...])   # [B, E] bf16

        # ---- one fused dot for everything that depends on hid: [attn_Wh | W_hh] ----
        hz = jnp.dot(hid_bf, hidW, preferred_element_type=jnp.float32)      # [B, 4HP]
        hW = hz[:, 0:HP]                                                    # [B, HP]
        gh = hz[:, HP:] + b_hh                                              # [B, 3HP]

        # ---- attention: energy = tanh(encW + hid@Wh); score = energy . v ----
        energy = jnp.tanh(encW + hW[:, None, :])                            # [B, S, HP] f32
        scores = jnp.sum(energy * attn_v[None, :, :], axis=-1)              # [B, S]
        scores = jnp.where(mask_is_pad, -1e10, scores)                      # masked_fill
        scores = scores - jnp.max(scores, axis=-1, keepdims=True)           # stable softmax
        p = jnp.exp(scores)
        a = p * pl.reciprocal(jnp.sum(p, axis=-1, keepdims=True), approx=True)

        # ---- weighted context = bmm(a.unsqueeze(1), enc) on the MXU ----
        weighted = jnp.einsum("bks,bsd->bkd",
                              a[:, None, :].astype(jnp.bfloat16), enc,
                              preferred_element_type=jnp.float32)[:, 0, :]  # [B, D2] f32
        w_bf = weighted.astype(jnp.bfloat16)

        # ---- per-operand dots (no lane-axis concats): GRU input gates + fc partials ----
        ez = jnp.dot(emb, embW, preferred_element_type=jnp.float32)         # [B, 3HP+V]
        wz = jnp.dot(w_bf, wW, preferred_element_type=jnp.float32)          # [B, 3HP+V]

        # ---- single-step GRU (PyTorch gate order r, z, n); gate slices lane-aligned ----
        gi = ez[:, 0:HP3] + wz[:, 0:HP3] + b_ih                             # [B, 3HP]
        r = jax.nn.sigmoid(gi[:, 0:HP] + gh[:, 0:HP])
        z = jax.nn.sigmoid(gi[:, HP:2 * HP] + gh[:, HP:2 * HP])
        n = jnp.tanh(gi[:, 2 * HP:] + r * gh[:, 2 * HP:])
        h_new = (1.0 - z) * n + z * hid                                     # [B, HP] f32
        hout_ref[...] = h_new

        # ---- prediction = fc_out(cat([output, weighted, embedded])) without the cat ----
        pred = (jnp.dot(h_new.astype(jnp.bfloat16), fcWh,
                        preferred_element_type=jnp.float32)
                + ez[:, HP3:] + wz[:, HP3:] + fc_b)                         # [B, V]
        out_ref[t + 1] = pred

        # ---- greedy next-token embedding, only when the NEXT step is not teacher-forced
        if t + 1 < T_dec:
            @pl.when(tf_ref[t + 1] == 0)
            def _():
                col = jax.lax.broadcasted_iota(jnp.int32, pred.shape, 1)    # [B, V]
                mx = jnp.max(pred, axis=-1, keepdims=True)
                idx = jnp.min(jnp.where(pred == mx, col, V),
                              axis=-1, keepdims=True)                       # first argmax
                onehot = (col == idx).astype(jnp.bfloat16)
                emb_scr[...] = jnp.dot(onehot, embtab_ref[...],
                                       preferred_element_type=jnp.float32
                                       ).astype(jnp.bfloat16)


# ----------------------------------------------------------------------------------
# Wrapper: one grid-less pallas_call for the whole decode loop
# ----------------------------------------------------------------------------------
def seq2seq_decode(kparams, sum_tokens, tf_flags, hidden0, encoder_outputs, mask):
    """sum_tokens [T,B] i32, tf_flags [T-1] i32, hidden0 [B,Hd] f32,
    encoder_outputs [S,B,D2] f32, mask [B,S]. Returns (outputs [T,B,V], hidden [B,Hd])."""
    T, B = sum_tokens.shape
    S, _, D2 = encoder_outputs.shape
    Hd = hidden0.shape[-1]
    V, E = kparams["emb_bf16"].shape
    HP = kparams["hidW"].shape[0]
    T_dec = T - 1
    B_p = ((B + 7) // 8) * 8                                    # pad batch to sublane multiple

    # One-time layout prep (amortized over the whole decode).
    enc_b = jnp.pad(jnp.transpose(encoder_outputs, (1, 0, 2)).astype(jnp.float32),
                    ((0, B_p - B), (0, 0), (0, 0)))                              # [B_p, S, D2]
    # Hoisted loop-invariant encoder-side attention projection (f32, once per decode).
    encW = jnp.einsum("bsd,dh->bsh", enc_b, kparams["attn_We_f32"]) \
        + kparams["attn_b_f32"][None]
    encW = jnp.pad(encW, ((0, 0), (0, 0), (0, HP - Hd)))                         # [B_p, S, HP]
    enc_bf = enc_b.astype(jnp.bfloat16)
    hid0 = jnp.pad(hidden0.astype(jnp.float32), ((0, B_p - B), (0, HP - Hd)))    # [B_p, HP]
    mask_p = jnp.pad(mask.astype(jnp.float32), ((0, B_p - B), (0, 0)))           # [B_p, S]
    sum_p = jnp.pad(sum_tokens, ((0, 0), (0, B_p - B)))                          # [T, B_p]
    sum_emb = kparams["emb_bf16"][sum_p[:-1]]                                    # [T_dec, B_p, E]
    tf_i32 = tf_flags.astype(jnp.int32)

    vmem = pltpu.MemorySpace.VMEM
    smem = pltpu.MemorySpace.SMEM

    outs, hout = pl.pallas_call(
        decode_kernel,
        out_shape=(jax.ShapeDtypeStruct((T, B_p, V), jnp.float32),
                   jax.ShapeDtypeStruct((B_p, HP), jnp.float32)),
        in_specs=[
            pl.BlockSpec(memory_space=smem),      # tf flags
            pl.BlockSpec(memory_space=vmem),      # sum_emb
            pl.BlockSpec(memory_space=vmem),      # hid0
            pl.BlockSpec(memory_space=vmem),      # encoder outputs (bf16)
            pl.BlockSpec(memory_space=vmem),      # hoisted encoder attention projection
            pl.BlockSpec(memory_space=vmem),      # mask
            pl.BlockSpec(memory_space=vmem),      # embedding table
            pl.BlockSpec(memory_space=vmem),      # hidW  [attn_Wh | W_hh]
            pl.BlockSpec(memory_space=vmem),      # embW  [W_ih_emb | fcW_emb]
            pl.BlockSpec(memory_space=vmem),      # wW    [W_ih_w | fcW_w]
            pl.BlockSpec(memory_space=vmem),      # fcW_h
            pl.BlockSpec(memory_space=vmem),      # packed biases
        ],
        out_specs=(pl.BlockSpec(memory_space=vmem),
                   pl.BlockSpec(memory_space=vmem)),
        scratch_shapes=[pltpu.VMEM((B_p, E), jnp.bfloat16)],    # greedy-token embedding
    )(tf_i32, sum_emb, hid0, enc_bf, encW, mask_p, kparams["emb_bf16"],
      kparams["hidW"], kparams["embW"], kparams["wW"], kparams["fcW_h"],
      kparams["bias_pack"])

    outputs = outs if B_p == B else outs[:, :B, :]     # strip batch padding (no-op if aligned)
    return outputs, hout[:B, :Hd]


def create_mask(text, pad_idx):
    """Seq2Seq.create_mask: (text != pad).permute(1, 0) -> [B, S]."""
    return (text != pad_idx).T


# ----------------------------------------------------------------------------------
# Parameters
# ----------------------------------------------------------------------------------
def init_params(key, V, E, He, Hd):
    D2 = 2 * He
    ks = jax.random.split(key, 10)
    s = 0.1
    return {
        "emb_table": jax.random.normal(ks[0], (V, E), jnp.float32) * 0.5,
        # attention Linear(D2+Hd, Hd), [in, out], cat order [hidden, enc]
        "attn_W": jax.random.normal(ks[1], (Hd + D2, Hd), jnp.float32) * s,
        "attn_b": jax.random.normal(ks[2], (1, Hd), jnp.float32) * s,
        "attn_v": jax.random.normal(ks[3], (1, Hd), jnp.float32) * s,
        # GRU(E+D2 -> Hd), [in, 3Hd], gate order r,z,n, input cat [embedded, weighted]
        "W_ih": jax.random.normal(ks[4], (E + D2, 3 * Hd), jnp.float32) * s,
        "W_hh": jax.random.normal(ks[5], (Hd, 3 * Hd), jnp.float32) * s,
        "b_ih": jax.random.normal(ks[6], (1, 3 * Hd), jnp.float32) * s,
        "b_hh": jax.random.normal(ks[7], (1, 3 * Hd), jnp.float32) * s,
        # fc_out Linear(Hd+D2+E, V), cat order [output, weighted, embedded]
        "fc_W": jax.random.normal(ks[8], (Hd + D2 + E, V), jnp.float32) * s,
        "fc_b": jax.random.normal(ks[9], (1, V), jnp.float32) * s,
    }


def prepare_kernel_params(p):
    """One-time packing: bf16 MXU weights with 128-lane-aligned gate layout, per-operand
    weight splits (no in-kernel concats), one fused hid-side weight, one f32 bias pack."""
    V, E = p["emb_table"].shape
    Hd = p["W_hh"].shape[0]
    D2 = p["attn_W"].shape[0] - Hd
    HP = ((Hd + 127) // 128) * 128                 # hidden width padded to lane multiple
    W = max(3 * HP, V)

    def pad_cols(x, n):
        return jnp.pad(x, ((0, 0), (0, n - x.shape[1])))

    def pad_rows(x, n):
        return jnp.pad(x, ((0, n - x.shape[0]), (0, 0)))

    def gate_align(w3):                            # [.., 3*Hd] -> [.., 3*HP], gate g at g*HP
        return jnp.concatenate(
            [pad_cols(w3[:, g * Hd:(g + 1) * Hd], HP) for g in range(3)], axis=1)

    attn_Wh = pad_cols(pad_rows(p["attn_W"][:Hd], HP), HP)          # [HP, HP]
    W_hh_al = pad_rows(gate_align(p["W_hh"]), HP)                   # [HP, 3HP]
    hidW = jnp.concatenate([attn_Wh, W_hh_al], axis=1)              # [HP, 4HP]

    W_ih_e = gate_align(p["W_ih"][:E])                              # [E, 3HP]
    W_ih_w = gate_align(p["W_ih"][E:])                              # [D2, 3HP]
    fcW_h = pad_rows(p["fc_W"][:Hd], HP)                            # [HP, V]
    fcW_w = p["fc_W"][Hd:Hd + D2]                                   # [D2, V]
    fcW_e = p["fc_W"][Hd + D2:]                                     # [E, V]
    embW = jnp.concatenate([W_ih_e, fcW_e], axis=1)                 # [E, 3HP + V]
    wW = jnp.concatenate([W_ih_w, fcW_w], axis=1)                   # [D2, 3HP + V]

    def row(x):
        flat = x.reshape(-1)
        return jnp.pad(flat, (0, W - flat.shape[0]))

    bias_pack = jnp.stack([row(pad_cols(p["attn_v"], HP)),          # attn_v  -> [0, :HP]
                           row(gate_align(p["b_ih"])),              # b_ih    -> [1, :3HP]
                           row(gate_align(p["b_hh"])),              # b_hh    -> [2, :3HP]
                           row(p["fc_b"])], axis=0).astype(jnp.float32)   # fc_b -> [3, :V]

    return {
        "emb_bf16": p["emb_table"].astype(jnp.bfloat16),
        "hidW": hidW.astype(jnp.bfloat16),
        "embW": embW.astype(jnp.bfloat16),
        "wW": wW.astype(jnp.bfloat16),
        "fcW_h": fcW_h.astype(jnp.bfloat16),
        "bias_pack": bias_pack,
        # f32 pieces used by the wrapper's hoisted encoder projection
        "attn_We_f32": p["attn_W"][Hd:].astype(jnp.float32),
        "attn_b_f32": p["attn_b"].astype(jnp.float32),
    }


# ----------------------------------------------------------------------------------
# Plain-JAX (f32) reference mirroring the PyTorch Seq2Seq forward
# ----------------------------------------------------------------------------------
def seq2seq_reference(params, sum_tokens, tf_flags, hidden0, encoder_outputs, mask):
    T, B = sum_tokens.shape
    enc = jnp.transpose(encoder_outputs, (1, 0, 2))                 # [B, S, D2]
    Hd = hidden0.shape[-1]
    V = params["fc_b"].shape[-1]
    mask = mask.astype(jnp.float32)

    def step(tokens, hidden):
        emb = params["emb_table"][tokens]
        hW = hidden @ params["attn_W"][:Hd]
        eW = jnp.einsum("bsd,dh->bsh", enc, params["attn_W"][Hd:])
        energy = jnp.tanh(eW + hW[:, None, :] + params["attn_b"][None])
        scores = jnp.sum(energy * params["attn_v"][None], axis=-1)
        scores = jnp.where(mask == 0.0, -1e10, scores)
        a = jax.nn.softmax(scores, axis=-1)
        weighted = jnp.einsum("bs,bsd->bd", a, enc)
        x = jnp.concatenate([emb, weighted], axis=-1)
        gi = x @ params["W_ih"] + params["b_ih"]
        gh = hidden @ params["W_hh"] + params["b_hh"]
        r = jax.nn.sigmoid(gi[:, :Hd] + gh[:, :Hd])
        z = jax.nn.sigmoid(gi[:, Hd:2 * Hd] + gh[:, Hd:2 * Hd])
        n = jnp.tanh(gi[:, 2 * Hd:] + r * gh[:, 2 * Hd:])
        h_new = (1.0 - z) * n + z * hidden
        pred = jnp.concatenate([h_new, weighted, emb], axis=-1) @ params["fc_W"] + params["fc_b"]
        return pred, h_new

    outputs = [jnp.zeros((B, V), jnp.float32)]
    hidden = hidden0
    tokens = sum_tokens[0]
    prev_top1 = tokens
    for g in range(T - 1):
        if g > 0:
            tokens = jnp.where(tf_flags[g] != 0, sum_tokens[g], prev_top1)
        pred, hidden = step(tokens, hidden)
        prev_top1 = jnp.argmax(pred, axis=-1)
        outputs.append(pred)
    return jnp.stack(outputs, axis=0), hidden


# ----------------------------------------------------------------------------------
if __name__ == "__main__":
    V, E, He, Hd = 128, 32, 32, 32       # vocab, embed, enc_hid, dec_hid
    S, B, T = 8, 4, 6                    # src_len, batch, sum_len
    PAD = 1
    D2 = 2 * He

    key = jax.random.PRNGKey(0)
    kp, ktext, ksum, kh, ke = jax.random.split(key, 5)
    params = init_params(kp, V, E, He, Hd)
    kparams = prepare_kernel_params(params)            # packed/bf16 once, outside the decode path

    # source text + mask (Seq2Seq.create_mask)
    text = jax.random.randint(ktext, (S, B), 2, V, dtype=jnp.int32)
    lengths = jnp.array([8, 6, 5, 7], dtype=jnp.int32)
    text = jnp.where(jnp.arange(S)[:, None] >= lengths[None, :], PAD, text)   # [S, B]
    mask = create_mask(text, PAD).astype(jnp.float32)                         # [B, S]

    # encoder products (encoder module itself is external -- see TODO at top)
    hidden0 = jax.random.normal(kh, (B, Hd), jnp.float32) * 0.5
    enc_out = jax.random.normal(ke, (S, B, D2), jnp.float32) * 0.5
    sum_tokens = jax.random.randint(ksum, (T, B), 2, V, dtype=jnp.int32)

    run = jax.jit(seq2seq_decode)

    # Run 1: full teacher forcing -> strict numerical check against the f32 reference.
    tf_all = jnp.ones((T - 1,), dtype=jnp.int32)
    out1, h1 = jax.block_until_ready(run(kparams, sum_tokens, tf_all, hidden0, enc_out, mask))
    out1_r, h1_r = seq2seq_reference(params, sum_tokens, tf_all, hidden0, enc_out, mask)
    assert out1.shape == (T, B, V) and h1.shape == (B, Hd)
    assert jnp.all(jnp.isfinite(out1)) and jnp.all(jnp.isfinite(h1))
    assert jnp.allclose(out1[0], 0.0)
    assert jnp.allclose(out1, out1_r, atol=2e-2, rtol=2e-2)
    assert jnp.allclose(h1, h1_r, atol=2e-2, rtol=2e-2)

    # Run 2: mixed teacher forcing -> exercises the pl.when-gated argmax / one-hot
    # embedding path (autoregressive feedback; not compared element-wise against the f32
    # reference because a single bf16-induced argmax flip could legitimately diverge it).
    tf_mix = jnp.array([1, 1, 0, 1, 0], dtype=jnp.int32)
    out2, h2 = jax.block_until_ready(run(kparams, sum_tokens, tf_mix, hidden0, enc_out, mask))
    assert out2.shape == (T, B, V) and h2.shape == (B, Hd)
    assert jnp.all(jnp.isfinite(out2)) and jnp.all(jnp.isfinite(h2))
    assert jnp.allclose(out2[1], out1[1])   # step 1 is tf-independent -> identical

    print("KERNEL_OK")
</pallas_src>

<mosaic_0001>
module attributes {stable_mosaic.version = 11 : i64} {
  func.func @decode_kernel(%arg0: memref<5xi32, #tpu.memory_space<smem>>, %arg1: memref<5x8x32xbf16, #tpu.memory_space<vmem>>, %arg2: memref<8x128xf32, #tpu.memory_space<vmem>>, %arg3: memref<8x8x64xbf16, #tpu.memory_space<vmem>>, %arg4: memref<8x8x128xf32, #tpu.memory_space<vmem>>, %arg5: memref<8x8xf32, #tpu.memory_space<vmem>>, %arg6: memref<128x32xbf16, #tpu.memory_space<vmem>>, %arg7: memref<128x512xbf16, #tpu.memory_space<vmem>>, %arg8: memref<32x512xbf16, #tpu.memory_space<vmem>>, %arg9: memref<64x512xbf16, #tpu.memory_space<vmem>>, %arg10: memref<128x128xbf16, #tpu.memory_space<vmem>>, %arg11: memref<4x384xf32, #tpu.memory_space<vmem>>, %arg12: memref<6x8x128xf32, #tpu.memory_space<vmem>>, %arg13: memref<8x128xf32, #tpu.memory_space<vmem>>, %arg14: memref<8x32xbf16, #tpu.memory_space<vmem>>) attributes {dimension_semantics = [], scalar_prefetch = 0 : i64, scratch_operands = 1 : i64, tpu.core_type = #tpu.core_type<tc>} {
    %c0 = arith.constant 0 : index
    %c0_0 = arith.constant 0 : index
    %0 = vector.load %arg11[%c0, %c0_0] : memref<4x384xf32, #tpu.memory_space<vmem>>, vector<1x128xf32>
    %c1 = arith.constant 1 : index
    %c0_1 = arith.constant 0 : index
    %1 = vector.load %arg11[%c1, %c0_1] : memref<4x384xf32, #tpu.memory_space<vmem>>, vector<1x384xf32>
    %c2 = arith.constant 2 : index
    %c0_2 = arith.constant 0 : index
    %2 = vector.load %arg11[%c2, %c0_2] : memref<4x384xf32, #tpu.memory_space<vmem>>, vector<1x384xf32>
    %c3 = arith.constant 3 : index
    %c0_3 = arith.constant 0 : index
    %3 = vector.load %arg11[%c3, %c0_3] : memref<4x384xf32, #tpu.memory_space<vmem>>, vector<1x128xf32>
    %c0_4 = arith.constant 0 : index
    %c0_5 = arith.constant 0 : index
    %c0_6 = arith.constant 0 : index
    %4 = vector.load %arg4[%c0_4, %c0_5, %c0_6] : memref<8x8x128xf32, #tpu.memory_space<vmem>>, vector<8x8x128xf32>
    %c0_7 = arith.constant 0 : index
    %c0_8 = arith.constant 0 : index
    %c0_9 = arith.constant 0 : index
    %5 = vector.load %arg3[%c0_7, %c0_8, %c0_9] : memref<8x8x64xbf16, #tpu.memory_space<vmem>>, vector<8x8x64xbf16>
    %c0_10 = arith.constant 0 : index
    %c0_11 = arith.constant 0 : index
    %6 = vector.load %arg5[%c0_10, %c0_11] : memref<8x8xf32, #tpu.memory_space<vmem>>, vector<8x8xf32>
    %cst = arith.constant 0.000000e+00 : f32
    %7 = vector.broadcast %cst : f32 to vector<8x8xf32>
    %8 = arith.cmpf oeq, %6, %7 : vector<8x8xf32>
    %c0_12 = arith.constant 0 : index
    %c0_13 = arith.constant 0 : index
    %9 = vector.load %arg7[%c0_12, %c0_13] : memref<128x512xbf16, #tpu.memory_space<vmem>>, vector<128x512xbf16>
    %c0_14 = arith.constant 0 : index
    %c0_15 = arith.constant 0 : index
    %10 = vector.load %arg8[%c0_14, %c0_15] : memref<32x512xbf16, #tpu.memory_space<vmem>>, vector<32x512xbf16>
    %c0_16 = arith.constant 0 : index
    %c0_17 = arith.constant 0 : index
    %11 = vector.load %arg9[%c0_16, %c0_17] : memref<64x512xbf16, #tpu.memory_space<vmem>>, vector<64x512xbf16>
    %c0_18 = arith.constant 0 : index
    %c0_19 = arith.constant 0 : index
    %12 = vector.load %arg10[%c0_18, %c0_19] : memref<128x128xbf16, #tpu.memory_space<vmem>>, vector<128x128xbf16>
    %cst_20 = arith.constant 0.000000e+00 : f32
    %13 = vector.broadcast %cst_20 : f32 to vector<8x128xf32>
    %c0_21 = arith.constant 0 : index
    %c0_22 = arith.constant 0 : index
    %c0_23 = arith.constant 0 : index
    %14 = vector.load %arg12[%c0_21, %c0_22, %c0_23] : memref<6x8x128xf32, #tpu.memory_space<vmem>>, vector<1x8x128xf32>
    %15 = vector.shape_cast %14 : vector<1x8x128xf32> to vector<8x128xf32>
    %16 = vector.shape_cast %13 : vector<8x128xf32> to vector<1x8x128xf32>
    tpu.vector_store %arg12[%c0_21, %c0_22, %c0_23], %16 {strides = array<i32>} : memref<6x8x128xf32, #tpu.memory_space<vmem>>, vector<1x8x128xf32>,
    %c0_24 = arith.constant 0 : index
    %c0_25 = arith.constant 0 : index
    %17 = vector.load %arg2[%c0_24, %c0_25] : memref<8x128xf32, #tpu.memory_space<vmem>>, vector<8x128xf32>
    %c0_26 = arith.constant 0 : index
    %c0_27 = arith.constant 0 : index
    %18 = vector.load %arg13[%c0_26, %c0_27] : memref<8x128xf32, #tpu.memory_space<vmem>>, vector<8x128xf32>
    tpu.vector_store %arg13[%c0_26, %c0_27], %17 {strides = array<i32>} : memref<8x128xf32, #tpu.memory_space<vmem>>, vector<8x128xf32>,
    %c0_28 = arith.constant 0 : index
    %c0_29 = arith.constant 0 : index
    %c0_30 = arith.constant 0 : index
    %19 = vector.load %arg1[%c0_28, %c0_29, %c0_30] : memref<5x8x32xbf16, #tpu.memory_space<vmem>>, vector<1x8x32xbf16>
    %20 = vector.shape_cast %19 : vector<1x8x32xbf16> to vector<8x32xbf16>
    %c0_31 = arith.constant 0 : index
    %c0_32 = arith.constant 0 : index
    %21 = vector.load %arg14[%c0_31, %c0_32] : memref<8x32xbf16, #tpu.memory_space<vmem>>, vector<8x32xbf16>
    tpu.vector_store %arg14[%c0_31, %c0_32], %20 {strides = array<i32>} : memref<8x32xbf16, #tpu.memory_space<vmem>>, vector<8x32xbf16>,
    %c0_33 = arith.constant 0 : index
    %c0_34 = arith.constant 0 : index
    %22 = vector.load %arg13[%c0_33, %c0_34] : memref<8x128xf32, #tpu.memory_space<vmem>>, vector<8x128xf32>
    %23 = arith.truncf %22 : vector<8x128xf32> to vector<8x128xbf16>
    %c0_35 = arith.constant 0 : index
    %c0_36 = arith.constant 0 : index
    %c0_37 = arith.constant 0 : index
    %24 = vector.load %arg1[%c0_35, %c0_36, %c0_37] : memref<5x8x32xbf16, #tpu.memory_space<vmem>>, vector<1x8x32xbf16>
    %25 = vector.shape_cast %24 : vector<1x8x32xbf16> to vector<8x32xbf16>
    %cst_38 = arith.constant dense<0.000000e+00> : vector<8x512xf32>
    %26 = tpu.matmul %23, %9, %cst_38 {dimension_numbers = #tpu.dot_dimension_numbers<[1], [0], [0], [1], [0, 0, 1, 1], [], []>} : vector<8x128xbf16>, vector<128x512xbf16>, vector<8x512xf32> -> vector<8x512xf32>
    %27 = vector.extract_strided_slice %26 {offsets = [0, 0], sizes = [8, 128], strides = [1, 1]} : vector<8x512xf32> to vector<8x128xf32>
    %28 = vector.extract_strided_slice %26 {offsets = [0, 128], sizes = [8, 384], strides = [1, 1]} : vector<8x512xf32> to vector<8x384xf32>
    %29 = vector.broadcast %2 : vector<1x384xf32> to vector<8x384xf32>
    %30 = arith.addf %28, %29 : vector<8x384xf32>
    %31 = vector.shape_cast %27 : vector<8x128xf32> to vector<8x1x128xf32>
    %32 = vector.broadcast %31 : vector<8x1x128xf32> to vector<8x8x128xf32>
    %33 = arith.addf %4, %32 : vector<8x8x128xf32>
    %34 = math.tanh %33 : vector<8x8x128xf32>
    %35 = vector.shape_cast %0 : vector<1x128xf32> to vector<1x1x128xf32>
    %36 = vector.broadcast %35 : vector<1x1x128xf32> to vector<8x8x128xf32>
    %37 = arith.mulf %34, %36 : vector<8x8x128xf32>
    %cst_39 = arith.constant dense<0.000000e+00> : vector<8x8xf32>
    %38 = vector.multi_reduction <add>, %37, %cst_39 [2] : vector<8x8x128xf32> to vector<8x8xf32>
    %cst_40 = arith.constant -1.000000e+10 : f32
    %39 = vector.broadcast %cst_40 : f32 to vector<8x8xf32>
    %40 = arith.select %8, %39, %38 : vector<8x8xi1>, vector<8x8xf32>
    %cst_41 = arith.constant dense<0xFF800000> : vector<8xf32>
    %41 = vector.multi_reduction <maximumf>, %40, %cst_41 [1] : vector<8x8xf32> to vector<8xf32>
    %42 = vector.shape_cast %41 : vector<8xf32> to vector<8x1xf32>
    %43 = vector.broadcast %42 : vector<8x1xf32> to vector<8x8xf32>
    %44 = arith.subf %40, %43 : vector<8x8xf32>
    %45 = math.exp %44 : vector<8x8xf32>
    %cst_42 = arith.constant dense<0.000000e+00> : vector<8xf32>
    %46 = vector.multi_reduction <add>, %45, %cst_42 [1] : vector<8x8xf32> to vector<8xf32>
    %47 = vector.shape_cast %46 : vector<8xf32> to vector<8x1xf32>
    %48 = tpu.reciprocal %47 {approx = true} : vector<8x1xf32> -> vector<8x1xf32>
    %49 = vector.broadcast %48 : vector<8x1xf32> to vector<8x8xf32>
    %50 = arith.mulf %45, %49 : vector<8x8xf32>
    %51 = vector.shape_cast %50 : vector<8x8xf32> to vector<8x1x8xf32>
    %52 = arith.truncf %51 : vector<8x1x8xf32> to vector<8x1x8xbf16>
    "tpu.trace_start"() <{level = 10 : i32, message = "bks,bsd->bkd"}> : () -> ()
    %cst_43 = arith.constant dense<0.000000e+00> : vector<8x1x64xf32>
    %53 = tpu.matmul %52, %5, %cst_43 {dimension_numbers = #tpu.dot_dimension_numbers<[2], [1], [1], [2], [0, 0, 0, 1, 1, 2], [0], [0]>} : vector<8x1x8xbf16>, vector<8x8x64xbf16>, vector<8x1x64xf32> -> vector<8x1x64xf32>
    "tpu.trace_stop"() : () -> ()
    %54 = vector.shape_cast %53 : vector<8x1x64xf32> to vector<8x64xf32>
    %55 = arith.truncf %54 : vector<8x64xf32> to vector<8x64xbf16>
    %cst_44 = arith.constant dense<0.000000e+00> : vector<8x512xf32>
    %56 = tpu.matmul %25, %10, %cst_44 {dimension_numbers = #tpu.dot_dimension_numbers<[1], [0], [0], [1], [0, 0, 1, 1], [], []>} : vector<8x32xbf16>, vector<32x512xbf16>, vector<8x512xf32> -> vector<8x512xf32>
    %cst_45 = arith.constant dense<0.000000e+00> : vector<8x512xf32>
    %57 = tpu.matmul %55, %11, %cst_45 {dimension_numbers = #tpu.dot_dimension_numbers<[1], [0], [0], [1], [0, 0, 1, 1], [], []>} : vector<8x64xbf16>, vector<64x512xbf16>, vector<8x512xf32> -> vector<8x512xf32>
    %58 = vector.extract_strided_slice %56 {offsets = [0, 0], sizes = [8, 384], strides = [1, 1]} : vector<8x512xf32> to vector<8x384xf32>
    %59 = vector.extract_strided_slice %57 {offsets = [0, 0], sizes = [8, 384], strides = [1, 1]} : vector<8x512xf32> to vector<8x384xf32>
    %60 = arith.addf %58, %59 : vector<8x384xf32>
    %61 = vector.broadcast %1 : vector<1x384xf32> to vector<8x384xf32>
    %62 = arith.addf %60, %61 : vector<8x384xf32>
    %63 = vector.extract_strided_slice %62 {offsets = [0, 0], sizes = [8, 128], strides = [1, 1]} : vector<8x384xf32> to vector<8x128xf32>
    %64 = vector.extract_strided_slice %30 {offsets = [0, 0], sizes = [8, 128], strides = [1, 1]} : vector<8x384xf32> to vector<8x128xf32>
    %65 = arith.addf %63, %64 : vector<8x128xf32>
    %66 = arith.negf %65 : vector<8x128xf32>
    %67 = math.exp %66 : vector<8x128xf32>
    %cst_46 = arith.constant 1.000000e+00 : f32
    %68 = vector.broadcast %cst_46 : f32 to vector<8x128xf32>
    %69 = arith.addf %68, %67 : vector<8x128xf32>
    %70 = arith.divf %68, %69 : vector<8x128xf32>
    %71 = vector.extract_strided_slice %62 {offsets = [0, 128], sizes = [8, 128], strides = [1, 1]} : vector<8x384xf32> to vector<8x128xf32>
    %72 = vector.extract_strided_slice %30 {offsets = [0, 128], sizes = [8, 128], strides = [1, 1]} : vector<8x384xf32> to vector<8x128xf32>
    %73 = arith.addf %71, %72 : vector<8x128xf32>
    %74 = arith.negf %73 : vector<8x128xf32>
    %75 = math.exp %74 : vector<8x128xf32>
    %cst_47 = arith.constant 1.000000e+00 : f32
    %76 = vector.broadcast %cst_47 : f32 to vector<8x128xf32>
    %77 = arith.addf %76, %75 : vector<8x128xf32>
    %78 = arith.divf %76, %77 : vector<8x128xf32>
    %79 = vector.extract_strided_slice %62 {offsets = [0, 256], sizes = [8, 128], strides = [1, 1]} : vector<8x384xf32> to vector<8x128xf32>
    %80 = vector.extract_strided_slice %30 {offsets = [0, 256], sizes = [8, 128], strides = [1, 1]} : vector<8x384xf32> to vector<8x128xf32>
    %81 = arith.mulf %70, %80 : vector<8x128xf32>
    %82 = arith.addf %79, %81 : vector<8x128xf32>
    %83 = math.tanh %82 : vector<8x128xf32>
    %cst_48 = arith.constant 1.000000e+00 : f32
    %84 = vector.broadcast %cst_48 : f32 to vector<8x128xf32>
    %85 = arith.subf %84, %78 : vector<8x128xf32>
    %86 = arith.mulf %85, %83 : vector<8x128xf32>
    %87 = arith.mulf %78, %22 : vector<8x128xf32>
    %88 = arith.addf %86, %87 : vector<8x128xf32>
    %c0_49 = arith.constant 0 : index
    %c0_50 = arith.constant 0 : index
    %89 = vector.load %arg13[%c0_49, %c0_50] : memref<8x128xf32, #tpu.memory_space<vmem>>, vector<8x128xf32>
    tpu.vector_store %arg13[%c0_49, %c0_50], %88 {strides = array<i32>} : memref<8x128xf32, #tpu.memory_space<vmem>>, vector<8x128xf32>,
    %90 = arith.truncf %88 : vector<8x128xf32> to vector<8x128xbf16>
    %cst_51 = arith.constant dense<0.000000e+00> : vector<8x128xf32>
    %91 = tpu.matmul %90, %12, %cst_51 {dimension_numbers = #tpu.dot_dimension_numbers<[1], [0], [0], [1], [0, 0, 1, 1], [], []>} : vector<8x128xbf16>, vector<128x128xbf16>, vector<8x128xf32> -> vector<8x128xf32>
    %92 = vector.extract_strided_slice %56 {offsets = [0, 384], sizes = [8, 128], strides = [1, 1]} : vector<8x512xf32> to vector<8x128xf32>
    %93 = arith.addf %91, %92 : vector<8x128xf32>
    %94 = vector.extract_strided_slice %57 {offsets = [0, 384], sizes = [8, 128], strides = [1, 1]} : vector<8x512xf32> to vector<8x128xf32>
    %95 = arith.addf %93, %94 : vector<8x128xf32>
    %96 = vector.broadcast %3 : vector<1x128xf32> to vector<8x128xf32>
    %97 = arith.addf %95, %96 : vector<8x128xf32>
    %c1_52 = arith.constant 1 : index
    %c0_53 = arith.constant 0 : index
    %c0_54 = arith.constant 0 : index
    %98 = vector.load %arg12[%c1_52, %c0_53, %c0_54] : memref<6x8x128xf32, #tpu.memory_space<vmem>>, vector<1x8x128xf32>
    %99 = vector.shape_cast %98 : vector<1x8x128xf32> to vector<8x128xf32>
    %100 = vector.shape_cast %97 : vector<8x128xf32> to vector<1x8x128xf32>
    tpu.vector_store %arg12[%c1_52, %c0_53, %c0_54], %100 {strides = array<i32>} : memref<6x8x128xf32, #tpu.memory_space<vmem>>, vector<1x8x128xf32>,
    %c1_55 = arith.constant 1 : index
    %101 = memref.load %arg0[%c1_55] : memref<5xi32, #tpu.memory_space<smem>>
    %c0_i32 = arith.constant 0 : i32
    %102 = arith.cmpi eq, %101, %c0_i32 : i32
    %103 = arith.extui %102 : i1 to i32
    %c0_i32_56 = arith.constant 0 : i32
    %104 = arith.cmpi ne, %103, %c0_i32_56 : i32
    scf.if %104 {
      %449 = tpu.iota {dimensions = array<i32: 1>} : vector<8x128xi32>
      %cst_168 = arith.constant dense<0xFF800000> : vector<8xf32>
      %450 = vector.multi_reduction <maximumf>, %97, %cst_168 [1] : vector<8x128xf32> to vector<8xf32>
      %451 = vector.shape_cast %450 : vector<8xf32> to vector<8x1xf32>
      %452 = vector.broadcast %451 : vector<8x1xf32> to vector<8x128xf32>
      %453 = arith.cmpf oeq, %97, %452 : vector<8x128xf32>
      %c128_i32 = arith.constant 128 : i32
      %454 = vector.broadcast %c128_i32 : i32 to vector<8x128xi32>
      %455 = arith.select %453, %449, %454 : vector<8x128xi1>, vector<8x128xi32>
      %cst_169 = arith.constant dense<2147483647> : vector<8xi32>
      %456 = vector.multi_reduction <minsi>, %455, %cst_169 [1] : vector<8x128xi32> to vector<8xi32>
      %457 = vector.shape_cast %456 : vector<8xi32> to vector<8x1xi32>
      %458 = vector.broadcast %457 : vector<8x1xi32> to vector<8x128xi32>
      %459 = arith.cmpi eq, %449, %458 : vector<8x128xi32>
      %460 = arith.extui %459 : vector<8x128xi1> to vector<8x128xi32>
      %461 = arith.sitofp %460 : vector<8x128xi32> to vector<8x128xf32>
      %462 = arith.truncf %461 : vector<8x128xf32> to vector<8x128xbf16>
      %c0_170 = arith.constant 0 : index
      %c0_171 = arith.constant 0 : index
      %463 = vector.load %arg6[%c0_170, %c0_171] : memref<128x32xbf16, #tpu.memory_space<vmem>>, vector<128x32xbf16>
      %cst_172 = arith.constant dense<0.000000e+00> : vector<8x32xf32>
      %464 = tpu.matmul %462, %463, %cst_172 {dimension_numbers = #tpu.dot_dimension_numbers<[1], [0], [0], [1], [0, 0, 1, 1], [], []>} : vector<8x128xbf16>, vector<128x32xbf16>, vector<8x32xf32> -> vector<8x32xf32>
      %465 = arith.truncf %464 : vector<8x32xf32> to vector<8x32xbf16>
      %c0_173 = arith.constant 0 : index
      %c0_174 = arith.constant 0 : index
      %466 = vector.load %arg14[%c0_173, %c0_174] : memref<8x32xbf16, #tpu.memory_space<vmem>>, vector<8x32xbf16>
      tpu.vector_store %arg14[%c0_173, %c0_174], %465 {strides = array<i32>} : memref<8x32xbf16, #tpu.memory_space<vmem>>, vector<8x32xbf16>,
    } else {
    }
    %c0_57 = arith.constant 0 : index
    %c0_58 = arith.constant 0 : index
    %105 = vector.load %arg13[%c0_57, %c0_58] : memref<8x128xf32, #tpu.memory_space<vmem>>, vector<8x128xf32>
    %106 = arith.truncf %105 : vector<8x128xf32> to vector<8x128xbf16>
    %c1_59 = arith.constant 1 : index
    %107 = memref.load %arg0[%c1_59] : memref<5xi32, #tpu.memory_space<smem>>
    %c0_i32_60 = arith.constant 0 : i32
    %108 = arith.cmpi ne, %107, %c0_i32_60 : i32
    %c1_61 = arith.constant 1 : index
    %c0_62 = arith.constant 0 : index
    %c0_63 = arith.constant 0 : index
    %109 = vector.load %arg1[%c1_61, %c0_62, %c0_63] : memref<5x8x32xbf16, #tpu.memory_space<vmem>>, vector<1x8x32xbf16>
    %110 = vector.shape_cast %109 : vector<1x8x32xbf16> to vector<8x32xbf16>
    %c0_64 = arith.constant 0 : index
    %c0_65 = arith.constant 0 : index
    %111 = vector.load %arg14[%c0_64, %c0_65] : memref<8x32xbf16, #tpu.memory_space<vmem>>, vector<8x32xbf16>
    %112 = arith.select %108, %110, %111 : vector<8x32xbf16>
    %cst_66 = arith.constant dense<0.000000e+00> : vector<8x512xf32>
    %113 = tpu.matmul %106, %9, %cst_66 {dimension_numbers = #tpu.dot_dimension_numbers<[1], [0], [0], [1], [0, 0, 1, 1], [], []>} : vector<8x128xbf16>, vector<128x512xbf16>, vector<8x512xf32> -> vector<8x512xf32>
    %114 = vector.extract_strided_slice %113 {offsets = [0, 0], sizes = [8, 128], strides = [1, 1]} : vector<8x512xf32> to vector<8x128xf32>
    %115 = vector.extract_strided_slice %113 {offsets = [0, 128], sizes = [8, 384], strides = [1, 1]} : vector<8x512xf32> to vector<8x384xf32>
    %116 = vector.broadcast %2 : vector<1x384xf32> to vector<8x384xf32>
    %117 = arith.addf %115, %116 : vector<8x384xf32>
    %118 = vector.shape_cast %114 : vector<8x128xf32> to vector<8x1x128xf32>
    %119 = vector.broadcast %118 : vector<8x1x128xf32> to vector<8x8x128xf32>
    %120 = arith.addf %4, %119 : vector<8x8x128xf32>
    %121 = math.tanh %120 : vector<8x8x128xf32>
    %122 = vector.shape_cast %0 : vector<1x128xf32> to vector<1x1x128xf32>
    %123 = vector.broadcast %122 : vector<1x1x128xf32> to vector<8x8x128xf32>
    %124 = arith.mulf %121, %123 : vector<8x8x128xf32>
    %cst_67 = arith.constant dense<0.000000e+00> : vector<8x8xf32>
    %125 = vector.multi_reduction <add>, %124, %cst_67 [2] : vector<8x8x128xf32> to vector<8x8xf32>
    %cst_68 = arith.constant -1.000000e+10 : f32
    %126 = vector.broadcast %cst_68 : f32 to vector<8x8xf32>
    %127 = arith.select %8, %126, %125 : vector<8x8xi1>, vector<8x8xf32>
    %cst_69 = arith.constant dense<0xFF800000> : vector<8xf32>
    %128 = vector.multi_reduction <maximumf>, %127, %cst_69 [1] : vector<8x8xf32> to vector<8xf32>
    %129 = vector.shape_cast %128 : vector<8xf32> to vector<8x1xf32>
    %130 = vector.broadcast %129 : vector<8x1xf32> to vector<8x8xf32>
    %131 = arith.subf %127, %130 : vector<8x8xf32>
    %132 = math.exp %131 : vector<8x8xf32>
    %cst_70 = arith.constant dense<0.000000e+00> : vector<8xf32>
    %133 = vector.multi_reduction <add>, %132, %cst_70 [1] : vector<8x8xf32> to vector<8xf32>
    %134 = vector.shape_cast %133 : vector<8xf32> to vector<8x1xf32>
    %135 = tpu.reciprocal %134 {approx = true} : vector<8x1xf32> -> vector<8x1xf32>
    %136 = vector.broadcast %135 : vector<8x1xf32> to vector<8x8xf32>
    %137 = arith.mulf %132, %136 : vector<8x8xf32>
    %138 = vector.shape_cast %137 : vector<8x8xf32> to vector<8x1x8xf32>
    %139 = arith.truncf %138 : vector<8x1x8xf32> to vector<8x1x8xbf16>
    "tpu.trace_start"() <{level = 10 : i32, message = "bks,bsd->bkd"}> : () -> ()
    %cst_71 = arith.constant dense<0.000000e+00> : vector<8x1x64xf32>
    %140 = tpu.matmul %139, %5, %cst_71 {dimension_numbers = #tpu.dot_dimension_numbers<[2], [1], [1], [2], [0, 0, 0, 1, 1, 2], [0], [0]>} : vector<8x1x8xbf16>, vector<8x8x64xbf16>, vector<8x1x64xf32> -> vector<8x1x64xf32>
    "tpu.trace_stop"() : () -> ()
    %141 = vector.shape_cast %140 : vector<8x1x64xf32> to vector<8x64xf32>
    %142 = arith.truncf %141 : vector<8x64xf32> to vector<8x64xbf16>
    %cst_72 = arith.constant dense<0.000000e+00> : vector<8x512xf32>
    %143 = tpu.matmul %112, %10, %cst_72 {dimension_numbers = #tpu.dot_dimension_numbers<[1], [0], [0], [1], [0, 0, 1, 1], [], []>} : vector<8x32xbf16>, vector<32x512xbf16>, vector<8x512xf32> -> vector<8x512xf32>
    %cst_73 = arith.constant dense<0.000000e+00> : vector<8x512xf32>
    %144 = tpu.matmul %142, %11, %cst_73 {dimension_numbers = #tpu.dot_dimension_numbers<[1], [0], [0], [1], [0, 0, 1, 1], [], []>} : vector<8x64xbf16>, vector<64x512xbf16>, vector<8x512xf32> -> vector<8x512xf32>
    %145 = vector.extract_strided_slice %143 {offsets = [0, 0], sizes = [8, 384], strides = [1, 1]} : vector<8x512xf32> to vector<8x384xf32>
    %146 = vector.extract_strided_slice %144 {offsets = [0, 0], sizes = [8, 384], strides = [1, 1]} : vector<8x512xf32> to vector<8x384xf32>
    %147 = arith.addf %145, %146 : vector<8x384xf32>
    %148 = vector.broadcast %1 : vector<1x384xf32> to vector<8x384xf32>
    %149 = arith.addf %147, %148 : vector<8x384xf32>
    %150 = vector.extract_strided_slice %149 {offsets = [0, 0], sizes = [8, 128], strides = [1, 1]} : vector<8x384xf32> to vector<8x128xf32>
    %151 = vector.extract_strided_slice %117 {offsets = [0, 0], sizes = [8, 128], strides = [1, 1]} : vector<8x384xf32> to vector<8x128xf32>
    %152 = arith.addf %150, %151 : vector<8x128xf32>
    %153 = arith.negf %152 : vector<8x128xf32>
    %154 = math.exp %153 : vector<8x128xf32>
    %cst_74 = arith.constant 1.000000e+00 : f32
    %155 = vector.broadcast %cst_74 : f32 to vector<8x128xf32>
    %156 = arith.addf %155, %154 : vector<8x128xf32>
    %157 = arith.divf %155, %156 : vector<8x128xf32>
    %158 = vector.extract_strided_slice %149 {offsets = [0, 128], sizes = [8, 128], strides = [1, 1]} : vector<8x384xf32> to vector<8x128xf32>
    %159 = vector.extract_strided_slice %117 {offsets = [0, 128], sizes = [8, 128], strides = [1, 1]} : vector<8x384xf32> to vector<8x128xf32>
    %160 = arith.addf %158, %159 : vector<8x128xf32>
    %161 = arith.negf %160 : vector<8x128xf32>
    %162 = math.exp %161 : vector<8x128xf32>
    %cst_75 = arith.constant 1.000000e+00 : f32
    %163 = vector.broadcast %cst_75 : f32 to vector<8x128xf32>
    %164 = arith.addf %163, %162 : vector<8x128xf32>
    %165 = arith.divf %163, %164 : vector<8x128xf32>
    %166 = vector.extract_strided_slice %149 {offsets = [0, 256], sizes = [8, 128], strides = [1, 1]} : vector<8x384xf32> to vector<8x128xf32>
    %167 = vector.extract_strided_slice %117 {offsets = [0, 256], sizes = [8, 128], strides = [1, 1]} : vector<8x384xf32> to vector<8x128xf32>
    %168 = arith.mulf %157, %167 : vector<8x128xf32>
    %169 = arith.addf %166, %168 : vector<8x128xf32>
    %170 = math.tanh %169 : vector<8x128xf32>
    %cst_76 = arith.constant 1.000000e+00 : f32
    %171 = vector.broadcast %cst_76 : f32 to vector<8x128xf32>
    %172 = arith.subf %171, %165 : vector<8x128xf32>
    %173 = arith.mulf %172, %170 : vector<8x128xf32>
    %174 = arith.mulf %165, %105 : vector<8x128xf32>
    %175 = arith.addf %173, %174 : vector<8x128xf32>
    %c0_77 = arith.constant 0 : index
    %c0_78 = arith.constant 0 : index
    %176 = vector.load %arg13[%c0_77, %c0_78] : memref<8x128xf32, #tpu.memory_space<vmem>>, vector<8x128xf32>
    tpu.vector_store %arg13[%c0_77, %c0_78], %175 {strides = array<i32>} : memref<8x128xf32, #tpu.memory_space<vmem>>, vector<8x128xf32>,
    %177 = arith.truncf %175 : vector<8x128xf32> to vector<8x128xbf16>
    %cst_79 = arith.constant dense<0.000000e+00> : vector<8x128xf32>
    %178 = tpu.matmul %177, %12, %cst_79 {dimension_numbers = #tpu.dot_dimension_numbers<[1], [0], [0], [1], [0, 0, 1, 1], [], []>} : vector<8x128xbf16>, vector<128x128xbf16>, vector<8x128xf32> -> vector<8x128xf32>
    %179 = vector.extract_strided_slice %143 {offsets = [0, 384], sizes = [8, 128], strides = [1, 1]} : vector<8x512xf32> to vector<8x128xf32>
    %180 = arith.addf %178, %179 : vector<8x128xf32>
    %181 = vector.extract_strided_slice %144 {offsets = [0, 384], sizes = [8, 128], strides = [1, 1]} : vector<8x512xf32> to vector<8x128xf32>
    %182 = arith.addf %180, %181 : vector<8x128xf32>
    %183 = vector.broadcast %3 : vector<1x128xf32> to vector<8x128xf32>
    %184 = arith.addf %182, %183 : vector<8x128xf32>
    %c2_80 = arith.constant 2 : index
    %c0_81 = arith.constant 0 : index
    %c0_82 = arith.constant 0 : index
    %185 = vector.load %arg12[%c2_80, %c0_81, %c0_82] : memref<6x8x128xf32, #tpu.memory_space<vmem>>, vector<1x8x128xf32>
    %186 = vector.shape_cast %185 : vector<1x8x128xf32> to vector<8x128xf32>
    %187 = vector.shape_cast %184 : vector<8x128xf32> to vector<1x8x128xf32>
    tpu.vector_store %arg12[%c2_80, %c0_81, %c0_82], %187 {strides = array<i32>} : memref<6x8x128xf32, #tpu.memory_space<vmem>>, vector<1x8x128xf32>,
    %c2_83 = arith.constant 2 : index
    %188 = memref.load %arg0[%c2_83] : memref<5xi32, #tpu.memory_space<smem>>
    %c0_i32_84 = arith.constant 0 : i32
    %189 = arith.cmpi eq, %188, %c0_i32_84 : i32
    %190 = arith.extui %189 : i1 to i32
    %c0_i32_85 = arith.constant 0 : i32
    %191 = arith.cmpi ne, %190, %c0_i32_85 : i32
    scf.if %191 {
      %449 = tpu.iota {dimensions = array<i32: 1>} : vector<8x128xi32>
      %cst_168 = arith.constant dense<0xFF800000> : vector<8xf32>
      %450 = vector.multi_reduction <maximumf>, %184, %cst_168 [1] : vector<8x128xf32> to vector<8xf32>
      %451 = vector.shape_cast %450 : vector<8xf32> to vector<8x1xf32>
      %452 = vector.broadcast %451 : vector<8x1xf32> to vector<8x128xf32>
      %453 = arith.cmpf oeq, %184, %452 : vector<8x128xf32>
      %c128_i32 = arith.constant 128 : i32
      %454 = vector.broadcast %c128_i32 : i32 to vector<8x128xi32>
      %455 = arith.select %453, %449, %454 : vector<8x128xi1>, vector<8x128xi32>
      %cst_169 = arith.constant dense<2147483647> : vector<8xi32>
      %456 = vector.multi_reduction <minsi>, %455, %cst_169 [1] : vector<8x128xi32> to vector<8xi32>
      %457 = vector.shape_cast %456 : vector<8xi32> to vector<8x1xi32>
      %458 = vector.broadcast %457 : vector<8x1xi32> to vector<8x128xi32>
      %459 = arith.cmpi eq, %449, %458 : vector<8x128xi32>
      %460 = arith.extui %459 : vector<8x128xi1> to vector<8x128xi32>
      %461 = arith.sitofp %460 : vector<8x128xi32> to vector<8x128xf32>
      %462 = arith.truncf %461 : vector<8x128xf32> to vector<8x128xbf16>
      %c0_170 = arith.constant 0 : index
      %c0_171 = arith.constant 0 : index
      %463 = vector.load %arg6[%c0_170, %c0_171] : memref<128x32xbf16, #tpu.memory_space<vmem>>, vector<128x32xbf16>
      %cst_172 = arith.constant dense<0.000000e+00> : vector<8x32xf32>
      %464 = tpu.matmul %462, %463, %cst_172 {dimension_numbers = #tpu.dot_dimension_numbers<[1], [0], [0], [1], [0, 0, 1, 1], [], []>} : vector<8x128xbf16>, vector<128x32xbf16>, vector<8x32xf32> -> vector<8x32xf32>
      %465 = arith.truncf %464 : vector<8x32xf32> to vector<8x32xbf16>
      %c0_173 = arith.constant 0 : index
      %c0_174 = arith.constant 0 : index
      %466 = vector.load %arg14[%c0_173, %c0_174] : memref<8x32xbf16, #tpu.memory_space<vmem>>, vector<8x32xbf16>
      tpu.vector_store %arg14[%c0_173, %c0_174], %465 {strides = array<i32>} : memref<8x32xbf16, #tpu.memory_space<vmem>>, vector<8x32xbf16>,
    } else {
    }
    %c0_86 = arith.constant 0 : index
    %c0_87 = arith.constant 0 : index
    %192 = vector.load %arg13[%c0_86, %c0_87] : memref<8x128xf32, #tpu.memory_space<vmem>>, vector<8x128xf32>
    %193 = arith.truncf %192 : vector<8x128xf32> to vector<8x128xbf16>
    %c2_88 = arith.constant 2 : index
    %194 = memref.load %arg0[%c2_88] : memref<5xi32, #tpu.memory_space<smem>>
    %c0_i32_89 = arith.constant 0 : i32
    %195 = arith.cmpi ne, %194, %c0_i32_89 : i32
    %c2_90 = arith.constant 2 : index
    %c0_91 = arith.constant 0 : index
    %c0_92 = arith.constant 0 : index
    %196 = vector.load %arg1[%c2_90, %c0_91, %c0_92] : memref<5x8x32xbf16, #tpu.memory_space<vmem>>, vector<1x8x32xbf16>
    %197 = vector.shape_cast %196 : vector<1x8x32xbf16> to vector<8x32xbf16>
    %c0_93 = arith.constant 0 : index
    %c0_94 = arith.constant 0 : index
    %198 = vector.load %arg14[%c0_93, %c0_94] : memref<8x32xbf16, #tpu.memory_space<vmem>>, vector<8x32xbf16>
    %199 = arith.select %195, %197, %198 : vector<8x32xbf16>
    %cst_95 = arith.constant dense<0.000000e+00> : vector<8x512xf32>
    %200 = tpu.matmul %193, %9, %cst_95 {dimension_numbers = #tpu.dot_dimension_numbers<[1], [0], [0], [1], [0, 0, 1, 1], [], []>} : vector<8x128xbf16>, vector<128x512xbf16>, vector<8x512xf32> -> vector<8x512xf32>
    %201 = vector.extract_strided_slice %200 {offsets = [0, 0], sizes = [8, 128], strides = [1, 1]} : vector<8x512xf32> to vector<8x128xf32>
    %202 = vector.extract_strided_slice %200 {offsets = [0, 128], sizes = [8, 384], strides = [1, 1]} : vector<8x512xf32> to vector<8x384xf32>
    %203 = vector.broadcast %2 : vector<1x384xf32> to vector<8x384xf32>
    %204 = arith.addf %202, %203 : vector<8x384xf32>
    %205 = vector.shape_cast %201 : vector<8x128xf32> to vector<8x1x128xf32>
    %206 = vector.broadcast %205 : vector<8x1x128xf32> to vector<8x8x128xf32>
    %207 = arith.addf %4, %206 : vector<8x8x128xf32>
    %208 = math.tanh %207 : vector<8x8x128xf32>
    %209 = vector.shape_cast %0 : vector<1x128xf32> to vector<1x1x128xf32>
    %210 = vector.broadcast %209 : vector<1x1x128xf32> to vector<8x8x128xf32>
    %211 = arith.mulf %208, %210 : vector<8x8x128xf32>
    %cst_96 = arith.constant dense<0.000000e+00> : vector<8x8xf32>
    %212 = vector.multi_reduction <add>, %211, %cst_96 [2] : vector<8x8x128xf32> to vector<8x8xf32>
    %cst_97 = arith.constant -1.000000e+10 : f32
    %213 = vector.broadcast %cst_97 : f32 to vector<8x8xf32>
    %214 = arith.select %8, %213, %212 : vector<8x8xi1>, vector<8x8xf32>
    %cst_98 = arith.constant dense<0xFF800000> : vector<8xf32>
    %215 = vector.multi_reduction <maximumf>, %214, %cst_98 [1] : vector<8x8xf32> to vector<8xf32>
    %216 = vector.shape_cast %215 : vector<8xf32> to vector<8x1xf32>
    %217 = vector.broadcast %216 : vector<8x1xf32> to vector<8x8xf32>
    %218 = arith.subf %214, %217 : vector<8x8xf32>
    %219 = math.exp %218 : vector<8x8xf32>
    %cst_99 = arith.constant dense<0.000000e+00> : vector<8xf32>
    %220 = vector.multi_reduction <add>, %219, %cst_99 [1] : vector<8x8xf32> to vector<8xf32>
    %221 = vector.shape_cast %220 : vector<8xf32> to vector<8x1xf32>
    %222 = tpu.reciprocal %221 {approx = true} : vector<8x1xf32> -> vector<8x1xf32>
    %223 = vector.broadcast %222 : vector<8x1xf32> to vector<8x8xf32>
    %224 = arith.mulf %219, %223 : vector<8x8xf32>
    %225 = vector.shape_cast %224 : vector<8x8xf32> to vector<8x1x8xf32>
    %226 = arith.truncf %225 : vector<8x1x8xf32> to vector<8x1x8xbf16>
    "tpu.trace_start"() <{level = 10 : i32, message = "bks,bsd->bkd"}> : () -> ()
    %cst_100 = arith.constant dense<0.000000e+00> : vector<8x1x64xf32>
    %227 = tpu.matmul %226, %5, %cst_100 {dimension_numbers = #tpu.dot_dimension_numbers<[2], [1], [1], [2], [0, 0, 0, 1, 1, 2], [0], [0]>} : vector<8x1x8xbf16>, vector<8x8x64xbf16>, vector<8x1x64xf32> -> vector<8x1x64xf32>
    "tpu.trace_stop"() : () -> ()
    %228 = vector.shape_cast %227 : vector<8x1x64xf32> to vector<8x64xf32>
    %229 = arith.truncf %228 : vector<8x64xf32> to vector<8x64xbf16>
    %cst_101 = arith.constant dense<0.000000e+00> : vector<8x512xf32>
    %230 = tpu.matmul %199, %10, %cst_101 {dimension_numbers = #tpu.dot_dimension_numbers<[1], [0], [0], [1], [0, 0, 1, 1], [], []>} : vector<8x32xbf16>, vector<32x512xbf16>, vector<8x512xf32> -> vector<8x512xf32>
    %cst_102 = arith.constant dense<0.000000e+00> : vector<8x512xf32>
    %231 = tpu.matmul %229, %11, %cst_102 {dimension_numbers = #tpu.dot_dimension_numbers<[1], [0], [0], [1], [0, 0, 1, 1], [], []>} : vector<8x64xbf16>, vector<64x512xbf16>, vector<8x512xf32> -> vector<8x512xf32>
    %232 = vector.extract_strided_slice %230 {offsets = [0, 0], sizes = [8, 384], strides = [1, 1]} : vector<8x512xf32> to vector<8x384xf32>
    %233 = vector.extract_strided_slice %231 {offsets = [0, 0], sizes = [8, 384], strides = [1, 1]} : vector<8x512xf32> to vector<8x384xf32>
    %234 = arith.addf %232, %233 : vector<8x384xf32>
    %235 = vector.broadcast %1 : vector<1x384xf32> to vector<8x384xf32>
    %236 = arith.addf %234, %235 : vector<8x384xf32>
    %237 = vector.extract_strided_slice %236 {offsets = [0, 0], sizes = [8, 128], strides = [1, 1]} : vector<8x384xf32> to vector<8x128xf32>
    %238 = vector.extract_strided_slice %204 {offsets = [0, 0], sizes = [8, 128], strides = [1, 1]} : vector<8x384xf32> to vector<8x128xf32>
    %239 = arith.addf %237, %238 : vector<8x128xf32>
    %240 = arith.negf %239 : vector<8x128xf32>
    %241 = math.exp %240 : vector<8x128xf32>
    %cst_103 = arith.constant 1.000000e+00 : f32
    %242 = vector.broadcast %cst_103 : f32 to vector<8x128xf32>
    %243 = arith.addf %242, %241 : vector<8x128xf32>
    %244 = arith.divf %242, %243 : vector<8x128xf32>
    %245 = vector.extract_strided_slice %236 {offsets = [0, 128], sizes = [8, 128], strides = [1, 1]} : vector<8x384xf32> to vector<8x128xf32>
    %246 = vector.extract_strided_slice %204 {offsets = [0, 128], sizes = [8, 128], strides = [1, 1]} : vector<8x384xf32> to vector<8x128xf32>
    %247 = arith.addf %245, %246 : vector<8x128xf32>
    %248 = arith.negf %247 : vector<8x128xf32>
    %249 = math.exp %248 : vector<8x128xf32>
    %cst_104 = arith.constant 1.000000e+00 : f32
    %250 = vector.broadcast %cst_104 : f32 to vector<8x128xf32>
    %251 = arith.addf %250, %249 : vector<8x128xf32>
    %252 = arith.divf %250, %251 : vector<8x128xf32>
    %253 = vector.extract_strided_slice %236 {offsets = [0, 256], sizes = [8, 128], strides = [1, 1]} : vector<8x384xf32> to vector<8x128xf32>
    %254 = vector.extract_strided_slice %204 {offsets = [0, 256], sizes = [8, 128], strides = [1, 1]} : vector<8x384xf32> to vector<8x128xf32>
    %255 = arith.mulf %244, %254 : vector<8x128xf32>
    %256 = arith.addf %253, %255 : vector<8x128xf32>
    %257 = math.tanh %256 : vector<8x128xf32>
    %cst_105 = arith.constant 1.000000e+00 : f32
    %258 = vector.broadcast %cst_105 : f32 to vector<8x128xf32>
    %259 = arith.subf %258, %252 : vector<8x128xf32>
    %260 = arith.mulf %259, %257 : vector<8x128xf32>
    %261 = arith.mulf %252, %192 : vector<8x128xf32>
    %262 = arith.addf %260, %261 : vector<8x128xf32>
    %c0_106 = arith.constant 0 : index
    %c0_107 = arith.constant 0 : index
    %263 = vector.load %arg13[%c0_106, %c0_107] : memref<8x128xf32, #tpu.memory_space<vmem>>, vector<8x128xf32>
    tpu.vector_store %arg13[%c0_106, %c0_107], %262 {strides = array<i32>} : memref<8x128xf32, #tpu.memory_space<vmem>>, vector<8x128xf32>,
    %264 = arith.truncf %262 : vector<8x128xf32> to vector<8x128xbf16>
    %cst_108 = arith.constant dense<0.000000e+00> : vector<8x128xf32>
    %265 = tpu.matmul %264, %12, %cst_108 {dimension_numbers = #tpu.dot_dimension_numbers<[1], [0], [0], [1], [0, 0, 1, 1], [], []>} : vector<8x128xbf16>, vector<128x128xbf16>, vector<8x128xf32> -> vector<8x128xf32>
    %266 = vector.extract_strided_slice %230 {offsets = [0, 384], sizes = [8, 128], strides = [1, 1]} : vector<8x512xf32> to vector<8x128xf32>
    %267 = arith.addf %265, %266 : vector<8x128xf32>
    %268 = vector.extract_strided_slice %231 {offsets = [0, 384], sizes = [8, 128], strides = [1, 1]} : vector<8x512xf32> to vector<8x128xf32>
    %269 = arith.addf %267, %268 : vector<8x128xf32>
    %270 = vector.broadcast %3 : vector<1x128xf32> to vector<8x128xf32>
    %271 = arith.addf %269, %270 : vector<8x128xf32>
    %c3_109 = arith.constant 3 : index
    %c0_110 = arith.constant 0 : index
    %c0_111 = arith.constant 0 : index
    %272 = vector.load %arg12[%c3_109, %c0_110, %c0_111] : memref<6x8x128xf32, #tpu.memory_space<vmem>>, vector<1x8x128xf32>
    %273 = vector.shape_cast %272 : vector<1x8x128xf32> to vector<8x128xf32>
    %274 = vector.shape_cast %271 : vector<8x128xf32> to vector<1x8x128xf32>
    tpu.vector_store %arg12[%c3_109, %c0_110, %c0_111], %274 {strides = array<i32>} : memref<6x8x128xf32, #tpu.memory_space<vmem>>, vector<1x8x128xf32>,
    %c3_112 = arith.constant 3 : index
    %275 = memref.load %arg0[%c3_112] : memref<5xi32, #tpu.memory_space<smem>>
    %c0_i32_113 = arith.constant 0 : i32
    %276 = arith.cmpi eq, %275, %c0_i32_113 : i32
    %277 = arith.extui %276 : i1 to i32
    %c0_i32_114 = arith.constant 0 : i32
    %278 = arith.cmpi ne, %277, %c0_i32_114 : i32
    scf.if %278 {
      %449 = tpu.iota {dimensions = array<i32: 1>} : vector<8x128xi32>
      %cst_168 = arith.constant dense<0xFF800000> : vector<8xf32>
      %450 = vector.multi_reduction <maximumf>, %271, %cst_168 [1] : vector<8x128xf32> to vector<8xf32>
      %451 = vector.shape_cast %450 : vector<8xf32> to vector<8x1xf32>
      %452 = vector.broadcast %451 : vector<8x1xf32> to vector<8x128xf32>
      %453 = arith.cmpf oeq, %271, %452 : vector<8x128xf32>
      %c128_i32 = arith.constant 128 : i32
      %454 = vector.broadcast %c128_i32 : i32 to vector<8x128xi32>
      %455 = arith.select %453, %449, %454 : vector<8x128xi1>, vector<8x128xi32>
      %cst_169 = arith.constant dense<2147483647> : vector<8xi32>
      %456 = vector.multi_reduction <minsi>, %455, %cst_169 [1] : vector<8x128xi32> to vector<8xi32>
      %457 = vector.shape_cast %456 : vector<8xi32> to vector<8x1xi32>
      %458 = vector.broadcast %457 : vector<8x1xi32> to vector<8x128xi32>
      %459 = arith.cmpi eq, %449, %458 : vector<8x128xi32>
      %460 = arith.extui %459 : vector<8x128xi1> to vector<8x128xi32>
      %461 = arith.sitofp %460 : vector<8x128xi32> to vector<8x128xf32>
      %462 = arith.truncf %461 : vector<8x128xf32> to vector<8x128xbf16>
      %c0_170 = arith.constant 0 : index
      %c0_171 = arith.constant 0 : index
      %463 = vector.load %arg6[%c0_170, %c0_171] : memref<128x32xbf16, #tpu.memory_space<vmem>>, vector<128x32xbf16>
      %cst_172 = arith.constant dense<0.000000e+00> : vector<8x32xf32>
      %464 = tpu.matmul %462, %463, %cst_172 {dimension_numbers = #tpu.dot_dimension_numbers<[1], [0], [0], [1], [0, 0, 1, 1], [], []>} : vector<8x128xbf16>, vector<128x32xbf16>, vector<8x32xf32> -> vector<8x32xf32>
      %465 = arith.truncf %464 : vector<8x32xf32> to vector<8x32xbf16>
      %c0_173 = arith.constant 0 : index
      %c0_174 = arith.constant 0 : index
      %466 = vector.load %arg14[%c0_173, %c0_174] : memref<8x32xbf16, #tpu.memory_space<vmem>>, vector<8x32xbf16>
      tpu.vector_store %arg14[%c0_173, %c0_174], %465 {strides = array<i32>} : memref<8x32xbf16, #tpu.memory_space<vmem>>, vector<8x32xbf16>,
    } else {
    }
    %c0_115 = arith.constant 0 : index
    %c0_116 = arith.constant 0 : index
    %279 = vector.load %arg13[%c0_115, %c0_116] : memref<8x128xf32, #tpu.memory_space<vmem>>, vector<8x128xf32>
    %280 = arith.truncf %279 : vector<8x128xf32> to vector<8x128xbf16>
    %c3_117 = arith.constant 3 : index
    %281 = memref.load %arg0[%c3_117] : memref<5xi32, #tpu.memory_space<smem>>
    %c0_i32_118 = arith.constant 0 : i32
    %282 = arith.cmpi ne, %281, %c0_i32_118 : i32
    %c3_119 = arith.constant 3 : index
    %c0_120 = arith.constant 0 : index
    %c0_121 = arith.constant 0 : index
    %283 = vector.load %arg1[%c3_119, %c0_120, %c0_121] : memref<5x8x32xbf16, #tpu.memory_space<vmem>>, vector<1x8x32xbf16>
    %284 = vector.shape_cast %283 : vector<1x8x32xbf16> to vector<8x32xbf16>
    %c0_122 = arith.constant 0 : index
    %c0_123 = arith.constant 0 : index
    %285 = vector.load %arg14[%c0_122, %c0_123] : memref<8x32xbf16, #tpu.memory_space<vmem>>, vector<8x32xbf16>
    %286 = arith.select %282, %284, %285 : vector<8x32xbf16>
    %cst_124 = arith.constant dense<0.000000e+00> : vector<8x512xf32>
    %287 = tpu.matmul %280, %9, %cst_124 {dimension_numbers = #tpu.dot_dimension_numbers<[1], [0], [0], [1], [0, 0, 1, 1], [], []>} : vector<8x128xbf16>, vector<128x512xbf16>, vector<8x512xf32> -> vector<8x512xf32>
    %288 = vector.extract_strided_slice %287 {offsets = [0, 0], sizes = [8, 128], strides = [1, 1]} : vector<8x512xf32> to vector<8x128xf32>
    %289 = vector.extract_strided_slice %287 {offsets = [0, 128], sizes = [8, 384], strides = [1, 1]} : vector<8x512xf32> to vector<8x384xf32>
    %290 = vector.broadcast %2 : vector<1x384xf32> to vector<8x384xf32>
    %291 = arith.addf %289, %290 : vector<8x384xf32>
    %292 = vector.shape_cast %288 : vector<8x128xf32> to vector<8x1x128xf32>
    %293 = vector.broadcast %292 : vector<8x1x128xf32> to vector<8x8x128xf32>
    %294 = arith.addf %4, %293 : vector<8x8x128xf32>
    %295 = math.tanh %294 : vector<8x8x128xf32>
    %296 = vector.shape_cast %0 : vector<1x128xf32> to vector<1x1x128xf32>
    %297 = vector.broadcast %296 : vector<1x1x128xf32> to vector<8x8x128xf32>
    %298 = arith.mulf %295, %297 : vector<8x8x128xf32>
    %cst_125 = arith.constant dense<0.000000e+00> : vector<8x8xf32>
    %299 = vector.multi_reduction <add>, %298, %cst_125 [2] : vector<8x8x128xf32> to vector<8x8xf32>
    %cst_126 = arith.constant -1.000000e+10 : f32
    %300 = vector.broadcast %cst_126 : f32 to vector<8x8xf32>
    %301 = arith.select %8, %300, %299 : vector<8x8xi1>, vector<8x8xf32>
    %cst_127 = arith.constant dense<0xFF800000> : vector<8xf32>
    %302 = vector.multi_reduction <maximumf>, %301, %cst_127 [1] : vector<8x8xf32> to vector<8xf32>
    %303 = vector.shape_cast %302 : vector<8xf32> to vector<8x1xf32>
    %304 = vector.broadcast %303 : vector<8x1xf32> to vector<8x8xf32>
    %305 = arith.subf %301, %304 : vector<8x8xf32>
    %306 = math.exp %305 : vector<8x8xf32>
    %cst_128 = arith.constant dense<0.000000e+00> : vector<8xf32>
    %307 = vector.multi_reduction <add>, %306, %cst_128 [1] : vector<8x8xf32> to vector<8xf32>
    %308 = vector.shape_cast %307 : vector<8xf32> to vector<8x1xf32>
    %309 = tpu.reciprocal %308 {approx = true} : vector<8x1xf32> -> vector<8x1xf32>
    %310 = vector.broadcast %309 : vector<8x1xf32> to vector<8x8xf32>
    %311 = arith.mulf %306, %310 : vector<8x8xf32>
    %312 = vector.shape_cast %311 : vector<8x8xf32> to vector<8x1x8xf32>
    %313 = arith.truncf %312 : vector<8x1x8xf32> to vector<8x1x8xbf16>
    "tpu.trace_start"() <{level = 10 : i32, message = "bks,bsd->bkd"}> : () -> ()
    %cst_129 = arith.constant dense<0.000000e+00> : vector<8x1x64xf32>
    %314 = tpu.matmul %313, %5, %cst_129 {dimension_numbers = #tpu.dot_dimension_numbers<[2], [1], [1], [2], [0, 0, 0, 1, 1, 2], [0], [0]>} : vector<8x1x8xbf16>, vector<8x8x64xbf16>, vector<8x1x64xf32> -> vector<8x1x64xf32>
    "tpu.trace_stop"() : () -> ()
    %315 = vector.shape_cast %314 : vector<8x1x64xf32> to vector<8x64xf32>
    %316 = arith.truncf %315 : vector<8x64xf32> to vector<8x64xbf16>
    %cst_130 = arith.constant dense<0.000000e+00> : vector<8x512xf32>
    %317 = tpu.matmul %286, %10, %cst_130 {dimension_numbers = #tpu.dot_dimension_numbers<[1], [0], [0], [1], [0, 0, 1, 1], [], []>} : vector<8x32xbf16>, vector<32x512xbf16>, vector<8x512xf32> -> vector<8x512xf32>
    %cst_131 = arith.constant dense<0.000000e+00> : vector<8x512xf32>
    %318 = tpu.matmul %316, %11, %cst_131 {dimension_numbers = #tpu.dot_dimension_numbers<[1], [0], [0], [1], [0, 0, 1, 1], [], []>} : vector<8x64xbf16>, vector<64x512xbf16>, vector<8x512xf32> -> vector<8x512xf32>
    %319 = vector.extract_strided_slice %317 {offsets = [0, 0], sizes = [8, 384], strides = [1, 1]} : vector<8x512xf32> to vector<8x384xf32>
    %320 = vector.extract_strided_slice %318 {offsets = [0, 0], sizes = [8, 384], strides = [1, 1]} : vector<8x512xf32> to vector<8x384xf32>
    %321 = arith.addf %319, %320 : vector<8x384xf32>
    %322 = vector.broadcast %1 : vector<1x384xf32> to vector<8x384xf32>
    %323 = arith.addf %321, %322 : vector<8x384xf32>
    %324 = vector.extract_strided_slice %323 {offsets = [0, 0], sizes = [8, 128], strides = [1, 1]} : vector<8x384xf32> to vector<8x128xf32>
    %325 = vector.extract_strided_slice %291 {offsets = [0, 0], sizes = [8, 128], strides = [1, 1]} : vector<8x384xf32> to vector<8x128xf32>
    %326 = arith.addf %324, %325 : vector<8x128xf32>
    %327 = arith.negf %326 : vector<8x128xf32>
    %328 = math.exp %327 : vector<8x128xf32>
    %cst_132 = arith.constant 1.000000e+00 : f32
    %329 = vector.broadcast %cst_132 : f32 to vector<8x128xf32>
    %330 = arith.addf %329, %328 : vector<8x128xf32>
    %331 = arith.divf %329, %330 : vector<8x128xf32>
    %332 = vector.extract_strided_slice %323 {offsets = [0, 128], sizes = [8, 128], strides = [1, 1]} : vector<8x384xf32> to vector<8x128xf32>
    %333 = vector.extract_strided_slice %291 {offsets = [0, 128], sizes = [8, 128], strides = [1, 1]} : vector<8x384xf32> to vector<8x128xf32>
    %334 = arith.addf %332, %333 : vector<8x128xf32>
    %335 = arith.negf %334 : vector<8x128xf32>
    %336 = math.exp %335 : vector<8x128xf32>
    %cst_133 = arith.constant 1.000000e+00 : f32
    %337 = vector.broadcast %cst_133 : f32 to vector<8x128xf32>
    %338 = arith.addf %337, %336 : vector<8x128xf32>
    %339 = arith.divf %337, %338 : vector<8x128xf32>
    %340 = vector.extract_strided_slice %323 {offsets = [0, 256], sizes = [8, 128], strides = [1, 1]} : vector<8x384xf32> to vector<8x128xf32>
    %341 = vector.extract_strided_slice %291 {offsets = [0, 256], sizes = [8, 128], strides = [1, 1]} : vector<8x384xf32> to vector<8x128xf32>
    %342 = arith.mulf %331, %341 : vector<8x128xf32>
    %343 = arith.addf %340, %342 : vector<8x128xf32>
    %344 = math.tanh %343 : vector<8x128xf32>
    %cst_134 = arith.constant 1.000000e+00 : f32
    %345 = vector.broadcast %cst_134 : f32 to vector<8x128xf32>
    %346 = arith.subf %345, %339 : vector<8x128xf32>
    %347 = arith.mulf %346, %344 : vector<8x128xf32>
    %348 = arith.mulf %339, %279 : vector<8x128xf32>
    %349 = arith.addf %347, %348 : vector<8x128xf32>
    %c0_135 = arith.constant 0 : index
    %c0_136 = arith.constant 0 : index
    %350 = vector.load %arg13[%c0_135, %c0_136] : memref<8x128xf32, #tpu.memory_space<vmem>>, vector<8x128xf32>
    tpu.vector_store %arg13[%c0_135, %c0_136], %349 {strides = array<i32>} : memref<8x128xf32, #tpu.memory_space<vmem>>, vector<8x128xf32>,
    %351 = arith.truncf %349 : vector<8x128xf32> to vector<8x128xbf16>
    %cst_137 = arith.constant dense<0.000000e+00> : vector<8x128xf32>
    %352 = tpu.matmul %351, %12, %cst_137 {dimension_numbers = #tpu.dot_dimension_numbers<[1], [0], [0], [1], [0, 0, 1, 1], [], []>} : vector<8x128xbf16>, vector<128x128xbf16>, vector<8x128xf32> -> vector<8x128xf32>
    %353 = vector.extract_strided_slice %317 {offsets = [0, 384], sizes = [8, 128], strides = [1, 1]} : vector<8x512xf32> to vector<8x128xf32>
    %354 = arith.addf %352, %353 : vector<8x128xf32>
    %355 = vector.extract_strided_slice %318 {offsets = [0, 384], sizes = [8, 128], strides = [1, 1]} : vector<8x512xf32> to vector<8x128xf32>
    %356 = arith.addf %354, %355 : vector<8x128xf32>
    %357 = vector.broadcast %3 : vector<1x128xf32> to vector<8x128xf32>
    %358 = arith.addf %356, %357 : vector<8x128xf32>
    %c4 = arith.constant 4 : index
    %c0_138 = arith.constant 0 : index
    %c0_139 = arith.constant 0 : index
    %359 = vector.load %arg12[%c4, %c0_138, %c0_139] : memref<6x8x128xf32, #tpu.memory_space<vmem>>, vector<1x8x128xf32>
    %360 = vector.shape_cast %359 : vector<1x8x128xf32> to vector<8x128xf32>
    %361 = vector.shape_cast %358 : vector<8x128xf32> to vector<1x8x128xf32>
    tpu.vector_store %arg12[%c4, %c0_138, %c0_139], %361 {strides = array<i32>} : memref<6x8x128xf32, #tpu.memory_space<vmem>>, vector<1x8x128xf32>,
    %c4_140 = arith.constant 4 : index
    %362 = memref.load %arg0[%c4_140] : memref<5xi32, #tpu.memory_space<smem>>
    %c0_i32_141 = arith.constant 0 : i32
    %363 = arith.cmpi eq, %362, %c0_i32_141 : i32
    %364 = arith.extui %363 : i1 to i32
    %c0_i32_142 = arith.constant 0 : i32
    %365 = arith.cmpi ne, %364, %c0_i32_142 : i32
    scf.if %365 {
      %449 = tpu.iota {dimensions = array<i32: 1>} : vector<8x128xi32>
      %cst_168 = arith.constant dense<0xFF800000> : vector<8xf32>
      %450 = vector.multi_reduction <maximumf>, %358, %cst_168 [1] : vector<8x128xf32> to vector<8xf32>
      %451 = vector.shape_cast %450 : vector<8xf32> to vector<8x1xf32>
      %452 = vector.broadcast %451 : vector<8x1xf32> to vector<8x128xf32>
      %453 = arith.cmpf oeq, %358, %452 : vector<8x128xf32>
      %c128_i32 = arith.constant 128 : i32
      %454 = vector.broadcast %c128_i32 : i32 to vector<8x128xi32>
      %455 = arith.select %453, %449, %454 : vector<8x128xi1>, vector<8x128xi32>
      %cst_169 = arith.constant dense<2147483647> : vector<8xi32>
      %456 = vector.multi_reduction <minsi>, %455, %cst_169 [1] : vector<8x128xi32> to vector<8xi32>
      %457 = vector.shape_cast %456 : vector<8xi32> to vector<8x1xi32>
      %458 = vector.broadcast %457 : vector<8x1xi32> to vector<8x128xi32>
      %459 = arith.cmpi eq, %449, %458 : vector<8x128xi32>
      %460 = arith.extui %459 : vector<8x128xi1> to vector<8x128xi32>
      %461 = arith.sitofp %460 : vector<8x128xi32> to vector<8x128xf32>
      %462 = arith.truncf %461 : vector<8x128xf32> to vector<8x128xbf16>
      %c0_170 = arith.constant 0 : index
      %c0_171 = arith.constant 0 : index
      %463 = vector.load %arg6[%c0_170, %c0_171] : memref<128x32xbf16, #tpu.memory_space<vmem>>, vector<128x32xbf16>
      %cst_172 = arith.constant dense<0.000000e+00> : vector<8x32xf32>
      %464 = tpu.matmul %462, %463, %cst_172 {dimension_numbers = #tpu.dot_dimension_numbers<[1], [0], [0], [1], [0, 0, 1, 1], [], []>} : vector<8x128xbf16>, vector<128x32xbf16>, vector<8x32xf32> -> vector<8x32xf32>
      %465 = arith.truncf %464 : vector<8x32xf32> to vector<8x32xbf16>
      %c0_173 = arith.constant 0 : index
      %c0_174 = arith.constant 0 : index
      %466 = vector.load %arg14[%c0_173, %c0_174] : memref<8x32xbf16, #tpu.memory_space<vmem>>, vector<8x32xbf16>
      tpu.vector_store %arg14[%c0_173, %c0_174], %465 {strides = array<i32>} : memref<8x32xbf16, #tpu.memory_space<vmem>>, vector<8x32xbf16>,
    } else {
    }
    %c0_143 = arith.constant 0 : index
    %c0_144 = arith.constant 0 : index
    %366 = vector.load %arg13[%c0_143, %c0_144] : memref<8x128xf32, #tpu.memory_space<vmem>>, vector<8x128xf32>
    %367 = arith.truncf %366 : vector<8x128xf32> to vector<8x128xbf16>
    %c4_145 = arith.constant 4 : index
    %368 = memref.load %arg0[%c4_145] : memref<5xi32, #tpu.memory_space<smem>>
    %c0_i32_146 = arith.constant 0 : i32
    %369 = arith.cmpi ne, %368, %c0_i32_146 : i32
    %c4_147 = arith.constant 4 : index
    %c0_148 = arith.constant 0 : index
    %c0_149 = arith.constant 0 : index
    %370 = vector.load %arg1[%c4_147, %c0_148, %c0_149] : memref<5x8x32xbf16, #tpu.memory_space<vmem>>, vector<1x8x32xbf16>
    %371 = vector.shape_cast %370 : vector<1x8x32xbf16> to vector<8x32xbf16>
    %c0_150 = arith.constant 0 : index
    %c0_151 = arith.constant 0 : index
    %372 = vector.load %arg14[%c0_150, %c0_151] : memref<8x32xbf16, #tpu.memory_space<vmem>>, vector<8x32xbf16>
    %373 = arith.select %369, %371, %372 : vector<8x32xbf16>
    %cst_152 = arith.constant dense<0.000000e+00> : vector<8x512xf32>
    %374 = tpu.matmul %367, %9, %cst_152 {dimension_numbers = #tpu.dot_dimension_numbers<[1], [0], [0], [1], [0, 0, 1, 1], [], []>} : vector<8x128xbf16>, vector<128x512xbf16>, vector<8x512xf32> -> vector<8x512xf32>
    %375 = vector.extract_strided_slice %374 {offsets = [0, 0], sizes = [8, 128], strides = [1, 1]} : vector<8x512xf32> to vector<8x128xf32>
    %376 = vector.extract_strided_slice %374 {offsets = [0, 128], sizes = [8, 384], strides = [1, 1]} : vector<8x512xf32> to vector<8x384xf32>
    %377 = vector.broadcast %2 : vector<1x384xf32> to vector<8x384xf32>
    %378 = arith.addf %376, %377 : vector<8x384xf32>
    %379 = vector.shape_cast %375 : vector<8x128xf32> to vector<8x1x128xf32>
    %380 = vector.broadcast %379 : vector<8x1x128xf32> to vector<8x8x128xf32>
    %381 = arith.addf %4, %380 : vector<8x8x128xf32>
    %382 = math.tanh %381 : vector<8x8x128xf32>
    %383 = vector.shape_cast %0 : vector<1x128xf32> to vector<1x1x128xf32>
    %384 = vector.broadcast %383 : vector<1x1x128xf32> to vector<8x8x128xf32>
    %385 = arith.mulf %382, %384 : vector<8x8x128xf32>
    %cst_153 = arith.constant dense<0.000000e+00> : vector<8x8xf32>
    %386 = vector.multi_reduction <add>, %385, %cst_153 [2] : vector<8x8x128xf32> to vector<8x8xf32>
    %cst_154 = arith.constant -1.000000e+10 : f32
    %387 = vector.broadcast %cst_154 : f32 to vector<8x8xf32>
    %388 = arith.select %8, %387, %386 : vector<8x8xi1>, vector<8x8xf32>
    %cst_155 = arith.constant dense<0xFF800000> : vector<8xf32>
    %389 = vector.multi_reduction <maximumf>, %388, %cst_155 [1] : vector<8x8xf32> to vector<8xf32>
    %390 = vector.shape_cast %389 : vector<8xf32> to vector<8x1xf32>
    %391 = vector.broadcast %390 : vector<8x1xf32> to vector<8x8xf32>
    %392 = arith.subf %388, %391 : vector<8x8xf32>
    %393 = math.exp %392 : vector<8x8xf32>
    %cst_156 = arith.constant dense<0.000000e+00> : vector<8xf32>
    %394 = vector.multi_reduction <add>, %393, %cst_156 [1] : vector<8x8xf32> to vector<8xf32>
    %395 = vector.shape_cast %394 : vector<8xf32> to vector<8x1xf32>
    %396 = tpu.reciprocal %395 {approx = true} : vector<8x1xf32> -> vector<8x1xf32>
    %397 = vector.broadcast %396 : vector<8x1xf32> to vector<8x8xf32>
    %398 = arith.mulf %393, %397 : vector<8x8xf32>
    %399 = vector.shape_cast %398 : vector<8x8xf32> to vector<8x1x8xf32>
    %400 = arith.truncf %399 : vector<8x1x8xf32> to vector<8x1x8xbf16>
    "tpu.trace_start"() <{level = 10 : i32, message = "bks,bsd->bkd"}> : () -> ()
    %cst_157 = arith.constant dense<0.000000e+00> : vector<8x1x64xf32>
    %401 = tpu.matmul %400, %5, %cst_157 {dimension_numbers = #tpu.dot_dimension_numbers<[2], [1], [1], [2], [0, 0, 0, 1, 1, 2], [0], [0]>} : vector<8x1x8xbf16>, vector<8x8x64xbf16>, vector<8x1x64xf32> -> vector<8x1x64xf32>
    "tpu.trace_stop"() : () -> ()
    %402 = vector.shape_cast %401 : vector<8x1x64xf32> to vector<8x64xf32>
    %403 = arith.truncf %402 : vector<8x64xf32> to vector<8x64xbf16>
    %cst_158 = arith.constant dense<0.000000e+00> : vector<8x512xf32>
    %404 = tpu.matmul %373, %10, %cst_158 {dimension_numbers = #tpu.dot_dimension_numbers<[1], [0], [0], [1], [0, 0, 1, 1], [], []>} : vector<8x32xbf16>, vector<32x512xbf16>, vector<8x512xf32> -> vector<8x512xf32>
    %cst_159 = arith.constant dense<0.000000e+00> : vector<8x512xf32>
    %405 = tpu.matmul %403, %11, %cst_159 {dimension_numbers = #tpu.dot_dimension_numbers<[1], [0], [0], [1], [0, 0, 1, 1], [], []>} : vector<8x64xbf16>, vector<64x512xbf16>, vector<8x512xf32> -> vector<8x512xf32>
    %406 = vector.extract_strided_slice %404 {offsets = [0, 0], sizes = [8, 384], strides = [1, 1]} : vector<8x512xf32> to vector<8x384xf32>
    %407 = vector.extract_strided_slice %405 {offsets = [0, 0], sizes = [8, 384], strides = [1, 1]} : vector<8x512xf32> to vector<8x384xf32>
    %408 = arith.addf %406, %407 : vector<8x384xf32>
    %409 = vector.broadcast %1 : vector<1x384xf32> to vector<8x384xf32>
    %410 = arith.addf %408, %409 : vector<8x384xf32>
    %411 = vector.extract_strided_slice %410 {offsets = [0, 0], sizes = [8, 128], strides = [1, 1]} : vector<8x384xf32> to vector<8x128xf32>
    %412 = vector.extract_strided_slice %378 {offsets = [0, 0], sizes = [8, 128], strides = [1, 1]} : vector<8x384xf32> to vector<8x128xf32>
    %413 = arith.addf %411, %412 : vector<8x128xf32>
    %414 = arith.negf %413 : vector<8x128xf32>
    %415 = math.exp %414 : vector<8x128xf32>
    %cst_160 = arith.constant 1.000000e+00 : f32
    %416 = vector.broadcast %cst_160 : f32 to vector<8x128xf32>
    %417 = arith.addf %416, %415 : vector<8x128xf32>
    %418 = arith.divf %416, %417 : vector<8x128xf32>
    %419 = vector.extract_strided_slice %410 {offsets = [0, 128], sizes = [8, 128], strides = [1, 1]} : vector<8x384xf32> to vector<8x128xf32>
    %420 = vector.extract_strided_slice %378 {offsets = [0, 128], sizes = [8, 128], strides = [1, 1]} : vector<8x384xf32> to vector<8x128xf32>
    %421 = arith.addf %419, %420 : vector<8x128xf32>
    %422 = arith.negf %421 : vector<8x128xf32>
    %423 = math.exp %422 : vector<8x128xf32>
    %cst_161 = arith.constant 1.000000e+00 : f32
    %424 = vector.broadcast %cst_161 : f32 to vector<8x128xf32>
    %425 = arith.addf %424, %423 : vector<8x128xf32>
    %426 = arith.divf %424, %425 : vector<8x128xf32>
    %427 = vector.extract_strided_slice %410 {offsets = [0, 256], sizes = [8, 128], strides = [1, 1]} : vector<8x384xf32> to vector<8x128xf32>
    %428 = vector.extract_strided_slice %378 {offsets = [0, 256], sizes = [8, 128], strides = [1, 1]} : vector<8x384xf32> to vector<8x128xf32>
    %429 = arith.mulf %418, %428 : vector<8x128xf32>
    %430 = arith.addf %427, %429 : vector<8x128xf32>
    %431 = math.tanh %430 : vector<8x128xf32>
    %cst_162 = arith.constant 1.000000e+00 : f32
    %432 = vector.broadcast %cst_162 : f32 to vector<8x128xf32>
    %433 = arith.subf %432, %426 : vector<8x128xf32>
    %434 = arith.mulf %433, %431 : vector<8x128xf32>
    %435 = arith.mulf %426, %366 : vector<8x128xf32>
    %436 = arith.addf %434, %435 : vector<8x128xf32>
    %c0_163 = arith.constant 0 : index
    %c0_164 = arith.constant 0 : index
    %437 = vector.load %arg13[%c0_163, %c0_164] : memref<8x128xf32, #tpu.memory_space<vmem>>, vector<8x128xf32>
    tpu.vector_store %arg13[%c0_163, %c0_164], %436 {strides = array<i32>} : memref<8x128xf32, #tpu.memory_space<vmem>>, vector<8x128xf32>,
    %438 = arith.truncf %436 : vector<8x128xf32> to vector<8x128xbf16>
    %cst_165 = arith.constant dense<0.000000e+00> : vector<8x128xf32>
    %439 = tpu.matmul %438, %12, %cst_165 {dimension_numbers = #tpu.dot_dimension_numbers<[1], [0], [0], [1], [0, 0, 1, 1], [], []>} : vector<8x128xbf16>, vector<128x128xbf16>, vector<8x128xf32> -> vector<8x128xf32>
    %440 = vector.extract_strided_slice %404 {offsets = [0, 384], sizes = [8, 128], strides = [1, 1]} : vector<8x512xf32> to vector<8x128xf32>
    %441 = arith.addf %439, %440 : vector<8x128xf32>
    %442 = vector.extract_strided_slice %405 {offsets = [0, 384], sizes = [8, 128], strides = [1, 1]} : vector<8x512xf32> to vector<8x128xf32>
    %443 = arith.addf %441, %442 : vector<8x128xf32>
    %444 = vector.broadcast %3 : vector<1x128xf32> to vector<8x128xf32>
    %445 = arith.addf %443, %444 : vector<8x128xf32>
    %c5 = arith.constant 5 : index
    %c0_166 = arith.constant 0 : index
    %c0_167 = arith.constant 0 : index
    %446 = vector.load %arg12[%c5, %c0_166, %c0_167] : memref<6x8x128xf32, #tpu.memory_space<vmem>>, vector<1x8x128xf32>
    %447 = vector.shape_cast %446 : vector<1x8x128xf32> to vector<8x128xf32>
    %448 = vector.shape_cast %445 : vector<8x128xf32> to vector<1x8x128xf32>
    tpu.vector_store %arg12[%c5, %c0_166, %c0_167], %448 {strides = array<i32>} : memref<6x8x128xf32, #tpu.memory_space<vmem>>, vector<1x8x128xf32>,
    return
  }
}

</mosaic_0001>

<bundles_post_ra>
// kernel: seq2seq_decode.1
= control target key start
LH: loop header
LB: loop body
LE: loop exit
PB: predicated region body
PF: predicated region fallthrough
CT: control target
= control target key end

     0   :  { %19 = vsyncpa [#allocation4], 0  ;;  %s4433_s28 = smov [#allocation3]   ;;  %s6091_s0 = inlined_call_operand.vmem [shape: s32[5], index: 0, kind: input, shape index: {}]   ;;  %s6092_s1 = inlined_call_operand.vmem [shape: bf16[5,8,32], index: 1, kind: input, shape index: {}]   ;;  %s6093_s2 = inlined_call_operand.vmem [shape: f32[8,128], index: 2, kind: input, shape index: {}]   ;;  %s6094_s3 = inlined_call_operand.vmem [shape: bf16[8,8,64], index: 3, kind: input, shape index: {}]   ;;  %s6095_s4 = inlined_call_operand.vmem [shape: f32[8,8,128], index: 4, kind: input, shape index: {}]   ;;  %s6096_s5 = inlined_call_operand.vmem [shape: f32[8,8], index: 5, kind: input, shape index: {}]   ;;  %s6097_s6 = inlined_call_operand.vmem [shape: bf16[128,32], index: 6, kind: input, shape index: {}]   ;;  %s6098_s7 = inlined_call_operand.vmem [shape: bf16[128,512], index: 7, kind: input, shape index: {}]   ;;  %s6099_s8 = inlined_call_operand.vmem [shape: bf16[32,512], index: 8, kind: input, shape index: {}]   ;;  %s6100_s9 = inlined_call_operand.vmem [shape: bf16[64,512], index: 9, kind: input, shape index: {}]   ;;  %s6101_s10 = inlined_call_operand.vmem [shape: bf16[128,128], index: 10, kind: input, shape index: {}]   ;;  %s6102_s11 = inlined_call_operand.vmem [shape: f32[4,384], index: 11, kind: input, shape index: {}]   ;;  %s6103_s12 = inlined_call_operand.vmem [shape: f32[6,8,128], index: 12, kind: output, shape index: {0}]   ;;  %s6104_s13 = inlined_call_operand.vmem [shape: f32[8,128], index: 13, kind: output, shape index: {1}]  }
   0x1   :  { %s25_s27 = sshll.u32 %s6091_s0, 4  ;;  %s26_s27 = int_to_ptr.vmem [resolvable:$true] %s25_s27 }
   0x2   :  { %28 = dma.vmem_to_smem %s26_s27, 16, %s4433_s28, [#allocation4]  }
   0x3   :  { %4431 = dma.done.wait [#allocation4], 16  }
   0x4   :  { %4432 = vsyncadd [#allocation4], 4294967280 }
   0x5   :  { %55 = sfence }
   0x6   :  { %v3771_v0 = vld [vmem:[%s6098_s7 + $0xe0] sm:$0xf]  ;;  %v4194_v1 = vld [vmem:[%s6098_s7 + $0xec] sm:$0xf0]  ;;  %vm157_vm0 = vcmask 257024   ;;  %v4434_v2 = vmov 0.0  }
   0x7   :  { %153 = vst [vmem:[%s6103_s12] sm:$0xff] %v4434_v2  ;;  %v156_v3 = vld [vmem:[%s6092_s1] sm:$0xf]  ;;  %v4524_v4 = vor.u32 %v4194_v1, %v3771_v0  ;;  %v4190_v6 = vld [vmem:[%s6098_s7 + $0xcc] sm:$0xf0]  ;;  %v4616_v42 = vld [vmem:[%s6095_s4 + $0x8] sm:$0xff]  ;;  %vm467_vm1 = vcmask 1041409  }
   0x8   :  { %v3755_v5 = vld [vmem:[%s6098_s7 + $0xc0] sm:$0xf]  ;;  %158 = vst.msk [vmem:[#allocation2] sm:$0xf] %vm157_vm0, %v156_v3  ;;  %v4186_v9 = vld [vmem:[%s6098_s7 + $0xac] sm:$0xf0] }
   0x9   :  { %322 = vmatpush.bf16.msra.mxu0 %v4524_v4  ;;  %v4534_v7 = vor.u32 %v4190_v6, %v3755_v5  ;;  %v3739_v8 = vld [vmem:[%s6098_s7 + $0xa0] sm:$0xf]  ;;  %v4182_v12 = vld [vmem:[%s6098_s7 + $0x8c] sm:$0xf0]  ;;  %6170 = vst [vmem:[#allocation9_spill] sm:$0xff] %v4616_v42  ;;  %v4623_v46 = vld [vmem:[%s6095_s4 + $0x28] sm:$0xff] }
   0xa   :  { %v4543_v10 = vor.u32 %v4186_v9, %v3739_v8  ;;  %v3723_v11 = vld [vmem:[%s6098_s7 + $0x80] sm:$0xf]  ;;  %v4178_v15 = vld [vmem:[%s6098_s7 + $0x6c] sm:$0xf0]  ;;  %6171 = vst [vmem:[#allocation10_spill] sm:$0xff] %v4623_v46  ;;  %v4629_v49 = vld [vmem:[%s6095_s4 + $0x18] sm:$0xff] }
   0xb   :  { %v4552_v13 = vor.u32 %v4182_v12, %v3723_v11  ;;  %v3707_v14 = vld [vmem:[%s6098_s7 + $0x60] sm:$0xf]  ;;  %v4174_v18 = vld [vmem:[%s6098_s7 + $0x4c] sm:$0xf0]  ;;  %6172 = vst [vmem:[#allocation11_spill] sm:$0xff] %v4629_v49  ;;  %v4650_v2 = vld [vmem:[%s6095_s4 + $0x38] sm:$0xff] }
   0xc   :  { %v4561_v16 = vor.u32 %v4178_v15, %v3707_v14  ;;  %v3691_v17 = vld [vmem:[%s6098_s7 + $0x40] sm:$0xf]  ;;  %v4170_v21 = vld [vmem:[%s6098_s7 + $0x2c] sm:$0xf0]  ;;  %6175 = vst [vmem:[#allocation14_spill] sm:$0xff] %v4650_v2  ;;  %vm469_vm2 = vcmask 1042434  }
   0xd   :  { %323 = vmatpush.bf16.msra.mxu0 %v4534_v7  ;;  %v4570_v19 = vor.u32 %v4174_v18, %v3691_v17  ;;  %v3675_v20 = vld [vmem:[%s6098_s7 + $0x20] sm:$0xf]  ;;  %v4166_v24 = vld [vmem:[%s6098_s7 + $0xc] sm:$0xf0]  ;;  %vm471_vm3 = vcmask 1043459   ;;  %vm473_vm4 = vcmask 1044484  }
   0xe   :  { %v4579_v22 = vor.u32 %v4170_v21, %v3675_v20  ;;  %v3659_v23 = vld [vmem:[%s6098_s7] sm:$0xf]  ;;  %v4610_v35 = vld [vmem:[%s6095_s4 + $0x10] sm:$0xff]  ;;  %v457_v21 = vlaneseq  ;;  %vm475_vm5 = vcmask 1045509   ;;  %vm477_vm6 = vcmask 1046534   ;;  %s3932_s29 = sld [smem:[#allocation3 + $0x1]] }
   0xf   :  { %v4588_v25 = vor.u32 %v4166_v24, %v3659_v23  ;;  %v154_v26 = vld [vmem:[%s6093_s2] sm:$0xff]  ;;  %6169 = vst [vmem:[#allocation8_spill] sm:$0xff] %v4610_v35  ;;  %v4642_v59 = vld [vmem:[%s6095_s4 + $0x30] sm:$0xff]  ;;  %vm479_vm7 = vcmask 1047559   ;;  %vm6160_vm9 = vcmask 64512   ;;  %vm521_vm10 = vcmask 1043456  }
  0x10   :  { %v4593_v27 = vpack.c.bf16 %v154_v26, %v154_v26  ;;  %v4600_v29 = vld [vmem:[%s6095_s4] sm:$0xff]  ;;  %6174 = vst [vmem:[#allocation13_spill] sm:$0xff] %v4642_v59  ;;  %v4658_v26 = vand.u32 127, %v457_v21  ;;  %vm6159_vm11 = vcmask 261120   ;;  %vm6157_vm12 = vcmask 523264  }
  0x11   :  { %324 = vmatpush.bf16.msra.mxu0 %v4543_v10  ;;  %6167 = vst [vmem:[#allocation6_spill] sm:$0xff] %v4600_v29  ;;  %v4605_v34 = vld [vmem:[%s6095_s4 + $0x20] sm:$0xff] }
  0x12   :  { %6168 = vst [vmem:[#allocation7_spill] sm:$0xff] %v4605_v34  ;;  %v4634_v52 = vld [vmem:[%s6102_s11] ss:$0 sm:$0xff] }
  0x13   :  { %6173 = vst [vmem:[#allocation12_spill] sm:$0xff] %v4634_v52 }
  0x14   :  { %p3933_p0 = scmp.ne.s32.totalorder %s3932_s29, 0 }
  0x15   :  { %325 = vmatpush.bf16.msra.mxu0 %v4552_v13 }
  0x19   :  { %326 = vmatpush.bf16.msra.mxu0 %v4561_v16 }
  0x1d   :  { %327 = vmatpush.bf16.msra.mxu0 %v4570_v19 }
  0x21   :  { %328 = vmatpush.bf16.msra.mxu0 %v4579_v22 }
  0x25   :  { %329 = vmatpush.bf16.msra.mxu0 %v4588_v25 }
  0x28   :  { %330 = vmatmul.bf16.vlgmr.msra.gmra.mxu0 %v4593_v27 }
  0xa5   :  { %v331_v28 = vpop.f32.mrf.mxu0 }
  0xa6   :  { %v392_v30 = vperm.slane %v331_v28, 0  ;;  %v388_v31 = vrot.slane %v331_v28, 4  ;;  %v386_v32 = vrot.slane %v331_v28, 2  ;;  %v385_v33 = vrot.slane %v331_v28, 1 }
  0xa7   :  { %v389_v36 = vrot.slane %v331_v28, 5  ;;  %v387_v37 = vrot.slane %v331_v28, 3  ;;  %v390_v50 = vrot.slane %v331_v28, 6  ;;  %v391_v55 = vrot.slane %v331_v28, 7 }
  0xa8   :  { %v408_v38 = vadd.f32 %v392_v30, %v4600_v29  ;;  %v396_v39 = vperm.slane %v388_v31, 0  ;;  %v394_v40 = vperm.slane %v386_v32, 0  ;;  %v393_v41 = vperm.slane %v385_v33, 0 }
  0xa9   :  { %v397_v45 = vperm.slane %v389_v36, 0  ;;  %v395_v47 = vperm.slane %v387_v37, 0  ;;  %v398_v57 = vperm.slane %v390_v50, 0  ;;  %v399_v63 = vperm.slane %v391_v55, 0 }
  0xaa   :  { %4268 = vtanh.f32 %v408_v38  ;;  %v412_v43 = vadd.f32 %v396_v39, %v4605_v34  ;;  %v410_v44 = vadd.f32 %v394_v40, %v4610_v35  ;;  %v409_v48 = vadd.f32 %v393_v41, %v4616_v42 }
  0xab   :  { %v413_v53 = vadd.f32 %v397_v45, %v4623_v46  ;;  %v411_v54 = vadd.f32 %v395_v47, %v4629_v49  ;;  %v414_v1 = vadd.f32 %v398_v57, %v4642_v59  ;;  %v415_v5 = vadd.f32 %v399_v63, %v4650_v2  ;;  %v3757_v63 = vld [vmem:[%s6098_s7 + $0xd0] sm:$0xf0]  ;;  %v4204_v46 = vld [vmem:[%s6100_s9 + $0x4] sm:$0xf] }
  0xac   :  { %4270 = vtanh.f32 %v412_v43 }
  0xad   :  { %v333_v51 = vpop.f32.mrf.mxu0  ;;  %4272 = vtanh.f32 %v410_v44 }
  0xae   :  { %4274 = vtanh.f32 %v409_v48  ;;  %v4674_v48 = vld [vmem:[%s6096_s5] sm:$0xff] }
  0xaf   :  { %4276 = vtanh.f32 %v413_v53  ;;  %6176 = vst [vmem:[#allocation15_spill] sm:$0xff] %v4674_v48  ;;  %vm80_vm8 = vcmp.eq.f32.partialorder %v4674_v48, 0.0 }
  0xb0   :  { %v4269_v56 = vpop.eup %4268  ;;  %4278 = vtanh.f32 %v411_v54 }
  0xb1   :  { %v425_v58 = vmul.f32 %v4269_v56, %v4634_v52  ;;  %4280 = vtanh.f32 %v414_v1  ;;  %v4195_v1 = vld [vmem:[%s6098_s7 + $0xf4] sm:$0xf0] }
  0xb2   :  { %v4271_v60 = vpop.eup %4270  ;;  %4282 = vtanh.f32 %v415_v5 }
  0xb3   :  { %v4273_v61 = vpop.eup %4272  ;;  %433 = vadd.xlane.f32.xlu0 %v425_v58  ;;  %v429_v62 = vmul.f32 %v4271_v60, %v4634_v52  ;;  %v4192_v58 = vld [vmem:[%s6098_s7 + $0xe4] sm:$0xf]  ;;  %v3773_v60 = vld [vmem:[%s6098_s7 + $0xf0] sm:$0xf0] }
  0xb4   :  { %v427_v0 = vmul.f32 %v4273_v61, %v4634_v52  ;;  %v4275_v3 = vpop.eup %4274  ;;  %v4188_v61 = vld [vmem:[%s6098_s7 + $0xc4] sm:$0xf] }
  0xb5   :  { %441 = vadd.xlane.f32.xlu2 %v429_v62  ;;  %v4277_v6 = vpop.eup %4276  ;;  %v426_v9 = vmul.f32 %v4275_v3, %v4634_v52  ;;  %v4696_v62 = vor.u32 %v4192_v58, %v3773_v60  ;;  %v4193_v3 = vld [vmem:[%s6098_s7 + $0xec] sm:$0xf]  ;;  %v4711_v5 = vor.u32 %v4188_v61, %v3757_v63  ;;  %v4172_v58 = vld [vmem:[%s6098_s7 + $0x44] sm:$0xf]  ;;  %v3693_v60 = vld [vmem:[%s6098_s7 + $0x50] sm:$0xf0] }
  0xb6   :  { %437 = vadd.xlane.f32.xlu1 %v427_v0  ;;  %v4279_v8 = vpop.eup %4278  ;;  %v430_v11 = vmul.f32 %v4277_v6, %v4634_v52  ;;  %v3779_v0 = vld [vmem:[%s6098_s7 + $0xe8] sm:$0xf]  ;;  %v4184_v6 = vld [vmem:[%s6098_s7 + $0xa4] sm:$0xf] }
  0xb7   :  { %v428_v12 = vmul.f32 %v4279_v8, %v4634_v52  ;;  %v4281_v14 = vpop.eup %4280  ;;  %335 = vmatpush.bf16.msra.mxu1 %v4696_v62  ;;  %v3741_v8 = vld [vmem:[%s6098_s7 + $0xb0] sm:$0xf0] }
  0xb8   :  { %v4283_v15 = vpop.eup %4282  ;;  %v431_v17 = vmul.f32 %v4281_v14, %v4634_v52  ;;  %v3763_v14 = vld [vmem:[%s6098_s7 + $0xc8] sm:$0xf] }
  0xb9   :  { %v432_v18 = vmul.f32 %v4283_v15, %v4634_v52  ;;  %v4191_v15 = vld [vmem:[%s6098_s7 + $0xd4] sm:$0xf0] }
  0xbb   :  { %435 = vadd.xlane.f32.xlu0 %v426_v9  ;;  %v4719_v9 = vor.u32 %v4195_v1, %v3779_v0  ;;  %336 = vmatpush.bf16.msra.mxu1 %v4711_v5  ;;  %v3699_v0 = vld [vmem:[%s6098_s7 + $0x48] sm:$0xf]  ;;  %v4175_v1 = vld [vmem:[%s6098_s7 + $0x54] sm:$0xf0] }
  0xbd   :  { %443 = vadd.xlane.f32.xlu2 %v430_v11  ;;  %v3781_v11 = vld [vmem:[%s6098_s7 + $0xf8] sm:$0xf0]  ;;  %348 = vmatpush.bf16.msra.mxu2 %v4719_v9 }
  0xbe   :  { %439 = vadd.xlane.f32.xlu1 %v428_v12  ;;  %v4724_v12 = vor.u32 %v4193_v3, %v3781_v11  ;;  %v3701_v11 = vld [vmem:[%s6098_s7 + $0x58] sm:$0xf0] }
  0xc0   :  { %361 = vmatpush.bf16.msra.mxu3 %v4724_v12 }
  0xc3   :  { %445 = vadd.xlane.f32.xlu0 %v431_v17  ;;  %v4189_v17 = vld [vmem:[%s6098_s7 + $0xcc] sm:$0xf] }
  0xc6   :  { %447 = vadd.xlane.f32.xlu1 %v432_v18  ;;  %v4736_v18 = vor.u32 %v4191_v15, %v3763_v14  ;;  %v4168_v15 = vld [vmem:[%s6098_s7 + $0x24] sm:$0xf] }
  0xc8   :  { %349 = vmatpush.bf16.msra.mxu2 %v4736_v18 }
 0x126   :  { %v434_v20 = vpop.xlane.xlu0 %433 }
 0x127   :  { %v459_v30 = vperm.slane %v434_v20, %v4658_v26  ;;  %v3765_v20 = vld [vmem:[%s6098_s7 + $0xd8] sm:$0xf0] }
 0x128   :  { %v442_v23 = vpop.xlane.xlu2 %441  ;;  %v4742_v21 = vor.u32 %v4189_v17, %v3765_v20  ;;  %v3677_v17 = vld [vmem:[%s6098_s7 + $0x30] sm:$0xf0]  ;;  %v4848_v20 = vor.u32 %v4175_v1, %v3699_v0 }
 0x129   :  { %v438_v24 = vpop.xlane.xlu1 %437  ;;  %v463_v39 = vperm.slane %v442_v23, %v4658_v26  ;;  %v3747_v23 = vld [vmem:[%s6098_s7 + $0xa8] sm:$0xf] }
 0x12a   :  { %v461_v32 = vperm.slane %v438_v24, %v4658_v26  ;;  %v4187_v24 = vld [vmem:[%s6098_s7 + $0xb4] sm:$0xf0]  ;;  %362 = vmatpush.bf16.msra.mxu3 %v4742_v21 }
 0x12e   :  { %v436_v28 = vpop.xlane.xlu0 %435 }
 0x12f   :  { %v460_v31 = vperm.slane %v436_v28, %v4658_v26  ;;  %v4751_v28 = vor.u32 %v4184_v6, %v3741_v8  ;;  %v4832_v6 = vor.u32 %v4172_v58, %v3693_v60  ;;  %v4173_v8 = vld [vmem:[%s6098_s7 + $0x4c] sm:$0xf] }
 0x130   :  { %v444_v40 = vpop.xlane.xlu2 %443 }
 0x131   :  { %v468_v33 = vsel %vm467_vm1, %v460_v31, %v459_v30  ;;  %v440_v36 = vpop.xlane.xlu1 %439  ;;  %v464_v44 = vperm.slane %v444_v40, %v4658_v26  ;;  %v4185_v30 = vld [vmem:[%s6098_s7 + $0xac] sm:$0xf]  ;;  %v3749_v31 = vld [vmem:[%s6098_s7 + $0xb8] sm:$0xf0]  ;;  %337 = vmatpush.bf16.msra.mxu1 %v4751_v28 }
 0x132   :  { %v462_v37 = vperm.slane %v440_v36, %v4658_v26  ;;  %v470_v38 = vsel %vm469_vm2, %v461_v32, %v468_v33  ;;  %v4180_v32 = vld [vmem:[%s6098_s7 + $0x84] sm:$0xf]  ;;  %v3725_v33 = vld [vmem:[%s6098_s7 + $0x90] sm:$0xf0]  ;;  %v4766_v36 = vor.u32 %v4187_v24, %v3747_v23  ;;  %v4851_v24 = vor.u32 %v4173_v8, %v3701_v11  ;;  %v73_v8 = vld [vmem:[%s6094_s3 + $0x8] sm:$0xf] }
 0x133   :  { %v4778_v40 = vor.u32 %v4180_v32, %v3725_v33  ;;  %v4169_v32 = vld [vmem:[%s6098_s7 + $0x2c] sm:$0xf]  ;;  %v3685_v33 = vld [vmem:[%s6098_s7 + $0x38] sm:$0xf0] }
 0x134   :  { %v472_v41 = vsel %vm471_vm3, %v462_v37, %v470_v38  ;;  %v4769_v37 = vor.u32 %v4185_v30, %v3749_v31  ;;  %v3731_v38 = vld [vmem:[%s6098_s7 + $0x88] sm:$0xf]  ;;  %350 = vmatpush.bf16.msra.mxu2 %v4766_v36  ;;  %v4171_v30 = vld [vmem:[%s6098_s7 + $0x34] sm:$0xf0]  ;;  %v4860_v31 = vor.u32 %v4168_v15, %v3677_v17  ;;  %v74_v11 = vld [vmem:[%s6094_s3 + $0xc] sm:$0xf] }
 0x135   :  { %v474_v43 = vsel %vm473_vm4, %v463_v39, %v472_v41  ;;  %v4183_v39 = vld [vmem:[%s6098_s7 + $0x94] sm:$0xf0]  ;;  %v4181_v41 = vld [vmem:[%s6098_s7 + $0x8c] sm:$0xf]  ;;  %338 = vmatpush.bf16.msra.mxu1 %v4778_v40  ;;  %v4925_v15 = vsel %vm521_vm10, %v73_v8, 0  ;;  %v4928_v17 = vsel %vm521_vm10, %v74_v11, 0 }
 0x136   :  { %v446_v45 = vpop.xlane.xlu0 %445  ;;  %v476_v50 = vsel %vm475_vm5, %v464_v44, %v474_v43  ;;  %v3733_v43 = vld [vmem:[%s6098_s7 + $0x98] sm:$0xf0]  ;;  %v4176_v44 = vld [vmem:[%s6098_s7 + $0x64] sm:$0xf]  ;;  %363 = vmatpush.bf16.msra.mxu3 %v4769_v37  ;;  %6179 = vst [vmem:[#allocation18_spill] sm:$0xff] %v4925_v15 }
 0x137   :  { %v465_v47 = vperm.slane %v446_v45, %v4658_v26  ;;  %v3709_v45 = vld [vmem:[%s6098_s7 + $0x70] sm:$0xf0]  ;;  %6180 = vst [vmem:[#allocation19_spill] sm:$0xff] %v4928_v17 }
 0x139   :  { %v448_v51 = vpop.xlane.xlu1 %447  ;;  %v478_v53 = vsel %vm477_vm6, %v465_v47, %v476_v50  ;;  %v4793_v47 = vor.u32 %v4183_v39, %v3731_v38  ;;  %v4796_v50 = vor.u32 %v4181_v41, %v3733_v43  ;;  %v4164_v38 = vld [vmem:[%s6098_s7 + $0x4] sm:$0xf]  ;;  %v3661_v39 = vld [vmem:[%s6098_s7 + $0x10] sm:$0xf0]  ;;  %v3667_v43 = vld [vmem:[%s6098_s7 + $0x8] sm:$0xf] }
 0x13a   :  { %v466_v54 = vperm.slane %v448_v51, %v4658_v26  ;;  %v3715_v51 = vld [vmem:[%s6098_s7 + $0x68] sm:$0xf] }
 0x13b   :  { %351 = vmatpush.bf16.msra.mxu2 %v4793_v47  ;;  %364 = vmatpush.bf16.msra.mxu3 %v4796_v50 }
 0x13c   :  { %v480_v55 = vsel %vm479_vm7, %v466_v54, %v478_v53  ;;  %v4179_v53 = vld [vmem:[%s6098_s7 + $0x74] sm:$0xf0]  ;;  %v4805_v54 = vor.u32 %v4176_v44, %v3709_v45  ;;  %v4881_v44 = vor.u32 %v4169_v32, %v3685_v33  ;;  %v78_v32 = vld [vmem:[%s6094_s3 + $0x1c] sm:$0xf] }
 0x13d   :  { %v4683_v56 = vsel %vm80_vm8, -1e+10, %v480_v55  ;;  %v4177_v55 = vld [vmem:[%s6098_s7 + $0x6c] sm:$0xf]  ;;  %v4820_v61 = vor.u32 %v4179_v53, %v3715_v51  ;;  %v4167_v45 = vld [vmem:[%s6098_s7 + $0x14] sm:$0xf0]  ;;  %v4890_v53 = vor.u32 %v4164_v38, %v3661_v39 }
 0x13e   :  { %v484_v57 = vsel %vm6160_vm9, %v4683_v56, -inf  ;;  %339 = vmatpush.bf16.msra.mxu1 %v4805_v54  ;;  %v71_v51 = vld [vmem:[%s6094_s3] sm:$0xf]  ;;  %v4899_v58 = vor.u32 %v4167_v45, %v3667_v43  ;;  %v4953_v38 = vsel %vm521_vm10, %v78_v32, 0  ;;  %v76_v43 = vld [vmem:[%s6094_s3 + $0x14] sm:$0xf] }
 0x13f   :  { %485 = vmax.xlane.f32.xlu2 %v484_v57  ;;  %v3717_v57 = vld [vmem:[%s6098_s7 + $0x78] sm:$0xf0]  ;;  %352 = vmatpush.bf16.msra.mxu2 %v4820_v61  ;;  %v4902_v60 = vsel %vm521_vm10, %v71_v51, 0  ;;  %6184 = vst [vmem:[#allocation23_spill] sm:$0xff] %v4953_v38 }
 0x140   :  { %v4823_v63 = vor.u32 %v4177_v55, %v3717_v57  ;;  %v4165_v55 = vld [vmem:[%s6098_s7 + $0xc] sm:$0xf]  ;;  %v3669_v57 = vld [vmem:[%s6098_s7 + $0x18] sm:$0xf0]  ;;  %6177 = vst [vmem:[#allocation16_spill] sm:$0xff] %v4902_v60 }
 0x141   :  { %v4905_v1 = vor.u32 %v4165_v55, %v3669_v57  ;;  %v4961_v55 = vsel %vm521_vm10, %v76_v43, 0 }
 0x142   :  { %365 = vmatpush.bf16.msra.mxu3 %v4823_v63  ;;  %340 = vmatpush.bf16.msra.mxu1 %v4832_v6  ;;  %6185 = vst [vmem:[#allocation24_spill] sm:$0xff] %v4961_v55 }
 0x143   :  { %353 = vmatpush.bf16.msra.mxu2 %v4848_v20  ;;  %6178 = vst [vmem:[#allocation17_spill] sm:$0xff] %v4905_v1 }
 0x146   :  { %366 = vmatpush.bf16.msra.mxu3 %v4851_v24  ;;  %341 = vmatpush.bf16.msra.mxu1 %v4860_v31 }
 0x14a   :  { %367 = vmatpush.bf16.msra.mxu3 %v4881_v44  ;;  %342 = vmatpush.bf16.msra.mxu1 %v4890_v53 }
 0x14d   :  { %343 = vmatmul.bf16.vlgmr.msra.gmra.mxu1 %v4593_v27 }
 0x14e   :  { %532 = vmatpush.bf16.msrb.mxu1 %v4902_v60  ;;  %368 = vmatpush.bf16.msra.mxu3 %v4905_v1 }
 0x151   :  { %369 = vmatmul.bf16.vlgmr.msra.gmra.mxu3 %v4593_v27 }
 0x152   :  { %589 = vmatpush.bf16.msrb.mxu3 %v4928_v17 }
 0x156   :  { %665 = vmatpush.bf16.msra.mxu3 %v4953_v38 }
 0x1b2   :  { %v486_v3 = vpop.xlane.xlu2 %485 }
 0x1b3   :  { %v487_v14 = vsub.f32 %v4683_v56, %v486_v3  ;;  %v3683_v56 = vld [vmem:[%s6098_s7 + $0x28] sm:$0xf] }
 0x1b4   :  { %v4875_v41 = vor.u32 %v4171_v30, %v3683_v56  ;;  %v77_v30 = vld [vmem:[%s6094_s3 + $0x18] sm:$0xf] }
 0x1b5   :  { %v488_v23 = vmul.f32 1.442695, %v487_v14  ;;  %v75_v14 = vld [vmem:[%s6094_s3 + $0x10] sm:$0xf]  ;;  %v4950_v33 = vsel %vm521_vm10, %v77_v30, 0 }
 0x1b6   :  { %354 = vmatpush.bf16.msra.mxu2 %v4875_v41  ;;  %6183 = vst [vmem:[#allocation22_spill] sm:$0xff] %v4950_v33 }
 0x1b7   :  { %4284 = vpow2.f32 %v488_v23  ;;  %v72_v23 = vld [vmem:[%s6094_s3 + $0x4] sm:$0xf] }
 0x1b8   :  { %v4940_v56 = vsel %vm521_vm10, %v72_v23, 0 }
 0x1b9   :  { %6182 = vst [vmem:[#allocation21_spill] sm:$0xff] %v4940_v56  ;;  %551 = vmatpush.bf16.msra.mxu1 %v4940_v56 }
 0x1ba   :  { %355 = vmatpush.bf16.msra.mxu2 %v4899_v58 }
 0x1bd   :  { %v4285_v0 = vpop.eup %4284  ;;  %356 = vmatmul.bf16.vlgmr.msra.gmra.mxu2 %v4593_v27  ;;  %v4931_v27 = vsel %vm521_vm10, %v75_v14, 0 }
 0x1be   :  { %v490_v3 = vsel %vm6160_vm9, %v4285_v0, 0.0  ;;  %6181 = vst [vmem:[#allocation20_spill] sm:$0xff] %v4931_v27  ;;  %570 = vmatpush.bf16.msrb.mxu2 %v4925_v15  ;;  %608 = vmatpush.bf16.msrb.mxu0 %v4931_v27 }
 0x1bf   :  { %491 = vadd.xlane.f32.xlu0 %v490_v3 }
 0x1c2   :  { %646 = vmatpush.bf16.msra.mxu2 %v4950_v33 }
 0x1ca   :  { %v4964_v32 = vpop.f32.mrf.mxu1 }
 0x1d4   :  { %v4972_v43 = vpop.f32.mrf.mxu3 }
 0x1dc   :  { %v372_v2 = vpop.f32.mrf.mxu3 }
 0x1dd   :  { %v3795_v2 = vld [vmem:[%s6099_s8] sm:$0xf] }
 0x232   :  { %v492_v39 = vpop.xlane.xlu0 %491 }
 0x233   :  { %4286 = vrcp.f32 %v492_v39 }
 0x239   :  { %v4287_v45 = vpop.eup %4286 }
 0x23a   :  { %v494_v51 = vmul.f32 %v4287_v45, %v4285_v0  ;;  %v346_v0 = vpop.f32.mrf.mxu1 }
 0x23b   :  { %v4202_v0 = vld [vmem:[%s6099_s8 + $0x2c] sm:$0xf0] }
 0x23c   :  { %v510_v57 = vpack.c.bf16 %v494_v51, %v494_v51  ;;  %v497_v3 = vrot.slane %v494_v51, 2  ;;  %v498_v8 = vrot.slane %v494_v51, 3  ;;  %v499_v11 = vrot.slane %v494_v51, 4 }
 0x23d   :  { %v496_v45 = vrot.slane %v494_v51, 1 }
 0x23e   :  { %3785 = vmatmul.msk.bf16.vlgmr.msrb.gmra.mxu1 %vm6160_vm9, %v510_v57  ;;  %v512_v14 = vpack.c.bf16 %v497_v3, %v497_v3  ;;  %v513_v23 = vpack.c.bf16 %v498_v8, %v498_v8  ;;  %v514_v30 = vpack.c.bf16 %v499_v11, %v499_v11  ;;  %v501_v57 = vrot.slane %v494_v51, 6 }
 0x23f   :  { %627 = vmatpush.bf16.msrb.mxu1 %v4961_v55  ;;  %v502_v3 = vrot.slane %v494_v51, 7  ;;  %v511_v8 = vpack.c.bf16 %v496_v45, %v496_v45 }
 0x240   :  { %3787 = vmatmul.msk.bf16.vlgmr.msrb.gmra.mxu2 %vm6160_vm9, %v512_v14  ;;  %3788 = vmatmul.msk.bf16.vlgmr.msrb.gmra.mxu3 %vm6160_vm9, %v513_v23  ;;  %v4970_v39 = vpop.f32.mrf.mxu2  ;;  %v516_v11 = vpack.c.bf16 %v501_v57, %v501_v57  ;;  %v500_v14 = vrot.slane %v494_v51, 5  ;;  %v3813_v57 = vld [vmem:[%s6099_s8 + $0x30] sm:$0xf0] }
 0x241   :  { %3789 = vmatmul.msk.bf16.vlgmr.msrb.gmra.mxu0 %vm6160_vm9, %v514_v30  ;;  %v517_v48 = vpack.c.bf16 %v502_v3, %v502_v3  ;;  %v3811_v30 = vld [vmem:[%s6099_s8 + $0x20] sm:$0xf]  ;;  %v3819_v3 = vld [vmem:[%s6099_s8 + $0x28] sm:$0xf] }
 0x242   :  { %v515_v23 = vpack.c.bf16 %v500_v14, %v500_v14  ;;  %v4984_v45 = vor.u32 %v4202_v0, %v3811_v30  ;;  %v4203_v14 = vld [vmem:[%s6099_s8 + $0x34] sm:$0xf0]  ;;  %v4201_v30 = vld [vmem:[%s6099_s8 + $0x2c] sm:$0xf]  ;;  %v3821_v0 = vld [vmem:[%s6099_s8 + $0x38] sm:$0xf0] }
 0x244   :  { %6186 = vst [vmem:[#allocation25_spill] sm:$0xff] %v4984_v45  ;;  %729 = vmatpush.bf16.msra.mxu0 %v4984_v45 }
 0x248   :  { %v359_v55 = vpop.f32.mrf.mxu2 }
 0x249   :  { %v4200_v55 = vld [vmem:[%s6099_s8 + $0x24] sm:$0xf] }
 0x24e   :  { %3786 = vmatmul.msk.bf16.vlgmr.msra.gmra.mxu1 %vm6160_vm9, %v511_v8  ;;  %v161_v8 = vld [vmem:[%s6092_s1] sm:$0xf] }
 0x250   :  { %3791 = vmatmul.msk.bf16.vlgmr.msra.gmra.mxu2 %vm6160_vm9, %v516_v11  ;;  %3792 = vmatmul.msk.bf16.vlgmr.msra.gmra.mxu3 %vm6160_vm9, %v517_v48  ;;  %v4198_v48 = vld [vmem:[%s6099_s8 + $0xc] sm:$0xf0]  ;;  %v5008_v11 = vor.u32 %v4200_v55, %v3813_v57  ;;  %v3797_v55 = vld [vmem:[%s6099_s8 + $0x10] sm:$0xf0]  ;;  %v3803_v57 = vld [vmem:[%s6099_s8 + $0x8] sm:$0xf] }
 0x251   :  { %v4993_v51 = vor.u32 %v4198_v48, %v3795_v2  ;;  %v5023_v2 = vor.u32 %v4201_v30, %v3821_v0  ;;  %v4196_v48 = vld [vmem:[%s6099_s8 + $0x4] sm:$0xf]  ;;  %v4197_v30 = vld [vmem:[%s6099_s8 + $0xc] sm:$0xf]  ;;  %v3805_v0 = vld [vmem:[%s6099_s8 + $0x18] sm:$0xf0] }
 0x252   :  { %6188 = vst [vmem:[#allocation27_spill] sm:$0xff] %v5008_v11  ;;  %742 = vmatpush.bf16.msra.mxu1 %v5008_v11 }
 0x253   :  { %6187 = vst [vmem:[#allocation26_spill] sm:$0xff] %v4993_v51  ;;  %730 = vmatpush.bf16.msra.mxu0 %v4993_v51  ;;  %768 = vmatpush.bf16.msrb.mxu3 %v5023_v2 }
 0x254   :  { %6190 = vst [vmem:[#allocation29_spill] sm:$0xff] %v5023_v2  ;;  %v4216_v2 = vld [vmem:[%s6100_s9 + $0x64] sm:$0xf] }
 0x256   :  { %3825 = vmatmul.msk.bf16.vlgmr.msra.gmra.mxu0 %vm6159_vm11, %v161_v8 }
 0x25e   :  { %3790 = vmatmul.msk.bf16.vlgmr.msrb.gmra.mxu1 %vm6160_vm9, %v515_v23  ;;  %v5014_v23 = vor.u32 %v4203_v14, %v3819_v3  ;;  %v5036_v3 = vor.u32 %v4196_v48, %v3797_v55  ;;  %v4199_v14 = vld [vmem:[%s6099_s8 + $0x14] sm:$0xf0]  ;;  %v3879_v48 = vld [vmem:[%s6100_s9 + $0x60] sm:$0xf]  ;;  %v4218_v55 = vld [vmem:[%s6100_s9 + $0x6c] sm:$0xf0] }
 0x25f   :  { %v5047_v11 = vor.u32 %v4199_v14, %v3803_v57  ;;  %v5062_v57 = vor.u32 %v4218_v55, %v3879_v48  ;;  %v3881_v14 = vld [vmem:[%s6100_s9 + $0x70] sm:$0xf0]  ;;  %v4217_v55 = vld [vmem:[%s6100_s9 + $0x6c] sm:$0xf] }
 0x260   :  { %6189 = vst [vmem:[#allocation28_spill] sm:$0xff] %v5014_v23  ;;  %755 = vmatpush.bf16.msrb.mxu2 %v5014_v23  ;;  %v5049_v23 = vor.u32 %v4197_v30, %v3805_v0  ;;  %743 = vmatpush.bf16.msra.mxu1 %v5036_v3  ;;  %v3887_v30 = vld [vmem:[%s6100_s9 + $0x68] sm:$0xf]  ;;  %v4219_v0 = vld [vmem:[%s6100_s9 + $0x74] sm:$0xf0]  ;;  %v5076_v59 = vor.u32 %v4216_v2, %v3881_v14 }
 0x261   :  { %6191 = vst [vmem:[#allocation30_spill] sm:$0xff] %v5036_v3  ;;  %v5078_v48 = vor.u32 %v4219_v0, %v3887_v30  ;;  %894 = vmatpush.bf16.msrb.mxu0 %v5062_v57  ;;  %v3863_v14 = vld [vmem:[%s6100_s9 + $0x40] sm:$0xf]  ;;  %v4214_v30 = vld [vmem:[%s6100_s9 + $0x4c] sm:$0xf0] }
 0x262   :  { %6192 = vst [vmem:[#allocation31_spill] sm:$0xff] %v5047_v11  ;;  %769 = vmatpush.bf16.msrb.mxu3 %v5049_v23  ;;  %v5106_v0 = vor.u32 %v4214_v30, %v3863_v14  ;;  %v4213_v14 = vld [vmem:[%s6100_s9 + $0x4c] sm:$0xf]  ;;  %v3873_v30 = vld [vmem:[%s6100_s9 + $0x58] sm:$0xf0] }
 0x263   :  { %6193 = vst [vmem:[#allocation32_spill] sm:$0xff] %v5049_v23 }
 0x264   :  { %756 = vmatpush.bf16.msrb.mxu2 %v5047_v11  ;;  %6194 = vst [vmem:[#allocation33_spill] sm:$0xff] %v5062_v57  ;;  %v3889_v11 = vld [vmem:[%s6100_s9 + $0x78] sm:$0xf0]  ;;  %907 = vmatpush.bf16.msrb.mxu1 %v5076_v59 }
 0x265   :  { %6195 = vst [vmem:[#allocation34_spill] sm:$0xff] %v5076_v59  ;;  %v5088_v52 = vor.u32 %v4217_v55, %v3889_v11  ;;  %3828 = vmatmul.msk.bf16.vlgmr.msrb.gmra.mxu3 %vm6159_vm11, %v161_v8  ;;  %v4212_v11 = vld [vmem:[%s6100_s9 + $0x44] sm:$0xf]  ;;  %v3871_v55 = vld [vmem:[%s6100_s9 + $0x48] sm:$0xf]  ;;  %895 = vmatpush.bf16.msrb.mxu0 %v5106_v0 }
 0x266   :  { %6196 = vst [vmem:[#allocation35_spill] sm:$0xff] %v5078_v48  ;;  %v4215_v59 = vld [vmem:[%s6100_s9 + $0x54] sm:$0xf0] }
 0x267   :  { %6197 = vst [vmem:[#allocation36_spill] sm:$0xff] %v5088_v52  ;;  %3827 = vmatmul.msk.bf16.vlgmr.msrb.gmra.mxu2 %vm6159_vm11, %v161_v8  ;;  %933 = vmatpush.bf16.msra.mxu3 %v5088_v52  ;;  %v5119_v23 = vor.u32 %v4215_v59, %v3871_v55  ;;  %v5128_v52 = vor.u32 %v4213_v14, %v3873_v30  ;;  %v3847_v59 = vld [vmem:[%s6100_s9 + $0x20] sm:$0xf]  ;;  %v3849_v30 = vld [vmem:[%s6100_s9 + $0x30] sm:$0xf0] }
 0x268   :  { %920 = vmatpush.bf16.msra.mxu2 %v5078_v48  ;;  %6198 = vst [vmem:[#allocation37_spill] sm:$0xff] %v5106_v0 }
 0x269   :  { %6200 = vst [vmem:[#allocation39_spill] sm:$0xff] %v5119_v23 }
 0x26a   :  { %6201 = vst [vmem:[#allocation40_spill] sm:$0xff] %v5128_v52 }
 0x26b   :  { %934 = vmatpush.bf16.msra.mxu3 %v5128_v52 }
 0x26c   :  { %921 = vmatpush.bf16.msra.mxu2 %v5119_v23 }
 0x26e   :  { %3826 = vmatmul.msk.bf16.vlgmr.msra.gmra.mxu1 %vm6159_vm11, %v161_v8  ;;  %v3865_v8 = vld [vmem:[%s6100_s9 + $0x50] sm:$0xf0] }
 0x26f   :  { %v5117_v48 = vor.u32 %v4212_v11, %v3865_v8  ;;  %v4210_v11 = vld [vmem:[%s6100_s9 + $0x2c] sm:$0xf0]  ;;  %v4208_v8 = vld [vmem:[%s6100_s9 + $0x24] sm:$0xf] }
 0x270   :  { %v5142_v14 = vor.u32 %v4210_v11, %v3847_v59  ;;  %v5150_v57 = vor.u32 %v4208_v8, %v3849_v30  ;;  %v4209_v59 = vld [vmem:[%s6100_s9 + $0x2c] sm:$0xf]  ;;  %v3857_v11 = vld [vmem:[%s6100_s9 + $0x38] sm:$0xf0]  ;;  %v3831_v8 = vld [vmem:[%s6100_s9] sm:$0xf] }
 0x271   :  { %6199 = vst [vmem:[#allocation38_spill] sm:$0xff] %v5117_v48  ;;  %908 = vmatpush.bf16.msrb.mxu1 %v5117_v48  ;;  %v3855_v48 = vld [vmem:[%s6100_s9 + $0x28] sm:$0xf]  ;;  %v5164_v49 = vor.u32 %v4209_v59, %v3857_v11  ;;  %v4206_v30 = vld [vmem:[%s6100_s9 + $0xc] sm:$0xf0] }
 0x272   :  { %6202 = vst [vmem:[#allocation41_spill] sm:$0xff] %v5142_v14  ;;  %896 = vmatpush.bf16.msrb.mxu0 %v5142_v14  ;;  %v5176_v14 = vor.u32 %v4206_v30, %v3831_v8  ;;  %v4207_v59 = vld [vmem:[%s6100_s9 + $0x14] sm:$0xf0]  ;;  %v4205_v8 = vld [vmem:[%s6100_s9 + $0xc] sm:$0xf] }
 0x273   :  { %6203 = vst [vmem:[#allocation42_spill] sm:$0xff] %v5150_v57  ;;  %935 = vmatpush.bf16.msra.mxu3 %v5164_v49  ;;  %v3841_v30 = vld [vmem:[%s6100_s9 + $0x18] sm:$0xf0] }
 0x274   :  { %6205 = vst [vmem:[#allocation44_spill] sm:$0xff] %v5164_v49 }
 0x275   :  { %909 = vmatpush.bf16.msrb.mxu1 %v5150_v57  ;;  %6206 = vst [vmem:[#allocation45_spill] sm:$0xff] %v5176_v14  ;;  %v5199_v57 = vor.u32 %v4205_v8, %v3841_v30 }
 0x276   :  { %897 = vmatpush.bf16.msrb.mxu0 %v5176_v14 }
 0x277   :  { %6209 = vst [vmem:[#allocation48_spill] sm:$0xff] %v5199_v57  ;;  %936 = vmatpush.bf16.msra.mxu3 %v5199_v57 }
 0x2bb   :  { %v5073_v3 = vpop.f32.mrf.mxu1 }
 0x2bc   :  { %v671_v35 = vpack.c.bf16 %v5073_v3, %v5073_v3 }
 0x2be   :  { %v5092_v2 = vpop.f32.mrf.mxu0 }
 0x2c3   :  { %v536_v55 = vpop.f32.mrf.mxu1  ;;  %v572_v0 = vpop.f32.mrf.mxu2 }
 0x2c4   :  { %v591_v23 = vpop.f32.mrf.mxu3  ;;  %v4211_v55 = vld [vmem:[%s6100_s9 + $0x34] sm:$0xf0] }
 0x2c5   :  { %v5162_v52 = vor.u32 %v4211_v55, %v3855_v48  ;;  %v3833_v48 = vld [vmem:[%s6100_s9 + $0x10] sm:$0xf0]  ;;  %v3839_v55 = vld [vmem:[%s6100_s9 + $0x8] sm:$0xf]  ;;  %v674_v30 = vpack.c.bf16 %v591_v23, %v591_v23 }
 0x2c6   :  { %v612_v42 = vpop.f32.mrf.mxu0  ;;  %v5191_v11 = vor.u32 %v4207_v59, %v3839_v55  ;;  %v673_v59 = vpack.c.bf16 %v572_v0, %v572_v0 }
 0x2c7   :  { %6204 = vst [vmem:[#allocation43_spill] sm:$0xff] %v5162_v52  ;;  %922 = vmatpush.bf16.msra.mxu2 %v5162_v52  ;;  %v5189_v42 = vor.u32 %v4204_v46, %v3833_v48 }
 0x2c8   :  { %6208 = vst [vmem:[#allocation47_spill] sm:$0xff] %v5191_v11  ;;  %v785_v51 = vunpack.c.l.b16 %v673_v59 }
 0x2c9   :  { %6207 = vst [vmem:[#allocation46_spill] sm:$0xff] %v5189_v42  ;;  %910 = vmatpush.bf16.msrb.mxu1 %v5189_v42  ;;  %v783_v42 = vunpack.c.l.b16 %v671_v35 }
 0x2cb   :  { %v553_v52 = vpop.f32.mrf.mxu1  ;;  %v574_v49 = vpop.f32.mrf.mxu2  ;;  %923 = vmatpush.bf16.msra.mxu2 %v5191_v11  ;;  %v786_v11 = vunpack.c.l.b16 %v674_v30 }
 0x2cc   :  { %v672_v46 = vpack.c.bf16 %v553_v52, %v553_v52  ;;  %v593_v48 = vpop.f32.mrf.mxu3  ;;  %v675_v49 = vpack.c.bf16 %v5092_v2, %v5092_v2  ;;  %v793_v52 = vrot.slane %v785_v51, 6 }
 0x2cd   :  { %v795_v38 = vrot.slane %v786_v11, 5 }
 0x2ce   :  { %v784_v55 = vunpack.c.l.b16 %v672_v46  ;;  %v787_v0 = vunpack.c.l.b16 %v675_v49 }
 0x2d0   :  { %v791_v29 = vrot.slane %v784_v55, 7  ;;  %v797_v2 = vrot.slane %v787_v0, 4  ;;  %v3656_v0 = vld [vmem:[%s6102_s11 + $0x2] ss:$4 sm:$0x7] }
 0x2d2   :  { %v792_v57 = vsel %vm467_vm1, %v791_v29, %v783_v42 }
 0x2d3   :  { %v555_v34 = vpop.f32.mrf.mxu1  ;;  %v648_v8 = vpop.f32.mrf.mxu2  ;;  %v794_v45 = vsel %vm469_vm2, %v793_v52, %v792_v57 }
 0x2d4   :  { %v667_v14 = vpop.f32.mrf.mxu3  ;;  %v677_v48 = vpack.c.bf16 %v648_v8, %v648_v8  ;;  %v796_v56 = vsel %vm471_vm3, %v795_v38, %v794_v45 }
 0x2d5   :  { %v678_v46 = vpack.c.bf16 %v667_v14, %v667_v14  ;;  %v798_v29 = vsel %vm473_vm4, %v797_v2, %v796_v56 }
 0x2d6   :  { %v789_v33 = vunpack.c.l.b16 %v677_v48 }
 0x2d7   :  { %v790_v59 = vunpack.c.l.b16 %v678_v46  ;;  %v5227_v46 = vld [vmem:[%s6101_s10 + $0x38] sm:$0xff] }
 0x2d8   :  { %v801_v27 = vrot.slane %v789_v33, 2  ;;  %v732_v33 = vpop.f32.mrf.mxu0  ;;  %6210 = vst [vmem:[#allocation49_spill] sm:$0xff] %v5227_v46  ;;  %1052 = vmatpush.bf16.msra.mxu0 %v5227_v46 }
 0x2d9   :  { %v803_v51 = vrot.slane %v790_v59, 1 }
 0x2db   :  { %v629_v3 = vpop.f32.mrf.mxu1  ;;  %v650_v34 = vpop.f32.mrf.mxu2 }
 0x2dc   :  { %v676_v23 = vpack.c.bf16 %v629_v3, %v629_v3  ;;  %v669_v55 = vpop.f32.mrf.mxu3  ;;  %v3655_v3 = vld [vmem:[%s6102_s11 + $0x1] ss:$4 sm:$0x7]  ;;  %v5239_v34 = vld [vmem:[%s6101_s10 + $0x30] sm:$0xff] }
 0x2dd   :  { %6211 = vst [vmem:[#allocation50_spill] sm:$0xff] %v5239_v34  ;;  %1053 = vmatpush.bf16.msra.mxu0 %v5239_v34  ;;  %v5244_v55 = vperm.slane %v3656_v0, 1  ;;  %v5246_v59 = vperm.slane %v3655_v3, 0 }
 0x2de   :  { %v788_v35 = vunpack.c.l.b16 %v676_v23  ;;  %v5242_v23 = vperm.slane %v3656_v0, 0 }
 0x2df   :  { %6213 = vst [vmem:[#allocation52_spill] sm:$0xff] %v5244_v55 }
 0x2e0   :  { %v799_v30 = vrot.slane %v788_v35, 3  ;;  %v734_v56 = vpop.f32.mrf.mxu0  ;;  %6212 = vst [vmem:[#allocation51_spill] sm:$0xff] %v5242_v23  ;;  %v5248_v35 = vperm.slane %v3655_v3, 1 }
 0x2e1   :  { %6214 = vst [vmem:[#allocation53_spill] sm:$0xff] %v5246_v59  ;;  %v5265_v56 = vld [vmem:[%s6101_s10 + $0x20] sm:$0xff] }
 0x2e2   :  { %v800_v14 = vsel %vm475_vm5, %v799_v30, %v798_v29  ;;  %6215 = vst [vmem:[#allocation54_spill] sm:$0xff] %v5248_v35  ;;  %v5253_v29 = vld [vmem:[%s6101_s10 + $0x28] sm:$0xff] }
 0x2e3   :  { %v802_v57 = vsel %vm477_vm6, %v801_v27, %v800_v14  ;;  %v631_v42 = vpop.f32.mrf.mxu1  ;;  %6216 = vst [vmem:[#allocation55_spill] sm:$0xff] %v5253_v29  ;;  %1054 = vmatpush.bf16.msra.mxu0 %v5253_v29 }
 0x2e4   :  { %v804_v11 = vsel %vm479_vm7, %v803_v51, %v802_v57  ;;  %v381_v57 = vadd.f32 %v5242_v23, %v4964_v32  ;;  %v382_v42 = vadd.f32 %v5244_v55, %v4970_v39  ;;  %6217 = vst [vmem:[#allocation56_spill] sm:$0xff] %v5265_v56  ;;  %v5273_v39 = vld [vmem:[%s6101_s10 + $0x18] sm:$0xff] }
 0x2e5   :  { %v805_v8 = vpack.c.b16 %v804_v11, %v804_v11  ;;  %6218 = vst [vmem:[#allocation57_spill] sm:$0xff] %v5273_v39 }
 0x2e7   :  { %3893 = vmatmul.msk.bf16.vlgmr.msrb.gmra.mxu0 %vm6157_vm12, %v805_v8  ;;  %3894 = vmatmul.msk.bf16.vlgmr.msrb.gmra.mxu1 %vm6157_vm12, %v805_v8 }
 0x2e8   :  { %3895 = vmatmul.msk.bf16.vlgmr.msra.gmra.mxu2 %vm6157_vm12, %v805_v8  ;;  %3896 = vmatmul.msk.bf16.vlgmr.msra.gmra.mxu3 %vm6157_vm12, %v805_v8  ;;  %v5222_v49 = vpop.f32.mrf.mxu3 }
 0x2e9   :  { %1055 = vmatpush.bf16.msra.mxu0 %v5265_v56 }
 0x2ea   :  { %v5220_v45 = vpop.f32.mrf.mxu2 }
 0x2eb   :  { %v745_v38 = vpop.f32.mrf.mxu1 }
 0x2ed   :  { %1056 = vmatpush.bf16.msra.mxu0 %v5273_v39 }
 0x2f0   :  { %v773_v48 = vpop.f32.mrf.mxu3 }
 0x2f2   :  { %v760_v52 = vpop.f32.mrf.mxu2 }
 0x2f3   :  { %v747_v27 = vpop.f32.mrf.mxu1 }
 0x364   :  { %v899_v2 = vpop.f32.mrf.mxu0  ;;  %v912_v30 = vpop.f32.mrf.mxu1 }
 0x365   :  { %v942_v51 = vadd.f32 %v899_v2, %v732_v33  ;;  %v943_v14 = vadd.f32 %v912_v30, %v745_v38 }
 0x367   :  { %v952_v11 = vadd.f32 %v5246_v59, %v942_v51  ;;  %v953_v8 = vadd.f32 %v5248_v35, %v943_v14  ;;  %v5279_v51 = vld [vmem:[%s6101_s10 + $0x10] sm:$0xff]  ;;  %v5285_v14 = vld [vmem:[%s6101_s10 + $0x8] sm:$0xff] }
 0x368   :  { %6219 = vst [vmem:[#allocation58_spill] sm:$0xff] %v5279_v51  ;;  %1057 = vmatpush.bf16.msra.mxu0 %v5279_v51  ;;  %v5297_v51 = vperm.slane %v3655_v3, 2 }
 0x369   :  { %v955_v27 = vadd.f32 %v952_v11, %v381_v57  ;;  %v975_v33 = vadd.f32 %v953_v8, %v382_v42  ;;  %6220 = vst [vmem:[#allocation59_spill] sm:$0xff] %v5285_v14 }
 0x36b   :  { %v3897_v38 = vmul.f32 -1.442695, %v955_v27  ;;  %v3898_v52 = vmul.f32 -1.442695, %v975_v33  ;;  %v925_v48 = vpop.f32.mrf.mxu2  ;;  %v5268_v32 = vpop.f32.mrf.mxu3 }
 0x36c   :  { %v901_v2 = vpop.f32.mrf.mxu0  ;;  %v914_v30 = vpop.f32.mrf.mxu1  ;;  %1058 = vmatpush.bf16.msra.mxu0 %v5285_v14  ;;  %v944_v14 = vadd.f32 %v925_v48, %v5220_v45 }
 0x36d   :  { %4288 = vpow2.f32 %v3897_v38  ;;  %v5291_v38 = vld [vmem:[%s6101_s10] sm:$0xff] }
 0x36e   :  { %4290 = vpow2.f32 %v3898_v52  ;;  %6221 = vst [vmem:[#allocation60_spill] sm:$0xff] %v5291_v38 }
 0x370   :  { %1059 = vmatpush.bf16.msra.mxu0 %v5291_v38 }
 0x373   :  { %v4289_v57 = vpop.eup %4288  ;;  %v927_v42 = vpop.f32.mrf.mxu2 }
 0x374   :  { %v940_v11 = vpop.f32.mrf.mxu3  ;;  %v4291_v8 = vpop.eup %4290  ;;  %v959_v27 = vadd.f32 1.0, %v4289_v57  ;;  %v5294_v57 = vperm.slane %v3656_v0, 2 }
 0x375   :  { %v979_v33 = vadd.f32 1.0, %v4291_v8 }
 0x376   :  { %4292 = vrcp.f32 %v959_v27  ;;  %v971_v59 = vand.u32 2147483648, %v959_v27  ;;  %v969_v55 = vand.u32 2147483647, %v959_v27  ;;  %vm965_vm14 = vweird.f32 %v959_v27 }
 0x377   :  { %4294 = vrcp.f32 %v979_v33  ;;  %v383_v56 = vadd.f32 %v5294_v57, %v4972_v43  ;;  %vm985_vm11 = vweird.f32 %v979_v33  ;;  %v989_v45 = vand.u32 2147483647, %v979_v33 }
 0x378   :  { %v972_v38 = vor.u32 1.1754944e-38, %v971_v59  ;;  %vm970_vm10 = vcmp.eq.f32.partialorder %v969_v55, 8.507059e+37 }
 0x37c   :  { %v4293_v52 = vpop.eup %4292 }
 0x37d   :  { %v4295_v2 = vpop.eup %4294  ;;  %v961_v30 = vmul.f32 %v4293_v52, %v959_v27  ;;  %vm966_vm13 = vweird.f32 %v4293_v52 }
 0x37e   :  { %v981_v35 = vmul.f32 %v4295_v2, %v979_v33  ;;  %vm967_vm15 = vmor %vm965_vm14, %vm966_vm13  ;;  %vm986_vm12 = vweird.f32 %v4295_v2  ;;  %vm990_vm13 = vcmp.eq.f32.partialorder %v989_v45, 8.507059e+37 }
 0x37f   :  { %v962_v42 = vsub.f32 1.0, %v961_v30  ;;  %vm987_vm9 = vmor %vm985_vm11, %vm986_vm12 }
 0x380   :  { %v982_v11 = vsub.f32 1.0, %v981_v35 }
 0x381   :  { %v963_v8 = vmul.f32 %v4293_v52, %v962_v42  ;;  %v954_v42 = vadd.f32 %v5297_v51, %v944_v14 }
 0x382   :  { %v983_v23 = vmul.f32 %v4295_v2, %v982_v11  ;;  %v991_v11 = vand.u32 2147483648, %v979_v33 }
 0x383   :  { %v964_v39 = vadd.f32 %v4293_v52, %v963_v8 }
 0x384   :  { %v984_v0 = vadd.f32 %v4295_v2, %v983_v23  ;;  %v992_v27 = vor.u32 1.1754944e-38, %v991_v11  ;;  %v4298_v23 = vld [vmem:[%s6093_s2] sm:$0xff] }
 0x385   :  { %v968_v30 = vsel %vm967_vm15, %v4293_v52, %v964_v39 }
 0x386   :  { %v973_v35 = vsel %vm970_vm10, %v972_v38, %v968_v30  ;;  %v988_v48 = vsel %vm987_vm9, %v4295_v2, %v984_v0  ;;  %v5312_v38 = vld [vmem:[%s6102_s11 + $0x3] ss:$0 sm:$0xff] }
 0x387   :  { %v995_v29 = vmul.f32 %v973_v35, %v383_v56  ;;  %v993_v59 = vsel %vm990_vm13, %v992_v27, %v988_v48 }
 0x388   :  { %v998_v8 = vsub.f32 1.0, %v993_v59  ;;  %v1000_v55 = vmul.f32 %v4298_v23, %v993_v59 }
 0x389   :  { %v996_v3 = vadd.f32 %v995_v29, %v954_v42 }
 0x38b   :  { %4296 = vtanh.f32 %v996_v3 }
 0x391   :  { %v4297_v43 = vpop.eup %4296 }
 0x392   :  { %v999_v39 = vmul.f32 %v4297_v43, %v998_v8 }
 0x394   :  { %v1001_v14 = vadd.f32 %v1000_v55, %v999_v39 }
 0x396   :  { %1002 = vst [vmem:[%s6104_s13] sm:$0xff] %v1001_v14  ;;  %v1003_v29 = vpack.c.bf16 %v1001_v14, %v1001_v14 }
 0x398   :  { %1060 = vmatmul.bf16.vlgmr.msra.gmra.mxu0 %v1003_v29 }
 0x415   :  { %v1061_v56 = vpop.f32.mrf.mxu0 }
 0x416   :  { %v1062_v33 = vadd.f32 %v1061_v56, %v5222_v49 }
 0x418   :  { %v1065_v52 = vadd.f32 %v1062_v33, %v5268_v32 }
 0x419   :  { %1074 = sbr.rel (%p3933_p0) target bundleno = 1550 (0x60e), region = 57 }
 0x41a   :  { %v1067_v2 = vadd.f32 %v5312_v38, %v1065_v52 }
 0x41c   :  { %3931 = vst [vmem:[%s6103_s12 + $0x8] sm:$0xff] %v1067_v2 }
 0x41d   :  { %v1063_v30 = vpop.f32.mrf.mxu0 }
 0x41e   :  { %1075 = vmax.xlane.f32.xlu0 %v1067_v2  ;;  %v4235_v32 = vld [vmem:[%s6097_s6 + $0x38] sm:$0xff]  ;;  %v4234_v11 = vld [vmem:[%s6097_s6 + $0x30] sm:$0xff]  ;;  %v4233_v45 = vld [vmem:[%s6097_s6 + $0x28] sm:$0xff] }
 0x41f   :  { %1161 = vmatpush.bf16.msra.mxu0 %v4235_v32  ;;  %v4232_v3 = vld [vmem:[%s6097_s6 + $0x20] sm:$0xff]  ;;  %v4231_v48 = vld [vmem:[%s6097_s6 + $0x18] sm:$0xff]  ;;  %v4230_v27 = vld [vmem:[%s6097_s6 + $0x10] sm:$0xff] }
 0x420   :  { %v4229_v23 = vld [vmem:[%s6097_s6 + $0x8] sm:$0xff]  ;;  %v4228_v55 = vld [vmem:[%s6097_s6] sm:$0xff] }
 0x423   :  { %1162 = vmatpush.bf16.msra.mxu0 %v4234_v11 }
 0x427   :  { %1163 = vmatpush.bf16.msra.mxu0 %v4233_v45 }
 0x42b   :  { %1164 = vmatpush.bf16.msra.mxu0 %v4232_v3 }
 0x42f   :  { %1165 = vmatpush.bf16.msra.mxu0 %v4231_v48 }
 0x433   :  { %1166 = vmatpush.bf16.msra.mxu0 %v4230_v27 }
 0x437   :  { %1167 = vmatpush.bf16.msra.mxu0 %v4229_v23 }
 0x43b   :  { %1168 = vmatpush.bf16.msra.mxu0 %v4228_v55 }
 0x491   :  { %v1076_v35 = vpop.xlane.xlu0 %1075 }
 0x492   :  { %vm1077_vm9 = vcmp.eq.f32.partialorder %v1067_v2, %v1076_v35  ;;  %v4435_v2 = vmov 1.0|1.0  }
 0x493   :  { %v1078_v49 = vsel %vm1077_vm9, %v4658_v26, 128 }
 0x494   :  { %v1080_v0 = vshra.s32 %v1078_v49, 16  ;;  %v1079_v59 = vand.u32 65535, %v1078_v49 }
 0x496   :  { %v1082_v42 = vcvt.s32.f32 %v1080_v0  ;;  %v1081_v43 = vcvt.s32.f32 %v1079_v59 }
 0x498   :  { %1083 = vmin.xlane.f32.xlu0 %v1082_v42 }
 0x50b   :  { %v1084_v8 = vpop.xlane.xlu0 %1083 }
 0x50c   :  { %vm1085_vm11 = vcmp.eq.f32.partialorder %v1082_v42, %v1084_v8  ;;  %v1090_v14 = vcvt.f32.s32 %v1084_v8 }
 0x50d   :  { %v1086_v39 = vsel %vm1085_vm11, %v1081_v43, inf }
 0x50e   :  { %1087 = vmin.xlane.f32.xlu1 %v1086_v39  ;;  %v1091_v56 = vshll.u32 %v1090_v14, 16 }
 0x581   :  { %v1088_v29 = vpop.xlane.xlu1 %1087 }
 0x582   :  { %v1089_v33 = vcvt.f32.s32 %v1088_v29 }
 0x584   :  { %v1092_v52 = vadd.s32 %v1091_v56, %v1089_v33 }
 0x586   :  { %vm1093_vm12 = vcmp.eq.s32.totalorder %v4658_v26, %v1092_v52 }
 0x587   :  { %vm3967_vm14 = vmpackc.low %vm1093_vm12, %vm1093_vm12 }
 0x588   :  { %3968 = vmatmul.msk.bf16.vlgmr.msra.gmra.mxu0 %vm3967_vm14, %v4435_v2 }
 0x605   :  { %v1170_v30 = vpop.f32.mrf.mxu0 }
 0x606   :  { %v1174_v35 = vpack.c.bf16 %v1170_v30, %v1170_v30 }
 0x608   :  { %1175 = vst.msk [vmem:[#allocation2] sm:$0xf] %vm157_vm0, %v1174_v35 }
 0x60d   :  { %v1172_v49 = vpop.f32.mrf.mxu0 }
 0x60e PF:  { %1187 = vmatpush.bf16.msra.mxu0 %v4524_v4  ;;  %1200 = vmatpush.bf16.msra.mxu1 %v4696_v62  ;;  %v5374_v0 = vld [vmem:[%s6104_s13] sm:$0xff]  ;;  %v6222_v32 = vld [vmem:[#allocation20_spill] sm:$0xff]  ;;  %v6225_v3 = vld [vmem:[#allocation23_spill] sm:$0xff]  ;;  %vm6238_vm15 = vcmask 64512   ;;  %s3969_s10 = sld [smem:[#allocation3 + $0x1]] }
 0x60f   :  { %1213 = vmatpush.bf16.msra.mxu2 %v4719_v9  ;;  %1226 = vmatpush.bf16.msra.mxu3 %v4724_v12  ;;  %v1177_v42 = vpack.c.bf16 %v5374_v0, %v5374_v0  ;;  %v6223_v11 = vld [vmem:[#allocation21_spill] sm:$0xff]  ;;  %v6224_v45 = vld [vmem:[#allocation22_spill] sm:$0xff]  ;;  %v6229_v30 = vld [vmem:[#allocation7_spill] sm:$0xff]  ;;  %s3990_s30 = sld [smem:[#allocation3 + $0x2]] }
 0x610   :  { %v6226_v48 = vld [vmem:[#allocation25_spill] sm:$0xff]  ;;  %v6227_v27 = vld [vmem:[#allocation26_spill] sm:$0xff]  ;;  %v6230_v49 = vld [vmem:[#allocation8_spill] sm:$0xff] }
 0x611   :  { %v6228_v29 = vld [vmem:[#allocation6_spill] sm:$0xff]  ;;  %vm6239_vm10 = vmmov %vm6238_vm15 }
 0x612   :  { %1188 = vmatpush.bf16.msra.mxu0 %v4534_v7  ;;  %1201 = vmatpush.bf16.msra.mxu1 %v4711_v5  ;;  %vm6240_vm13 = vmmov %vm6239_vm10 }
 0x613   :  { %1214 = vmatpush.bf16.msra.mxu2 %v4736_v18  ;;  %1227 = vmatpush.bf16.msra.mxu3 %v4742_v21  ;;  %vm6242_vm9 = vmmov %vm6239_vm10 }
 0x614   :  { %vm6243_vm11 = vmmov %vm6242_vm9  ;;  %p1179_p1 = scmp.ne.s32.totalorder %s3969_s10, 0 }
 0x615   :  { %vm6244_vm12 = vmmov %vm6242_vm9  ;;  %p3991_p2 = scmp.ne.s32.totalorder %s3990_s30, 0 }
 0x616   :  { %1189 = vmatpush.bf16.msra.mxu0 %v4543_v10  ;;  %1202 = vmatpush.bf16.msra.mxu1 %v4751_v28  ;;  %vm6252_vm14 = vmmov %vm6242_vm9  ;;  %s1183_s26 = scalar_select %p1179_p1, 1, 0 }
 0x617   :  { %1215 = vmatpush.bf16.msra.mxu2 %v4766_v36  ;;  %1228 = vmatpush.bf16.msra.mxu3 %v4769_v37 }
 0x61a   :  { %1190 = vmatpush.bf16.msra.mxu0 %v4552_v13  ;;  %1203 = vmatpush.bf16.msra.mxu1 %v4778_v40 }
 0x61b   :  { %1216 = vmatpush.bf16.msra.mxu2 %v4793_v47  ;;  %1229 = vmatpush.bf16.msra.mxu3 %v4796_v50 }
 0x61e   :  { %1191 = vmatpush.bf16.msra.mxu0 %v4561_v16  ;;  %1204 = vmatpush.bf16.msra.mxu1 %v4805_v54 }
 0x61f   :  { %1217 = vmatpush.bf16.msra.mxu2 %v4820_v61  ;;  %1230 = vmatpush.bf16.msra.mxu3 %v4823_v63 }
 0x622   :  { %1192 = vmatpush.bf16.msra.mxu0 %v4570_v19  ;;  %1205 = vmatpush.bf16.msra.mxu1 %v4832_v6 }
 0x623   :  { %1218 = vmatpush.bf16.msra.mxu2 %v4848_v20  ;;  %1231 = vmatpush.bf16.msra.mxu3 %v4851_v24 }
 0x626   :  { %1193 = vmatpush.bf16.msra.mxu0 %v4579_v22  ;;  %1206 = vmatpush.bf16.msra.mxu1 %v4860_v31 }
 0x627   :  { %1219 = vmatpush.bf16.msra.mxu2 %v4875_v41  ;;  %1232 = vmatpush.bf16.msra.mxu3 %v4881_v44 }
 0x62a   :  { %1194 = vmatpush.bf16.msra.mxu0 %v4588_v25  ;;  %1207 = vmatpush.bf16.msra.mxu1 %v4890_v53 }
 0x62b   :  { %1220 = vmatpush.bf16.msra.mxu2 %v4899_v58  ;;  %1233 = vmatpush.bf16.msra.mxu3 %v4905_v1 }
 0x62d   :  { %1195 = vmatmul.bf16.vlgmr.msra.gmra.mxu0 %v1177_v42  ;;  %1208 = vmatmul.bf16.vlgmr.msra.gmra.mxu1 %v1177_v42 }
 0x62e   :  { %1375 = vmatpush.bf16.msrb.mxu1 %v4902_v60  ;;  %1221 = vmatmul.bf16.vlgmr.msra.gmra.mxu2 %v1177_v42  ;;  %v6233_v60 = vld [vmem:[#allocation11_spill] sm:$0xff] }
 0x62f   :  { %1407 = vmatpush.bf16.msrb.mxu2 %v4925_v15  ;;  %1234 = vmatmul.bf16.vlgmr.msra.gmra.mxu3 %v1177_v42 }
 0x630   :  { %1423 = vmatpush.bf16.msrb.mxu3 %v4928_v17  ;;  %1439 = vmatpush.bf16.msrb.mxu0 %v6222_v32  ;;  %v6232_v17 = vld [vmem:[#allocation10_spill] sm:$0xff] }
 0x632   :  { %1391 = vmatpush.bf16.msra.mxu1 %v6223_v11 }
 0x633   :  { %1471 = vmatpush.bf16.msra.mxu2 %v6224_v45  ;;  %v6231_v45 = vld [vmem:[#allocation9_spill] sm:$0xff] }
 0x634   :  { %1487 = vmatpush.bf16.msra.mxu3 %v6225_v3  ;;  %1510 = vmatpush.bf16.msra.mxu0 %v6226_v48 }
 0x638   :  { %1511 = vmatpush.bf16.msra.mxu0 %v6227_v27 }
 0x6aa   :  { %v1196_v59 = vpop.f32.mrf.mxu0 }
 0x6ab   :  { %v1250_v8 = vperm.slane %v1196_v59, 0  ;;  %v1246_v43 = vrot.slane %v1196_v59, 4  ;;  %v1244_v39 = vrot.slane %v1196_v59, 2  ;;  %v1243_v23 = vrot.slane %v1196_v59, 1 }
 0x6ac   :  { %v1247_v55 = vrot.slane %v1196_v59, 5  ;;  %v1245_v14 = vrot.slane %v1196_v59, 3  ;;  %v1248_v48 = vrot.slane %v1196_v59, 6 }
 0x6ad   :  { %v1266_v56 = vadd.f32 %v1250_v8, %v6228_v29  ;;  %v1254_v33 = vperm.slane %v1246_v43, 0  ;;  %v1252_v52 = vperm.slane %v1244_v39, 0  ;;  %v1251_v2 = vperm.slane %v1243_v23, 0  ;;  %v6234_v29 = vld [vmem:[#allocation12_spill] sm:$0xff] }
 0x6ae   :  { %v1255_v32 = vperm.slane %v1247_v55, 0  ;;  %v1253_v11 = vperm.slane %v1245_v14, 0  ;;  %v1249_v43 = vrot.slane %v1196_v59, 7  ;;  %v1256_v23 = vperm.slane %v1248_v48, 0  ;;  %v6236_v59 = vld [vmem:[#allocation14_spill] sm:$0xff] }
 0x6af   :  { %4299 = vtanh.f32 %v1266_v56  ;;  %v1270_v35 = vadd.f32 %v1254_v33, %v6229_v30  ;;  %v1268_v42 = vadd.f32 %v1252_v52, %v6230_v49  ;;  %v1267_v3 = vadd.f32 %v1251_v2, %v6231_v45  ;;  %v6235_v30 = vld [vmem:[#allocation13_spill] sm:$0xff] }
 0x6b0   :  { %v1271_v15 = vadd.f32 %v1255_v32, %v6232_v17  ;;  %v1269_v8 = vadd.f32 %v1253_v11, %v6233_v60  ;;  %v1257_v52 = vperm.slane %v1249_v43, 0  ;;  %v1272_v17 = vadd.f32 %v1256_v23, %v6235_v30 }
 0x6b1   :  { %4301 = vtanh.f32 %v1270_v35 }
 0x6b2   :  { %v1198_v27 = vpop.f32.mrf.mxu0  ;;  %4303 = vtanh.f32 %v1268_v42  ;;  %v1273_v35 = vadd.f32 %v1257_v52, %v6236_v59 }
 0x6b3   :  { %4305 = vtanh.f32 %v1267_v3 }
 0x6b4   :  { %4307 = vtanh.f32 %v1271_v15 }
 0x6b5   :  { %v4300_v39 = vpop.eup %4299  ;;  %4309 = vtanh.f32 %v1269_v8 }
 0x6b6   :  { %v1282_v56 = vmul.f32 %v4300_v39, %v6234_v29  ;;  %4311 = vtanh.f32 %v1272_v17 }
 0x6b7   :  { %v4302_v33 = vpop.eup %4301  ;;  %4313 = vtanh.f32 %v1273_v35 }
 0x6b8   :  { %v4304_v55 = vpop.eup %4303  ;;  %1290 = vadd.xlane.f32.xlu0 %v1282_v56  ;;  %v1286_v14 = vmul.f32 %v4302_v33, %v6234_v29 }
 0x6b9   :  { %v1284_v2 = vmul.f32 %v4304_v55, %v6234_v29  ;;  %v4306_v60 = vpop.eup %4305 }
 0x6ba   :  { %1298 = vadd.xlane.f32.xlu2 %v1286_v14  ;;  %v4308_v49 = vpop.eup %4307  ;;  %v1283_v15 = vmul.f32 %v4306_v60, %v6234_v29 }
 0x6bb   :  { %1294 = vadd.xlane.f32.xlu1 %v1284_v2  ;;  %v4310_v42 = vpop.eup %4309  ;;  %v1287_v32 = vmul.f32 %v4308_v49, %v6234_v29 }
 0x6bc   :  { %v1285_v11 = vmul.f32 %v4310_v42, %v6234_v29  ;;  %v4312_v45 = vpop.eup %4311 }
 0x6bd   :  { %v4314_v3 = vpop.eup %4313  ;;  %v1288_v48 = vmul.f32 %v4312_v45, %v6234_v29 }
 0x6be   :  { %v1289_v27 = vmul.f32 %v4314_v3, %v6234_v29 }
 0x6c0   :  { %1292 = vadd.xlane.f32.xlu0 %v1283_v15 }
 0x6c2   :  { %1300 = vadd.xlane.f32.xlu2 %v1287_v32 }
 0x6c3   :  { %1296 = vadd.xlane.f32.xlu1 %v1285_v11 }
 0x6c8   :  { %1302 = vadd.xlane.f32.xlu0 %v1288_v48  ;;  %v6248_v48 = vld [vmem:[#allocation31_spill] sm:$0xff] }
 0x6cb   :  { %1304 = vadd.xlane.f32.xlu1 %v1289_v27 }
 0x72b   :  { %v1291_v8 = vpop.xlane.xlu0 %1290 }
 0x72c   :  { %v1314_v56 = vperm.slane %v1291_v8, %v4658_v26 }
 0x72d   :  { %v1299_v43 = vpop.xlane.xlu2 %1298 }
 0x72e   :  { %v1295_v39 = vpop.xlane.xlu1 %1294  ;;  %v1318_v29 = vperm.slane %v1299_v43, %v4658_v26 }
 0x72f   :  { %v1316_v55 = vperm.slane %v1295_v39, %v4658_v26 }
 0x733   :  { %v1293_v23 = vpop.xlane.xlu0 %1292 }
 0x734   :  { %v1315_v33 = vperm.slane %v1293_v23, %v4658_v26 }
 0x735   :  { %v1301_v17 = vpop.xlane.xlu2 %1300 }
 0x736   :  { %v1322_v14 = vsel %vm467_vm1, %v1315_v33, %v1314_v56  ;;  %v1297_v52 = vpop.xlane.xlu1 %1296  ;;  %v1319_v35 = vperm.slane %v1301_v17, %v4658_v26 }
 0x737   :  { %v1317_v2 = vperm.slane %v1297_v52, %v4658_v26  ;;  %v1323_v30 = vsel %vm469_vm2, %v1316_v55, %v1322_v14 }
 0x739   :  { %v1324_v60 = vsel %vm471_vm3, %v1317_v2, %v1323_v30 }
 0x73a   :  { %v1325_v59 = vsel %vm473_vm4, %v1318_v29, %v1324_v60 }
 0x73b   :  { %v1303_v49 = vpop.xlane.xlu0 %1302  ;;  %v1326_v15 = vsel %vm475_vm5, %v1319_v35, %v1325_v59 }
 0x73c   :  { %v1320_v42 = vperm.slane %v1303_v49, %v4658_v26  ;;  %v5430_v49 = vpop.f32.mrf.mxu1 }
 0x73e   :  { %v1327_v32 = vsel %vm477_vm6, %v1320_v42, %v1326_v15  ;;  %v1305_v11 = vpop.xlane.xlu1 %1304  ;;  %v5432_v42 = vpop.f32.mrf.mxu2  ;;  %v6241_v15 = vld [vmem:[#allocation24_spill] sm:$0xff] }
 0x73f   :  { %v1321_v45 = vperm.slane %v1305_v11, %v4658_v26  ;;  %v6245_v11 = vld [vmem:[#allocation28_spill] sm:$0xff] }
 0x741   :  { %v1328_v3 = vsel %vm479_vm7, %v1321_v45, %v1327_v32  ;;  %v5435_v32 = vpop.f32.mrf.mxu3  ;;  %v6246_v45 = vld [vmem:[#allocation29_spill] sm:$0xff] }
 0x742   :  { %v1330_v27 = vsel %vm80_vm8, -1e+10, %v1328_v3  ;;  %v6247_v3 = vld [vmem:[#allocation33_spill] sm:$0xff] }
 0x743   :  { %v1331_v8 = vsel %vm6238_vm15, %v1330_v27, -inf  ;;  %vm6255_vm15 = vmmov %vm6242_vm9 }
 0x744   :  { %1332 = vmax.xlane.f32.xlu2 %v1331_v8 }
 0x746   :  { %v1224_v8 = vpop.f32.mrf.mxu2 }
 0x7b7   :  { %v1333_v43 = vpop.xlane.xlu2 %1332 }
 0x7b8   :  { %v1334_v39 = vsub.f32 %v1330_v27, %v1333_v43  ;;  %v1211_v27 = vpop.f32.mrf.mxu1  ;;  %v6249_v43 = vld [vmem:[#allocation32_spill] sm:$0xff] }
 0x7b9   :  { %v6263_v27 = vld [vmem:[#allocation44_spill] sm:$0xff] }
 0x7ba   :  { %v1335_v23 = vmul.f32 1.442695, %v1334_v39  ;;  %v6250_v39 = vld [vmem:[#allocation37_spill] sm:$0xff] }
 0x7bc   :  { %4315 = vpow2.f32 %v1335_v23  ;;  %v1237_v23 = vpop.f32.mrf.mxu3 }
 0x7bd   :  { %v6267_v23 = vld [vmem:[#allocation34_spill] sm:$0xff] }
 0x7c2   :  { %v4316_v56 = vpop.eup %4315 }
 0x7c3   :  { %v1337_v33 = vsel %vm6239_vm10, %v4316_v56, 0.0  ;;  %vm6256_vm10 = vmmov %vm6242_vm9 }
 0x7c4   :  { %1338 = vadd.xlane.f32.xlu0 %v1337_v33 }
 0x837   :  { %v1339_v55 = vpop.xlane.xlu0 %1338 }
 0x838   :  { %4317 = vrcp.f32 %v1339_v55 }
 0x83e   :  { %v4318_v14 = vpop.eup %4317 }
 0x83f   :  { %v1341_v52 = vmul.f32 %v4318_v14, %v4316_v56  ;;  %v6251_v14 = vld [vmem:[#allocation41_spill] sm:$0xff] }
 0x841   :  { %v1357_v2 = vpack.c.bf16 %v1341_v52, %v1341_v52  ;;  %v1344_v30 = vrot.slane %v1341_v52, 2  ;;  %v1345_v29 = vrot.slane %v1341_v52, 3  ;;  %v1346_v17 = vrot.slane %v1341_v52, 4 }
 0x842   :  { %v1343_v56 = vrot.slane %v1341_v52, 1  ;;  %v1348_v33 = vrot.slane %v1341_v52, 6  ;;  %v1349_v55 = vrot.slane %v1341_v52, 7 }
 0x843   :  { %3971 = vmatmul.msk.bf16.vlgmr.msrb.gmra.mxu1 %vm6240_vm13, %v1357_v2  ;;  %v1359_v60 = vpack.c.bf16 %v1344_v30, %v1344_v30  ;;  %v1360_v59 = vpack.c.bf16 %v1345_v29, %v1345_v29  ;;  %v1361_v35 = vpack.c.bf16 %v1346_v17, %v1346_v17  ;;  %v6253_v17 = vld [vmem:[#allocation45_spill] sm:$0xff]  ;;  %vm6266_vm13 = vmmov %vm6242_vm9 }
 0x844   :  { %1455 = vmatpush.bf16.msrb.mxu1 %v6241_v15  ;;  %v1358_v2 = vpack.c.bf16 %v1343_v56, %v1343_v56  ;;  %v1363_v30 = vpack.c.bf16 %v1348_v33, %v1348_v33  ;;  %v1364_v29 = vpack.c.bf16 %v1349_v55, %v1349_v55  ;;  %v6259_v15 = vld [vmem:[#allocation30_spill] sm:$0xff] }
 0x845   :  { %3973 = vmatmul.msk.bf16.vlgmr.msrb.gmra.mxu2 %vm6242_vm9, %v1359_v60  ;;  %3974 = vmatmul.msk.bf16.vlgmr.msrb.gmra.mxu3 %vm6243_vm11, %v1360_v59  ;;  %v6254_v60 = vld [vmem:[#allocation27_spill] sm:$0xff]  ;;  %v6268_v56 = vld [vmem:[#allocation38_spill] sm:$0xff]  ;;  %vm6271_vm11 = vcmask 261120  }
 0x846   :  { %3975 = vmatmul.msk.bf16.vlgmr.msrb.gmra.mxu0 %vm6244_vm12, %v1361_v35  ;;  %1536 = vmatpush.bf16.msrb.mxu2 %v6245_v11  ;;  %v6257_v59 = vld [vmem:[#allocation35_spill] sm:$0xff]  ;;  %v6258_v35 = vld [vmem:[#allocation36_spill] sm:$0xff]  ;;  %v6269_v33 = vld [vmem:[#allocation42_spill] sm:$0xff] }
 0x847   :  { %1549 = vmatpush.bf16.msrb.mxu3 %v6246_v45  ;;  %1594 = vmatpush.bf16.msrb.mxu0 %v6247_v3  ;;  %v6260_v11 = vld [vmem:[#allocation39_spill] sm:$0xff]  ;;  %v6261_v45 = vld [vmem:[#allocation40_spill] sm:$0xff]  ;;  %v1347_v3 = vrot.slane %v1341_v52, 5  ;;  %v6270_v55 = vld [vmem:[#allocation46_spill] sm:$0xff]  ;;  %v1184_v52 = vstv %s1183_s26 }
 0x848   :  { %vm1185_vm9 = vcmp.eq.s32.totalorder %v1184_v52, 1  ;;  %vm6272_vm12 = vmmov %vm6271_vm11  ;;  %v6280_v52 = vld [vmem:[#allocation60_spill] sm:$0xff] }
 0x849   :  { %v1362_v8 = vpack.c.bf16 %v1347_v3, %v1347_v3  ;;  %v6277_v3 = vld [vmem:[#allocation57_spill] sm:$0xff] }
 0x84a   :  { %1537 = vmatpush.bf16.msrb.mxu2 %v6248_v48  ;;  %v6262_v48 = vld [vmem:[#allocation43_spill] sm:$0xff] }
 0x84b   :  { %1550 = vmatpush.bf16.msrb.mxu3 %v6249_v43  ;;  %1595 = vmatpush.bf16.msrb.mxu0 %v6250_v39  ;;  %v6264_v43 = vld [vmem:[#allocation47_spill] sm:$0xff]  ;;  %v6265_v39 = vld [vmem:[#allocation48_spill] sm:$0xff] }
 0x84f   :  { %1596 = vmatpush.bf16.msrb.mxu0 %v6251_v14  ;;  %v3970_v14 = vld [vmem:[%s6092_s1 + $0x4] sm:$0xf] }
 0x853   :  { %3972 = vmatmul.msk.bf16.vlgmr.msra.gmra.mxu1 %vm6252_vm14, %v1358_v2  ;;  %1597 = vmatpush.bf16.msrb.mxu0 %v6253_v17  ;;  %v1182_v2 = vld [vmem:[#allocation2] sm:$0xf]  ;;  %vm6273_vm14 = vmmov %vm6271_vm11 }
 0x854   :  { %1523 = vmatpush.bf16.msra.mxu1 %v6254_v60  ;;  %v6275_v60 = vld [vmem:[#allocation55_spill] sm:$0xff] }
 0x855   :  { %3977 = vmatmul.msk.bf16.vlgmr.msra.gmra.mxu2 %vm6255_vm15, %v1363_v30  ;;  %3978 = vmatmul.msk.bf16.vlgmr.msra.gmra.mxu3 %vm6256_vm10, %v1364_v29  ;;  %v1186_v30 = vsel %vm1185_vm9, %v3970_v14, %v1182_v2  ;;  %vm6274_vm15 = vmmov %vm6271_vm11  ;;  %vm6281_vm10 = vcmask 523264  }
 0x856   :  { %1620 = vmatpush.bf16.msra.mxu2 %v6257_v59  ;;  %1633 = vmatpush.bf16.msra.mxu3 %v6258_v35  ;;  %v6276_v59 = vld [vmem:[#allocation56_spill] sm:$0xff]  ;;  %vm6283_vm9 = vmmov %vm6281_vm10 }
 0x857   :  { %3979 = vmatmul.msk.bf16.vlgmr.msra.gmra.mxu0 %vm6271_vm11, %v1186_v30  ;;  %vm6284_vm11 = vmmov %vm6283_vm9 }
 0x858   :  { %1524 = vmatpush.bf16.msra.mxu1 %v6259_v15  ;;  %1697 = vmatpush.bf16.msra.mxu0 %v5227_v46 }
 0x85a   :  { %1621 = vmatpush.bf16.msra.mxu2 %v6260_v11  ;;  %1634 = vmatpush.bf16.msra.mxu3 %v6261_v45 }
 0x85c   :  { %1698 = vmatpush.bf16.msra.mxu0 %v5239_v34 }
 0x85e   :  { %1622 = vmatpush.bf16.msra.mxu2 %v6262_v48  ;;  %1635 = vmatpush.bf16.msra.mxu3 %v6263_v27  ;;  %v6278_v48 = vld [vmem:[#allocation58_spill] sm:$0xff] }
 0x860   :  { %1699 = vmatpush.bf16.msra.mxu0 %v6275_v60 }
 0x862   :  { %1623 = vmatpush.bf16.msra.mxu2 %v6264_v43  ;;  %1636 = vmatpush.bf16.msra.mxu3 %v6265_v39 }
 0x863   :  { %3976 = vmatmul.msk.bf16.vlgmr.msrb.gmra.mxu1 %vm6266_vm13, %v1362_v8  ;;  %vm6282_vm13 = vmmov %vm6281_vm10 }
 0x864   :  { %1607 = vmatpush.bf16.msrb.mxu1 %v6267_v23  ;;  %1700 = vmatpush.bf16.msra.mxu0 %v6276_v59  ;;  %v6279_v23 = vld [vmem:[#allocation59_spill] sm:$0xff] }
 0x865   :  { %3981 = vmatmul.msk.bf16.vlgmr.msrb.gmra.mxu2 %vm6273_vm14, %v1186_v30  ;;  %3982 = vmatmul.msk.bf16.vlgmr.msrb.gmra.mxu3 %vm6274_vm15, %v1186_v30 }
 0x868   :  { %1608 = vmatpush.bf16.msrb.mxu1 %v6268_v56  ;;  %1701 = vmatpush.bf16.msra.mxu0 %v6277_v3 }
 0x86c   :  { %1609 = vmatpush.bf16.msrb.mxu1 %v6269_v33  ;;  %1702 = vmatpush.bf16.msra.mxu0 %v6278_v48 }
 0x870   :  { %1610 = vmatpush.bf16.msrb.mxu1 %v6270_v55  ;;  %1703 = vmatpush.bf16.msra.mxu0 %v6279_v23 }
 0x873   :  { %3980 = vmatmul.msk.bf16.vlgmr.msra.gmra.mxu1 %vm6272_vm12, %v1186_v30 }
 0x874   :  { %1704 = vmatpush.bf16.msra.mxu0 %v6280_v52 }
 0x8c0   :  { %v1377_v29 = vpop.f32.mrf.mxu1 }
 0x8c1   :  { %v1493_v55 = vpack.c.bf16 %v1377_v29, %v1377_v29 }
 0x8c3   :  { %v1441_v17 = vpop.f32.mrf.mxu0 }
 0x8c4   :  { %v1497_v3 = vpack.c.bf16 %v1441_v17, %v1441_v17 }
 0x8c6   :  { %v1568_v23 = vunpack.c.l.b16 %v1497_v3 }
 0x8c8   :  { %v1379_v35 = vpop.f32.mrf.mxu1  ;;  %v1409_v15 = vpop.f32.mrf.mxu2  ;;  %v1578_v17 = vrot.slane %v1568_v23, 4 }
 0x8c9   :  { %v1425_v11 = vpop.f32.mrf.mxu3  ;;  %v1495_v33 = vpack.c.bf16 %v1409_v15, %v1409_v15 }
 0x8ca   :  { %v1496_v30 = vpack.c.bf16 %v1425_v11, %v1425_v11 }
 0x8cb   :  { %v1443_v45 = vpop.f32.mrf.mxu0  ;;  %v1566_v35 = vunpack.c.l.b16 %v1495_v33 }
 0x8cc   :  { %v1564_v45 = vunpack.c.l.b16 %v1493_v55  ;;  %v1567_v48 = vunpack.c.l.b16 %v1496_v30 }
 0x8ce   :  { %v1576_v52 = vrot.slane %v1567_v48, 5 }
 0x8d0   :  { %v1393_v27 = vpop.f32.mrf.mxu1  ;;  %v1411_v8 = vpop.f32.mrf.mxu2 }
 0x8d1   :  { %v1494_v43 = vpack.c.bf16 %v1393_v27, %v1393_v27  ;;  %v1427_v39 = vpop.f32.mrf.mxu3  ;;  %v1574_v27 = vrot.slane %v1566_v35, 6 }
 0x8d3   :  { %v1565_v56 = vunpack.c.l.b16 %v1494_v43 }
 0x8d5   :  { %v1572_v60 = vrot.slane %v1565_v56, 7 }
 0x8d7   :  { %v1573_v8 = vsel %vm467_vm1, %v1572_v60, %v1564_v45 }
 0x8d8   :  { %v1395_v14 = vpop.f32.mrf.mxu1  ;;  %v1473_v2 = vpop.f32.mrf.mxu2  ;;  %v1575_v15 = vsel %vm469_vm2, %v1574_v27, %v1573_v8 }
 0x8d9   :  { %v1489_v59 = vpop.f32.mrf.mxu3  ;;  %v1499_v39 = vpack.c.bf16 %v1473_v2, %v1473_v2  ;;  %v1577_v33 = vsel %vm471_vm3, %v1576_v52, %v1575_v15 }
 0x8da   :  { %v1500_v34 = vpack.c.bf16 %v1489_v59, %v1489_v59  ;;  %v1579_v60 = vsel %vm473_vm4, %v1578_v17, %v1577_v33  ;;  %v6286_v33 = vld [vmem:[#allocation52_spill] sm:$0xff] }
 0x8db   :  { %v1570_v11 = vunpack.c.l.b16 %v1499_v39  ;;  %v1240_v17 = vadd.f32 %v5432_v42, %v6286_v33 }
 0x8dc   :  { %v1571_v56 = vunpack.c.l.b16 %v1500_v34 }
 0x8dd   :  { %v1582_v30 = vrot.slane %v1570_v11, 2  ;;  %v6285_v11 = vld [vmem:[#allocation51_spill] sm:$0xff] }
 0x8de   :  { %v1584_v2 = vrot.slane %v1571_v56, 1  ;;  %v1239_v56 = vadd.f32 %v5430_v49, %v6285_v11 }
 0x8e0   :  { %v1457_v29 = vpop.f32.mrf.mxu1  ;;  %v1475_v43 = vpop.f32.mrf.mxu2 }
 0x8e1   :  { %v1498_v14 = vpack.c.bf16 %v1457_v29, %v1457_v29  ;;  %v1491_v46 = vpop.f32.mrf.mxu3 }
 0x8e3   :  { %v1569_v1 = vunpack.c.l.b16 %v1498_v14 }
 0x8e5   :  { %v1580_v55 = vrot.slane %v1569_v1, 3  ;;  %v1513_v1 = vpop.f32.mrf.mxu0 }
 0x8e7   :  { %v1581_v59 = vsel %vm475_vm5, %v1580_v55, %v1579_v60  ;;  %v6287_v55 = vld [vmem:[#allocation53_spill] sm:$0xff]  ;;  %v6288_v60 = vld [vmem:[#allocation54_spill] sm:$0xff] }
 0x8e8   :  { %v1583_v35 = vsel %vm477_vm6, %v1582_v30, %v1581_v59  ;;  %v1459_v45 = vpop.f32.mrf.mxu1  ;;  %v1539_v34 = vpop.f32.mrf.mxu2 }
 0x8e9   :  { %v1585_v3 = vsel %vm479_vm7, %v1584_v2, %v1583_v35  ;;  %v5492_v8 = vpop.f32.mrf.mxu3 }
 0x8ea   :  { %v1586_v48 = vpack.c.b16 %v1585_v3, %v1585_v3 }
 0x8ec   :  { %3983 = vmatmul.msk.bf16.vlgmr.msrb.gmra.mxu0 %vm6281_vm10, %v1586_v48  ;;  %3984 = vmatmul.msk.bf16.vlgmr.msrb.gmra.mxu1 %vm6282_vm13, %v1586_v48 }
 0x8ed   :  { %3985 = vmatmul.msk.bf16.vlgmr.msra.gmra.mxu2 %vm6283_vm9, %v1586_v48  ;;  %3986 = vmatmul.msk.bf16.vlgmr.msra.gmra.mxu3 %vm6284_vm11, %v1586_v48  ;;  %v1515_v27 = vpop.f32.mrf.mxu0 }
 0x8f0   :  { %v1526_v46 = vpop.f32.mrf.mxu1  ;;  %v1541_v23 = vpop.f32.mrf.mxu2 }
 0x8f1   :  { %v1554_v15 = vpop.f32.mrf.mxu3 }
 0x8f8   :  { %v1528_v39 = vpop.f32.mrf.mxu1 }
 0x969   :  { %v1599_v29 = vpop.f32.mrf.mxu0  ;;  %v1612_v43 = vpop.f32.mrf.mxu1 }
 0x96a   :  { %v1642_v52 = vadd.f32 %v1599_v29, %v1513_v1  ;;  %v1643_v14 = vadd.f32 %v1612_v43, %v1526_v46 }
 0x96c   :  { %v1645_v30 = vadd.f32 %v1642_v52, %v6287_v55  ;;  %v1646_v2 = vadd.f32 %v1643_v14, %v6288_v60 }
 0x96e   :  { %v1648_v59 = vadd.f32 %v1645_v30, %v1239_v56  ;;  %v1668_v35 = vadd.f32 %v1646_v2, %v1240_v17 }
 0x970   :  { %v3987_v45 = vmul.f32 -1.442695, %v1648_v59  ;;  %v3988_v3 = vmul.f32 -1.442695, %v1668_v35  ;;  %v1625_v48 = vpop.f32.mrf.mxu2  ;;  %v1638_v27 = vpop.f32.mrf.mxu3 }
 0x971   :  { %v1601_v39 = vpop.f32.mrf.mxu0  ;;  %v1614_v23 = vpop.f32.mrf.mxu1  ;;  %v1644_v2 = vadd.f32 %v1625_v48, %v1539_v34 }
 0x972   :  { %4319 = vpow2.f32 %v3987_v45  ;;  %v1241_v45 = vadd.f32 %v5435_v32, %v5294_v57 }
 0x973   :  { %4321 = vpow2.f32 %v3988_v3 }
 0x978   :  { %v4320_v1 = vpop.eup %4319  ;;  %v1627_v46 = vpop.f32.mrf.mxu2 }
 0x979   :  { %v1640_v49 = vpop.f32.mrf.mxu3  ;;  %v4322_v15 = vpop.eup %4321  ;;  %v1652_v29 = vadd.f32 1.0, %v4320_v1  ;;  %v1647_v46 = vadd.f32 %v1644_v2, %v5297_v51 }
 0x97a   :  { %v1672_v42 = vadd.f32 1.0, %v4322_v15 }
 0x97b   :  { %4323 = vrcp.f32 %v1652_v29  ;;  %v1664_v17 = vand.u32 2147483648, %v1652_v29  ;;  %v1662_v30 = vand.u32 2147483647, %v1652_v29  ;;  %vm1658_vm14 = vweird.f32 %v1652_v29 }
 0x97c   :  { %4325 = vrcp.f32 %v1672_v42  ;;  %v1684_v1 = vand.u32 2147483648, %v1672_v42  ;;  %vm1678_vm9 = vweird.f32 %v1672_v42  ;;  %v1682_v15 = vand.u32 2147483647, %v1672_v42 }
 0x97d   :  { %v1665_v35 = vor.u32 1.1754944e-38, %v1664_v17  ;;  %vm1663_vm10 = vcmp.eq.f32.partialorder %v1662_v30, 8.507059e+37 }
 0x981   :  { %v4324_v43 = vpop.eup %4323 }
 0x982   :  { %v4326_v52 = vpop.eup %4325  ;;  %v1654_v14 = vmul.f32 %v4324_v43, %v1652_v29  ;;  %vm1659_vm12 = vweird.f32 %v4324_v43  ;;  %v1685_v29 = vor.u32 1.1754944e-38, %v1684_v1 }
 0x983   :  { %v1674_v11 = vmul.f32 %v4326_v52, %v1672_v42  ;;  %vm1660_vm15 = vmor %vm1658_vm14, %vm1659_vm12  ;;  %vm1679_vm13 = vweird.f32 %v4326_v52  ;;  %vm1683_vm12 = vcmp.eq.f32.partialorder %v1682_v15, 8.507059e+37 }
 0x984   :  { %v1655_v56 = vsub.f32 1.0, %v1654_v14  ;;  %vm1680_vm11 = vmor %vm1678_vm9, %vm1679_vm13 }
 0x985   :  { %v1675_v33 = vsub.f32 1.0, %v1674_v11 }
 0x986   :  { %v1656_v55 = vmul.f32 %v4324_v43, %v1655_v56 }
 0x987   :  { %v1676_v60 = vmul.f32 %v4326_v52, %v1675_v33 }
 0x988   :  { %v1657_v59 = vadd.f32 %v4324_v43, %v1656_v55 }
 0x989   :  { %v1677_v23 = vadd.f32 %v4326_v52, %v1676_v60 }
 0x98a   :  { %v1661_v3 = vsel %vm1660_vm15, %v4324_v43, %v1657_v59 }
 0x98b   :  { %v1666_v39 = vsel %vm1663_vm10, %v1665_v35, %v1661_v3  ;;  %v1681_v48 = vsel %vm1680_vm11, %v4326_v52, %v1677_v23 }
 0x98c   :  { %v1688_v49 = vmul.f32 %v1666_v39, %v1241_v45  ;;  %v1686_v14 = vsel %vm1683_vm12, %v1685_v29, %v1681_v48 }
 0x98d   :  { %v1691_v11 = vsub.f32 1.0, %v1686_v14  ;;  %v1693_v56 = vmul.f32 %v1686_v14, %v5374_v0 }
 0x98e   :  { %v1689_v34 = vadd.f32 %v1688_v49, %v1647_v46 }
 0x990   :  { %4327 = vtanh.f32 %v1689_v34 }
 0x996   :  { %v4328_v32 = vpop.eup %4327 }
 0x997   :  { %v1692_v43 = vmul.f32 %v4328_v32, %v1691_v11 }
 0x999   :  { %v1694_v33 = vadd.f32 %v1693_v56, %v1692_v43 }
 0x99b   :  { %1695 = vst [vmem:[%s6104_s13] sm:$0xff] %v1694_v33  ;;  %v1696_v17 = vpack.c.bf16 %v1694_v33, %v1694_v33 }
 0x99d   :  { %1705 = vmatmul.bf16.vlgmr.msra.gmra.mxu0 %v1696_v17 }
 0xa1a   :  { %v1706_v42 = vpop.f32.mrf.mxu0 }
 0xa1b   :  { %v1707_v52 = vadd.f32 %v1706_v42, %v5492_v8 }
 0xa1d   :  { %v1710_v55 = vadd.f32 %v1707_v52, %v1638_v27 }
 0xa1e   :  { %1718 = sbr.rel (%p3991_p2) target bundleno = 3091 (0xc13), region = 61 }
 0xa1f   :  { %v1711_v30 = vadd.f32 %v5312_v38, %v1710_v55 }
 0xa21   :  { %3989 = vst [vmem:[%s6103_s12 + $0x10] sm:$0xff] %v1711_v30 }
 0xa22   :  { %v1708_v60 = vpop.f32.mrf.mxu0 }
 0xa23   :  { %1719 = vmax.xlane.f32.xlu0 %v1711_v30  ;;  %v4243_v8 = vld [vmem:[%s6097_s6 + $0x38] sm:$0xff]  ;;  %v4242_v27 = vld [vmem:[%s6097_s6 + $0x30] sm:$0xff]  ;;  %v4241_v45 = vld [vmem:[%s6097_s6 + $0x28] sm:$0xff]  ;;  %v4436_v56 = vmov 1.0|1.0  }
 0xa24   :  { %1805 = vmatpush.bf16.msra.mxu0 %v4243_v8  ;;  %v4240_v3 = vld [vmem:[%s6097_s6 + $0x20] sm:$0xff]  ;;  %v4239_v39 = vld [vmem:[%s6097_s6 + $0x18] sm:$0xff]  ;;  %v4238_v23 = vld [vmem:[%s6097_s6 + $0x10] sm:$0xff] }
 0xa25   :  { %v4237_v34 = vld [vmem:[%s6097_s6 + $0x8] sm:$0xff]  ;;  %v4236_v48 = vld [vmem:[%s6097_s6] sm:$0xff] }
 0xa28   :  { %1806 = vmatpush.bf16.msra.mxu0 %v4242_v27 }
 0xa2c   :  { %1807 = vmatpush.bf16.msra.mxu0 %v4241_v45 }
 0xa30   :  { %1808 = vmatpush.bf16.msra.mxu0 %v4240_v3 }
 0xa34   :  { %1809 = vmatpush.bf16.msra.mxu0 %v4239_v39 }
 0xa38   :  { %1810 = vmatpush.bf16.msra.mxu0 %v4238_v23 }
 0xa3c   :  { %1811 = vmatpush.bf16.msra.mxu0 %v4237_v34 }
 0xa40   :  { %1812 = vmatpush.bf16.msra.mxu0 %v4236_v48 }
 0xa96   :  { %v1720_v0 = vpop.xlane.xlu0 %1719 }
 0xa97   :  { %vm1721_vm14 = vcmp.eq.f32.partialorder %v1711_v30, %v1720_v0 }
 0xa98   :  { %v1722_v2 = vsel %vm1721_vm14, %v4658_v26, 128 }
 0xa99   :  { %v1724_v59 = vshra.s32 %v1722_v2, 16  ;;  %v1723_v1 = vand.u32 65535, %v1722_v2 }
 0xa9b   :  { %v1726_v35 = vcvt.s32.f32 %v1724_v59  ;;  %v1725_v49 = vcvt.s32.f32 %v1723_v1 }
 0xa9d   :  { %1727 = vmin.xlane.f32.xlu0 %v1726_v35 }
 0xb10   :  { %v1728_v46 = vpop.xlane.xlu0 %1727 }
 0xb11   :  { %vm1729_vm15 = vcmp.eq.f32.partialorder %v1726_v35, %v1728_v46  ;;  %v1734_v29 = vcvt.f32.s32 %v1728_v46 }
 0xb12   :  { %v1730_v15 = vsel %vm1729_vm15, %v1725_v49, inf }
 0xb13   :  { %1731 = vmin.xlane.f32.xlu1 %v1730_v15  ;;  %v1735_v11 = vshll.u32 %v1734_v29, 16 }
 0xb86   :  { %v1732_v14 = vpop.xlane.xlu1 %1731 }
 0xb87   :  { %v1733_v32 = vcvt.f32.s32 %v1732_v14 }
 0xb89   :  { %v1736_v43 = vadd.s32 %v1735_v11, %v1733_v32 }
 0xb8b   :  { %vm1737_vm10 = vcmp.eq.s32.totalorder %v4658_v26, %v1736_v43 }
 0xb8c   :  { %vm4025_vm13 = vmpackc.low %vm1737_vm10, %vm1737_vm10 }
 0xb8d   :  { %4026 = vmatmul.msk.bf16.vlgmr.msra.gmra.mxu0 %vm4025_vm13, %v4436_v56 }
 0xc0a   :  { %v1814_v33 = vpop.f32.mrf.mxu0 }
 0xc0b   :  { %v1818_v17 = vpack.c.bf16 %v1814_v33, %v1814_v33 }
 0xc0d   :  { %1819 = vst.msk [vmem:[#allocation2] sm:$0xf] %vm157_vm0, %v1818_v17 }
 0xc12   :  { %v1816_v42 = vpop.f32.mrf.mxu0 }
 0xc13 PF:  { %1831 = vmatpush.bf16.msra.mxu0 %v4524_v4  ;;  %1844 = vmatpush.bf16.msra.mxu1 %v4696_v62  ;;  %v5567_v52 = vld [vmem:[%s6104_s13] sm:$0xff]  ;;  %v6290_v60 = vld [vmem:[#allocation16_spill] sm:$0xff]  ;;  %v6292_v2 = vld [vmem:[#allocation19_spill] sm:$0xff]  ;;  %vm6309_vm9 = vcmask 64512   ;;  %s4027_s10 = sld [smem:[#allocation3 + $0x2]] }
 0xc14   :  { %1857 = vmatpush.bf16.msra.mxu2 %v4719_v9  ;;  %1870 = vmatpush.bf16.msra.mxu3 %v4724_v12  ;;  %v1821_v55 = vpack.c.bf16 %v5567_v52, %v5567_v52  ;;  %v6289_v30 = vld [vmem:[#allocation17_spill] sm:$0xff]  ;;  %v6291_v0 = vld [vmem:[#allocation18_spill] sm:$0xff]  ;;  %v6293_v59 = vld [vmem:[#allocation20_spill] sm:$0xff]  ;;  %s4048_s30 = sld [smem:[#allocation3 + $0x3]] }
 0xc15   :  { %v6294_v35 = vld [vmem:[#allocation21_spill] sm:$0xff]  ;;  %v6295_v8 = vld [vmem:[#allocation22_spill] sm:$0xff]  ;;  %v6296_v27 = vld [vmem:[#allocation23_spill] sm:$0xff] }
 0xc16   :  { %v6297_v45 = vld [vmem:[#allocation25_spill] sm:$0xff]  ;;  %v6298_v3 = vld [vmem:[#allocation26_spill] sm:$0xff]  ;;  %v6300_v43 = vld [vmem:[#allocation7_spill] sm:$0xff] }
 0xc17   :  { %1832 = vmatpush.bf16.msra.mxu0 %v4534_v7  ;;  %1845 = vmatpush.bf16.msra.mxu1 %v4711_v5  ;;  %v6299_v48 = vld [vmem:[#allocation6_spill] sm:$0xff]  ;;  %v6301_v33 = vld [vmem:[#allocation8_spill] sm:$0xff]  ;;  %vm6310_vm11 = vmmov %vm6309_vm9 }
 0xc18   :  { %1858 = vmatpush.bf16.msra.mxu2 %v4736_v18  ;;  %1871 = vmatpush.bf16.msra.mxu3 %v4742_v21  ;;  %vm6311_vm12 = vmmov %vm6309_vm9 }
 0xc19   :  { %vm6313_vm14 = vmmov %vm6309_vm9  ;;  %p1823_p3 = scmp.ne.s32.totalorder %s4027_s10, 0 }
 0xc1a   :  { %vm6314_vm15 = vmmov %vm6309_vm9  ;;  %p4049_p4 = scmp.ne.s32.totalorder %s4048_s30, 0 }
 0xc1b   :  { %1833 = vmatpush.bf16.msra.mxu0 %v4543_v10  ;;  %1846 = vmatpush.bf16.msra.mxu1 %v4751_v28  ;;  %vm6315_vm10 = vmmov %vm6309_vm9  ;;  %s1827_s26 = scalar_select %p1823_p3, 1, 0 }
 0xc1c   :  { %1859 = vmatpush.bf16.msra.mxu2 %v4766_v36  ;;  %1872 = vmatpush.bf16.msra.mxu3 %v4769_v37  ;;  %vm6323_vm13 = vmmov %vm6309_vm9 }
 0xc1f   :  { %1834 = vmatpush.bf16.msra.mxu0 %v4552_v13  ;;  %1847 = vmatpush.bf16.msra.mxu1 %v4778_v40 }
 0xc20   :  { %1860 = vmatpush.bf16.msra.mxu2 %v4793_v47  ;;  %1873 = vmatpush.bf16.msra.mxu3 %v4796_v50 }
 0xc23   :  { %1835 = vmatpush.bf16.msra.mxu0 %v4561_v16  ;;  %1848 = vmatpush.bf16.msra.mxu1 %v4805_v54 }
 0xc24   :  { %1861 = vmatpush.bf16.msra.mxu2 %v4820_v61  ;;  %1874 = vmatpush.bf16.msra.mxu3 %v4823_v63 }
 0xc27   :  { %1836 = vmatpush.bf16.msra.mxu0 %v4570_v19  ;;  %1849 = vmatpush.bf16.msra.mxu1 %v4832_v6 }
 0xc28   :  { %1862 = vmatpush.bf16.msra.mxu2 %v4848_v20  ;;  %1875 = vmatpush.bf16.msra.mxu3 %v4851_v24 }
 0xc2b   :  { %1837 = vmatpush.bf16.msra.mxu0 %v4579_v22  ;;  %1850 = vmatpush.bf16.msra.mxu1 %v4860_v31 }
 0xc2c   :  { %1863 = vmatpush.bf16.msra.mxu2 %v4875_v41  ;;  %1876 = vmatpush.bf16.msra.mxu3 %v4881_v44 }
 0xc2f   :  { %1838 = vmatpush.bf16.msra.mxu0 %v4588_v25  ;;  %1851 = vmatpush.bf16.msra.mxu1 %v4890_v53 }
 0xc30   :  { %1864 = vmatpush.bf16.msra.mxu2 %v4899_v58  ;;  %1877 = vmatpush.bf16.msra.mxu3 %v6289_v30  ;;  %v6302_v30 = vld [vmem:[#allocation9_spill] sm:$0xff] }
 0xc32   :  { %1839 = vmatmul.bf16.vlgmr.msra.gmra.mxu0 %v1821_v55  ;;  %1852 = vmatmul.bf16.vlgmr.msra.gmra.mxu1 %v1821_v55 }
 0xc33   :  { %2019 = vmatpush.bf16.msrb.mxu1 %v6290_v60  ;;  %1865 = vmatmul.bf16.vlgmr.msra.gmra.mxu2 %v1821_v55 }
 0xc34   :  { %2051 = vmatpush.bf16.msrb.mxu2 %v6291_v0  ;;  %1878 = vmatmul.bf16.vlgmr.msra.gmra.mxu3 %v1821_v55 }
 0xc35   :  { %2067 = vmatpush.bf16.msrb.mxu3 %v6292_v2  ;;  %2083 = vmatpush.bf16.msrb.mxu0 %v6293_v59  ;;  %v6303_v59 = vld [vmem:[#allocation10_spill] sm:$0xff] }
 0xc37   :  { %2035 = vmatpush.bf16.msra.mxu1 %v6294_v35 }
 0xc38   :  { %2115 = vmatpush.bf16.msra.mxu2 %v6295_v8  ;;  %v6304_v8 = vld [vmem:[#allocation11_spill] sm:$0xff] }
 0xc39   :  { %2131 = vmatpush.bf16.msra.mxu3 %v6296_v27  ;;  %2154 = vmatpush.bf16.msra.mxu0 %v6297_v45 }
 0xc3d   :  { %2155 = vmatpush.bf16.msra.mxu0 %v6298_v3 }
 0xcaf   :  { %v1840_v39 = vpop.f32.mrf.mxu0 }
 0xcb0   :  { %v1894_v23 = vperm.slane %v1840_v39, 0  ;;  %v1890_v1 = vrot.slane %v1840_v39, 4  ;;  %v1888_v46 = vrot.slane %v1840_v39, 2  ;;  %v1887_v49 = vrot.slane %v1840_v39, 1 }
 0xcb1   :  { %v1891_v15 = vrot.slane %v1840_v39, 5  ;;  %v1889_v34 = vrot.slane %v1840_v39, 3  ;;  %v1892_v0 = vrot.slane %v1840_v39, 6  ;;  %v1893_v45 = vrot.slane %v1840_v39, 7  ;;  %v6307_v39 = vld [vmem:[#allocation14_spill] sm:$0xff] }
 0xcb2   :  { %v1910_v29 = vadd.f32 %v1894_v23, %v6299_v48  ;;  %v1898_v14 = vperm.slane %v1890_v1, 0  ;;  %v1896_v11 = vperm.slane %v1888_v46, 0  ;;  %v1895_v32 = vperm.slane %v1887_v49, 0  ;;  %v6305_v1 = vld [vmem:[#allocation12_spill] sm:$0xff] }
 0xcb3   :  { %v1899_v42 = vperm.slane %v1891_v15, 0  ;;  %v1897_v55 = vperm.slane %v1889_v34, 0  ;;  %v1900_v23 = vperm.slane %v1892_v0, 0  ;;  %v1901_v48 = vperm.slane %v1893_v45, 0 }
 0xcb4   :  { %4329 = vtanh.f32 %v1910_v29  ;;  %v1914_v56 = vadd.f32 %v1898_v14, %v6300_v43  ;;  %v1912_v17 = vadd.f32 %v1896_v11, %v6301_v33  ;;  %v1911_v60 = vadd.f32 %v1895_v32, %v6302_v30  ;;  %v6306_v14 = vld [vmem:[#allocation13_spill] sm:$0xff] }
 0xcb5   :  { %v1915_v35 = vadd.f32 %v1899_v42, %v6303_v59  ;;  %v1913_v27 = vadd.f32 %v1897_v55, %v6304_v8  ;;  %v1916_v11 = vadd.f32 %v1900_v23, %v6306_v14  ;;  %v1917_v43 = vadd.f32 %v1901_v48, %v6307_v39 }
 0xcb6   :  { %4331 = vtanh.f32 %v1914_v56 }
 0xcb7   :  { %v1842_v2 = vpop.f32.mrf.mxu0  ;;  %4333 = vtanh.f32 %v1912_v17 }
 0xcb8   :  { %4335 = vtanh.f32 %v1911_v60 }
 0xcb9   :  { %4337 = vtanh.f32 %v1915_v35 }
 0xcba   :  { %v4330_v3 = vpop.eup %4329  ;;  %4339 = vtanh.f32 %v1913_v27 }
 0xcbb   :  { %v1926_v46 = vmul.f32 %v4330_v3, %v6305_v1  ;;  %4341 = vtanh.f32 %v1916_v11 }
 0xcbc   :  { %v4332_v49 = vpop.eup %4331  ;;  %4343 = vtanh.f32 %v1917_v43 }
 0xcbd   :  { %v4334_v15 = vpop.eup %4333  ;;  %1934 = vadd.xlane.f32.xlu0 %v1926_v46  ;;  %v1930_v34 = vmul.f32 %v4332_v49, %v6305_v1 }
 0xcbe   :  { %v1928_v29 = vmul.f32 %v4334_v15, %v6305_v1  ;;  %v4336_v32 = vpop.eup %4335 }
 0xcbf   :  { %1942 = vadd.xlane.f32.xlu2 %v1930_v34  ;;  %v4338_v56 = vpop.eup %4337  ;;  %v1927_v17 = vmul.f32 %v4336_v32, %v6305_v1 }
 0xcc0   :  { %1938 = vadd.xlane.f32.xlu1 %v1928_v29  ;;  %v4340_v33 = vpop.eup %4339  ;;  %v1931_v42 = vmul.f32 %v4338_v56, %v6305_v1 }
 0xcc1   :  { %v1929_v55 = vmul.f32 %v4340_v33, %v6305_v1  ;;  %v4342_v30 = vpop.eup %4341 }
 0xcc2   :  { %v4344_v60 = vpop.eup %4343  ;;  %v1932_v0 = vmul.f32 %v4342_v30, %v6305_v1 }
 0xcc3   :  { %v1933_v2 = vmul.f32 %v4344_v60, %v6305_v1 }
 0xcc5   :  { %1936 = vadd.xlane.f32.xlu0 %v1927_v17 }
 0xcc7   :  { %1944 = vadd.xlane.f32.xlu2 %v1931_v42 }
 0xcc8   :  { %1940 = vadd.xlane.f32.xlu1 %v1929_v55  ;;  %v6320_v55 = vld [vmem:[#allocation32_spill] sm:$0xff] }
 0xccd   :  { %1946 = vadd.xlane.f32.xlu0 %v1932_v0 }
 0xcd0   :  { %1948 = vadd.xlane.f32.xlu1 %v1933_v2 }
 0xd30   :  { %v1935_v59 = vpop.xlane.xlu0 %1934 }
 0xd31   :  { %v1958_v45 = vperm.slane %v1935_v59, %v4658_v26 }
 0xd32   :  { %v1943_v35 = vpop.xlane.xlu2 %1942 }
 0xd33   :  { %v1939_v8 = vpop.xlane.xlu1 %1938  ;;  %v1962_v1 = vperm.slane %v1943_v35, %v4658_v26 }
 0xd34   :  { %v1960_v23 = vperm.slane %v1939_v8, %v4658_v26 }
 0xd38   :  { %v1937_v27 = vpop.xlane.xlu0 %1936 }
 0xd39   :  { %v1959_v3 = vperm.slane %v1937_v27, %v4658_v26 }
 0xd3a   :  { %v1945_v48 = vpop.xlane.xlu2 %1944 }
 0xd3b   :  { %v1966_v46 = vsel %vm467_vm1, %v1959_v3, %v1958_v45  ;;  %v1941_v49 = vpop.xlane.xlu1 %1940  ;;  %v1963_v11 = vperm.slane %v1945_v48, %v4658_v26 }
 0xd3c   :  { %v1961_v15 = vperm.slane %v1941_v49, %v4658_v26  ;;  %v1967_v34 = vsel %vm469_vm2, %v1960_v23, %v1966_v46 }
 0xd3e   :  { %v1968_v29 = vsel %vm471_vm3, %v1961_v15, %v1967_v34 }
 0xd3f   :  { %v1969_v14 = vsel %vm473_vm4, %v1962_v1, %v1968_v29  ;;  %v5623_v29 = vpop.f32.mrf.mxu1 }
 0xd40   :  { %v1947_v32 = vpop.xlane.xlu0 %1946  ;;  %v1970_v43 = vsel %vm475_vm5, %v1963_v11, %v1969_v14  ;;  %v5625_v14 = vpop.f32.mrf.mxu2  ;;  %v6312_v11 = vld [vmem:[#allocation24_spill] sm:$0xff] }
 0xd41   :  { %v1964_v39 = vperm.slane %v1947_v32, %v4658_v26  ;;  %v5628_v32 = vpop.f32.mrf.mxu3 }
 0xd43   :  { %v1971_v56 = vsel %vm477_vm6, %v1964_v39, %v1970_v43  ;;  %v1949_v33 = vpop.xlane.xlu1 %1948  ;;  %v6316_v39 = vld [vmem:[#allocation28_spill] sm:$0xff]  ;;  %v6317_v43 = vld [vmem:[#allocation29_spill] sm:$0xff] }
 0xd44   :  { %v1965_v17 = vperm.slane %v1949_v33, %v4658_v26  ;;  %v6319_v33 = vld [vmem:[#allocation31_spill] sm:$0xff] }
 0xd46   :  { %v1972_v42 = vsel %vm479_vm7, %v1965_v17, %v1971_v56  ;;  %v6318_v56 = vld [vmem:[#allocation33_spill] sm:$0xff] }
 0xd47   :  { %v1974_v30 = vsel %vm80_vm8, -1e+10, %v1972_v42  ;;  %v1855_v17 = vpop.f32.mrf.mxu1 }
 0xd48   :  { %v1975_v60 = vsel %vm6309_vm9, %v1974_v30, -inf  ;;  %v1868_v42 = vpop.f32.mrf.mxu2  ;;  %v6335_v17 = vld [vmem:[#allocation48_spill] sm:$0xff] }
 0xd49   :  { %1976 = vmax.xlane.f32.xlu2 %v1975_v60  ;;  %v1881_v60 = vpop.f32.mrf.mxu3  ;;  %v6337_v42 = vld [vmem:[#allocation34_spill] sm:$0xff] }
 0xd4a   :  { %v6340_v60 = vld [vmem:[#allocation46_spill] sm:$0xff] }
 0xdbc   :  { %v1977_v0 = vpop.xlane.xlu2 %1976 }
 0xdbd   :  { %v1978_v2 = vsub.f32 %v1974_v30, %v1977_v0  ;;  %v6321_v30 = vld [vmem:[#allocation37_spill] sm:$0xff] }
 0xdbf   :  { %v1979_v59 = vmul.f32 1.442695, %v1978_v2 }
 0xdc1   :  { %4345 = vpow2.f32 %v1979_v59 }
 0xdc7   :  { %v4346_v35 = vpop.eup %4345 }
 0xdc8   :  { %v1981_v8 = vsel %vm6310_vm11, %v4346_v35, 0.0  ;;  %vm6326_vm11 = vmmov %vm6309_vm9 }
 0xdc9   :  { %1982 = vadd.xlane.f32.xlu0 %v1981_v8 }
 0xe3c   :  { %v1983_v27 = vpop.xlane.xlu0 %1982 }
 0xe3d   :  { %4347 = vrcp.f32 %v1983_v27 }
 0xe43   :  { %v4348_v45 = vpop.eup %4347 }
 0xe44   :  { %v1985_v3 = vmul.f32 %v4348_v45, %v4346_v35  ;;  %v6322_v35 = vld [vmem:[#allocation41_spill] sm:$0xff] }
 0xe46   :  { %v2001_v23 = vpack.c.bf16 %v1985_v3, %v1985_v3  ;;  %v1988_v46 = vrot.slane %v1985_v3, 2  ;;  %v1989_v49 = vrot.slane %v1985_v3, 3  ;;  %v1990_v15 = vrot.slane %v1985_v3, 4 }
 0xe47   :  { %v1987_v0 = vrot.slane %v1985_v3, 1  ;;  %v1992_v2 = vrot.slane %v1985_v3, 6  ;;  %v1993_v59 = vrot.slane %v1985_v3, 7 }
 0xe48   :  { %4029 = vmatmul.msk.bf16.vlgmr.msrb.gmra.mxu1 %vm6311_vm12, %v2001_v23  ;;  %v2003_v34 = vpack.c.bf16 %v1988_v46, %v1988_v46  ;;  %v2004_v1 = vpack.c.bf16 %v1989_v49, %v1989_v49  ;;  %v2005_v48 = vpack.c.bf16 %v1990_v15, %v1990_v15  ;;  %v6324_v23 = vld [vmem:[#allocation45_spill] sm:$0xff]  ;;  %v6325_v46 = vld [vmem:[#allocation27_spill] sm:$0xff]  ;;  %v6328_v15 = vld [vmem:[#allocation36_spill] sm:$0xff] }
 0xe49   :  { %2099 = vmatpush.bf16.msrb.mxu1 %v6312_v11  ;;  %v2002_v8 = vpack.c.bf16 %v1987_v0, %v1987_v0  ;;  %v2007_v27 = vpack.c.bf16 %v1992_v2, %v1992_v2  ;;  %v2008_v45 = vpack.c.bf16 %v1993_v59, %v1993_v59  ;;  %v6327_v49 = vld [vmem:[#allocation35_spill] sm:$0xff]  ;;  %v1991_v11 = vrot.slane %v1985_v3, 5  ;;  %vm6336_vm12 = vmmov %vm6309_vm9  ;;  %v4028_v0 = vld [vmem:[%s6092_s1 + $0x8] sm:$0xf] }
 0xe4a   :  { %4031 = vmatmul.msk.bf16.vlgmr.msrb.gmra.mxu2 %vm6313_vm14, %v2003_v34  ;;  %4032 = vmatmul.msk.bf16.vlgmr.msrb.gmra.mxu3 %vm6314_vm15, %v2004_v1  ;;  %v6329_v34 = vld [vmem:[#allocation30_spill] sm:$0xff]  ;;  %v6330_v1 = vld [vmem:[#allocation39_spill] sm:$0xff]  ;;  %v1828_v3 = vstv %s1827_s26  ;;  %v1826_v2 = vld [vmem:[#allocation2] sm:$0xf]  ;;  %vm6341_vm15 = vcmask 261120  }
 0xe4b   :  { %4033 = vmatmul.msk.bf16.vlgmr.msrb.gmra.mxu0 %vm6315_vm10, %v2005_v48  ;;  %2180 = vmatpush.bf16.msrb.mxu2 %v6316_v39  ;;  %v6331_v48 = vld [vmem:[#allocation40_spill] sm:$0xff]  ;;  %v6332_v39 = vld [vmem:[#allocation43_spill] sm:$0xff]  ;;  %vm1829_vm14 = vcmp.eq.s32.totalorder %v1828_v3, 1  ;;  %vm6342_vm10 = vmmov %vm6341_vm15 }
 0xe4c   :  { %2193 = vmatpush.bf16.msrb.mxu3 %v6317_v43  ;;  %2238 = vmatpush.bf16.msrb.mxu0 %v6318_v56  ;;  %v6333_v43 = vld [vmem:[#allocation44_spill] sm:$0xff]  ;;  %v2006_v56 = vpack.c.bf16 %v1991_v11, %v1991_v11  ;;  %v1830_v59 = vsel %vm1829_vm14, %v4028_v0, %v1826_v2  ;;  %v6350_v11 = vld [vmem:[#allocation58_spill] sm:$0xff] }
 0xe4f   :  { %2181 = vmatpush.bf16.msrb.mxu2 %v6319_v33  ;;  %v6334_v33 = vld [vmem:[#allocation47_spill] sm:$0xff] }
 0xe50   :  { %2194 = vmatpush.bf16.msrb.mxu3 %v6320_v55  ;;  %2239 = vmatpush.bf16.msrb.mxu0 %v6321_v30  ;;  %v6338_v55 = vld [vmem:[#allocation38_spill] sm:$0xff] }
 0xe51   :  { %v6339_v30 = vld [vmem:[#allocation42_spill] sm:$0xff] }
 0xe54   :  { %2240 = vmatpush.bf16.msrb.mxu0 %v6322_v35  ;;  %v6345_v35 = vld [vmem:[#allocation49_spill] sm:$0xff] }
 0xe58   :  { %4030 = vmatmul.msk.bf16.vlgmr.msra.gmra.mxu1 %vm6323_vm13, %v2002_v8  ;;  %2241 = vmatpush.bf16.msrb.mxu0 %v6324_v23  ;;  %vm6343_vm13 = vmmov %vm6342_vm10  ;;  %v6346_v8 = vld [vmem:[#allocation50_spill] sm:$0xff]  ;;  %v6347_v23 = vld [vmem:[#allocation55_spill] sm:$0xff] }
 0xe59   :  { %2167 = vmatpush.bf16.msra.mxu1 %v6325_v46  ;;  %v6348_v46 = vld [vmem:[#allocation56_spill] sm:$0xff] }
 0xe5a   :  { %4035 = vmatmul.msk.bf16.vlgmr.msra.gmra.mxu2 %vm6309_vm9, %v2007_v27  ;;  %4036 = vmatmul.msk.bf16.vlgmr.msra.gmra.mxu3 %vm6326_vm11, %v2008_v45  ;;  %vm6344_vm9 = vmmov %vm6342_vm10  ;;  %vm6353_vm11 = vcmask 523264  }
 0xe5b   :  { %2264 = vmatpush.bf16.msra.mxu2 %v6327_v49  ;;  %2277 = vmatpush.bf16.msra.mxu3 %v6328_v15  ;;  %vm6355_vm14 = vmmov %vm6353_vm11 }
 0xe5c   :  { %4037 = vmatmul.msk.bf16.vlgmr.msra.gmra.mxu0 %vm6341_vm15, %v1830_v59  ;;  %vm6356_vm15 = vmmov %vm6353_vm11 }
 0xe5d   :  { %2168 = vmatpush.bf16.msra.mxu1 %v6329_v34  ;;  %2341 = vmatpush.bf16.msra.mxu0 %v6345_v35 }
 0xe5f   :  { %2265 = vmatpush.bf16.msra.mxu2 %v6330_v1  ;;  %2278 = vmatpush.bf16.msra.mxu3 %v6331_v48  ;;  %v6349_v48 = vld [vmem:[#allocation57_spill] sm:$0xff] }
 0xe61   :  { %2342 = vmatpush.bf16.msra.mxu0 %v6346_v8 }
 0xe63   :  { %2266 = vmatpush.bf16.msra.mxu2 %v6332_v39  ;;  %2279 = vmatpush.bf16.msra.mxu3 %v6333_v43 }
 0xe65   :  { %2343 = vmatpush.bf16.msra.mxu0 %v6347_v23 }
 0xe67   :  { %2267 = vmatpush.bf16.msra.mxu2 %v6334_v33  ;;  %2280 = vmatpush.bf16.msra.mxu3 %v6335_v17  ;;  %v6351_v17 = vld [vmem:[#allocation59_spill] sm:$0xff] }
 0xe68   :  { %4034 = vmatmul.msk.bf16.vlgmr.msrb.gmra.mxu1 %vm6336_vm12, %v2006_v56  ;;  %vm6354_vm12 = vmmov %vm6353_vm11 }
 0xe69   :  { %2251 = vmatpush.bf16.msrb.mxu1 %v6337_v42  ;;  %2344 = vmatpush.bf16.msra.mxu0 %v6348_v46 }
 0xe6a   :  { %4039 = vmatmul.msk.bf16.vlgmr.msrb.gmra.mxu2 %vm6343_vm13, %v1830_v59  ;;  %4040 = vmatmul.msk.bf16.vlgmr.msrb.gmra.mxu3 %vm6344_vm9, %v1830_v59 }
 0xe6d   :  { %2252 = vmatpush.bf16.msrb.mxu1 %v6338_v55  ;;  %2345 = vmatpush.bf16.msra.mxu0 %v6349_v48 }
 0xe71   :  { %2253 = vmatpush.bf16.msrb.mxu1 %v6339_v30  ;;  %2346 = vmatpush.bf16.msra.mxu0 %v6350_v11 }
 0xe75   :  { %2254 = vmatpush.bf16.msrb.mxu1 %v6340_v60  ;;  %2347 = vmatpush.bf16.msra.mxu0 %v6351_v17  ;;  %v6352_v60 = vld [vmem:[#allocation60_spill] sm:$0xff] }
 0xe78   :  { %4038 = vmatmul.msk.bf16.vlgmr.msra.gmra.mxu1 %vm6342_vm10, %v1830_v59 }
 0xe79   :  { %2348 = vmatpush.bf16.msra.mxu0 %v6352_v60 }
 0xec5   :  { %v2021_v27 = vpop.f32.mrf.mxu1 }
 0xec6   :  { %v2137_v30 = vpack.c.bf16 %v2021_v27, %v2021_v27 }
 0xec8   :  { %v2085_v45 = vpop.f32.mrf.mxu0  ;;  %v2208_v23 = vunpack.c.l.b16 %v2137_v30 }
 0xec9   :  { %v2141_v46 = vpack.c.bf16 %v2085_v45, %v2085_v45 }
 0xecd   :  { %v2023_v49 = vpop.f32.mrf.mxu1  ;;  %v2053_v15 = vpop.f32.mrf.mxu2 }
 0xece   :  { %v2069_v34 = vpop.f32.mrf.mxu3  ;;  %v2139_v55 = vpack.c.bf16 %v2053_v15, %v2053_v15 }
 0xecf   :  { %v2140_v2 = vpack.c.bf16 %v2069_v34, %v2069_v34 }
 0xed0   :  { %v2087_v1 = vpop.f32.mrf.mxu0  ;;  %v2210_v8 = vunpack.c.l.b16 %v2139_v55 }
 0xed1   :  { %v2211_v49 = vunpack.c.l.b16 %v2140_v2 }
 0xed2   :  { %v2218_v48 = vrot.slane %v2210_v8, 6 }
 0xed5   :  { %v2037_v39 = vpop.f32.mrf.mxu1  ;;  %v2055_v43 = vpop.f32.mrf.mxu2 }
 0xed6   :  { %v2138_v56 = vpack.c.bf16 %v2037_v39, %v2037_v39  ;;  %v2071_v33 = vpop.f32.mrf.mxu3  ;;  %v2212_v43 = vunpack.c.l.b16 %v2141_v46 }
 0xed7   :  { %v2220_v33 = vrot.slane %v2211_v49, 5 }
 0xed8   :  { %v2209_v42 = vunpack.c.l.b16 %v2138_v56  ;;  %v2222_v45 = vrot.slane %v2212_v43, 4 }
 0xeda   :  { %v2216_v59 = vrot.slane %v2209_v42, 7 }
 0xedc   :  { %v2217_v1 = vsel %vm467_vm1, %v2216_v59, %v2208_v23 }
 0xedd   :  { %v2039_v3 = vpop.f32.mrf.mxu1  ;;  %v2117_v0 = vpop.f32.mrf.mxu2  ;;  %v2219_v15 = vsel %vm469_vm2, %v2218_v48, %v2217_v1 }
 0xede   :  { %v2133_v35 = vpop.f32.mrf.mxu3  ;;  %v2143_v11 = vpack.c.bf16 %v2117_v0, %v2117_v0  ;;  %v2221_v55 = vsel %vm471_vm3, %v2220_v33, %v2219_v15  ;;  %v2157_v1 = vpop.f32.mrf.mxu0 }
 0xedf   :  { %v2144_v39 = vpack.c.bf16 %v2133_v35, %v2133_v35  ;;  %v2223_v59 = vsel %vm473_vm4, %v2222_v45, %v2221_v55  ;;  %v6358_v55 = vld [vmem:[#allocation52_spill] sm:$0xff] }
 0xee0   :  { %v2214_v34 = vunpack.c.l.b16 %v2143_v11  ;;  %v1884_v45 = vadd.f32 %v5625_v14, %v6358_v55 }
 0xee1   :  { %v2215_v42 = vunpack.c.l.b16 %v2144_v39 }
 0xee2   :  { %v2226_v2 = vrot.slane %v2214_v34, 2 }
 0xee3   :  { %v2228_v0 = vrot.slane %v2215_v42, 1  ;;  %v6357_v42 = vld [vmem:[#allocation51_spill] sm:$0xff] }
 0xee5   :  { %v2101_v27 = vpop.f32.mrf.mxu1  ;;  %v2119_v56 = vpop.f32.mrf.mxu2 }
 0xee6   :  { %v2142_v17 = vpack.c.bf16 %v2101_v27, %v2101_v27  ;;  %v2135_v60 = vpop.f32.mrf.mxu3  ;;  %v2159_v43 = vpop.f32.mrf.mxu0 }
 0xee8   :  { %v2213_v3 = vunpack.c.l.b16 %v2142_v17 }
 0xeea   :  { %v2224_v30 = vrot.slane %v2213_v3, 3  ;;  %v1883_v3 = vadd.f32 %v5623_v29, %v6357_v42 }
 0xeec   :  { %v2225_v35 = vsel %vm475_vm5, %v2224_v30, %v2223_v59  ;;  %v6359_v30 = vld [vmem:[#allocation53_spill] sm:$0xff]  ;;  %v6360_v59 = vld [vmem:[#allocation54_spill] sm:$0xff] }
 0xeed   :  { %v2227_v8 = vsel %vm477_vm6, %v2226_v2, %v2225_v35  ;;  %v2103_v23 = vpop.f32.mrf.mxu1  ;;  %v2183_v11 = vpop.f32.mrf.mxu2 }
 0xeee   :  { %v2229_v46 = vsel %vm479_vm7, %v2228_v0, %v2227_v8  ;;  %v5685_v39 = vpop.f32.mrf.mxu3 }
 0xeef   :  { %v2230_v49 = vpack.c.b16 %v2229_v46, %v2229_v46 }
 0xef1   :  { %4041 = vmatmul.msk.bf16.vlgmr.msrb.gmra.mxu0 %vm6353_vm11, %v2230_v49  ;;  %4042 = vmatmul.msk.bf16.vlgmr.msrb.gmra.mxu1 %vm6354_vm12, %v2230_v49 }
 0xef2   :  { %4043 = vmatmul.msk.bf16.vlgmr.msra.gmra.mxu2 %vm6355_vm14, %v2230_v49  ;;  %4044 = vmatmul.msk.bf16.vlgmr.msra.gmra.mxu3 %vm6356_vm15, %v2230_v49 }
 0xef5   :  { %v2170_v48 = vpop.f32.mrf.mxu1  ;;  %v2185_v27 = vpop.f32.mrf.mxu2 }
 0xef6   :  { %v2198_v56 = vpop.f32.mrf.mxu3 }
 0xefd   :  { %v2172_v15 = vpop.f32.mrf.mxu1 }
 0xf6e   :  { %v2243_v33 = vpop.f32.mrf.mxu0  ;;  %v2256_v17 = vpop.f32.mrf.mxu1 }
 0xf6f   :  { %v2286_v60 = vadd.f32 %v2243_v33, %v2157_v1  ;;  %v2287_v34 = vadd.f32 %v2256_v17, %v2170_v48 }
 0xf71   :  { %v2289_v2 = vadd.f32 %v2286_v60, %v6359_v30  ;;  %v2290_v0 = vadd.f32 %v2287_v34, %v6360_v59 }
 0xf73   :  { %v2292_v35 = vadd.f32 %v2289_v2, %v1883_v3  ;;  %v2312_v8 = vadd.f32 %v2290_v0, %v1884_v45 }
 0xf75   :  { %v4045_v23 = vmul.f32 -1.442695, %v2292_v35  ;;  %v4046_v46 = vmul.f32 -1.442695, %v2312_v8  ;;  %v2269_v49 = vpop.f32.mrf.mxu2  ;;  %v2282_v43 = vpop.f32.mrf.mxu3 }
 0xf76   :  { %v2245_v15 = vpop.f32.mrf.mxu0  ;;  %v2258_v27 = vpop.f32.mrf.mxu1  ;;  %v2288_v0 = vadd.f32 %v2269_v49, %v2183_v11 }
 0xf77   :  { %4349 = vpow2.f32 %v4045_v23  ;;  %v1885_v23 = vadd.f32 %v5628_v32, %v5294_v57 }
 0xf78   :  { %4351 = vpow2.f32 %v4046_v46 }
 0xf7d   :  { %v4350_v1 = vpop.eup %4349  ;;  %v2271_v48 = vpop.f32.mrf.mxu2 }
 0xf7e   :  { %v2284_v29 = vpop.f32.mrf.mxu3  ;;  %v4352_v56 = vpop.eup %4351  ;;  %v2296_v33 = vadd.f32 1.0, %v4350_v1  ;;  %v2291_v48 = vadd.f32 %v2288_v0, %v5297_v51 }
 0xf7f   :  { %v2316_v14 = vadd.f32 1.0, %v4352_v56 }
 0xf80   :  { %4353 = vrcp.f32 %v2296_v33  ;;  %v2308_v45 = vand.u32 2147483648, %v2296_v33  ;;  %v2306_v2 = vand.u32 2147483647, %v2296_v33  ;;  %vm2302_vm13 = vweird.f32 %v2296_v33 }
 0xf81   :  { %4355 = vrcp.f32 %v2316_v14  ;;  %v2328_v1 = vand.u32 2147483648, %v2316_v14  ;;  %vm2322_vm14 = vweird.f32 %v2316_v14  ;;  %v2326_v56 = vand.u32 2147483647, %v2316_v14 }
 0xf82   :  { %v2309_v8 = vor.u32 1.1754944e-38, %v2308_v45  ;;  %vm2307_vm11 = vcmp.eq.f32.partialorder %v2306_v2, 8.507059e+37 }
 0xf86   :  { %v4354_v17 = vpop.eup %4353 }
 0xf87   :  { %v4356_v60 = vpop.eup %4355  ;;  %v2298_v34 = vmul.f32 %v4354_v17, %v2296_v33  ;;  %vm2303_vm10 = vweird.f32 %v4354_v17  ;;  %v2329_v33 = vor.u32 1.1754944e-38, %v2328_v1 }
 0xf88   :  { %v2318_v42 = vmul.f32 %v4356_v60, %v2316_v14  ;;  %vm2304_vm9 = vmor %vm2302_vm13, %vm2303_vm10  ;;  %vm2323_vm12 = vweird.f32 %v4356_v60  ;;  %vm2327_vm10 = vcmp.eq.f32.partialorder %v2326_v56, 8.507059e+37 }
 0xf89   :  { %v2299_v3 = vsub.f32 1.0, %v2298_v34  ;;  %vm2324_vm15 = vmor %vm2322_vm14, %vm2323_vm12 }
 0xf8a   :  { %v2319_v55 = vsub.f32 1.0, %v2318_v42 }
 0xf8b   :  { %v2300_v30 = vmul.f32 %v4354_v17, %v2299_v3 }
 0xf8c   :  { %v2320_v59 = vmul.f32 %v4356_v60, %v2319_v55 }
 0xf8d   :  { %v2301_v35 = vadd.f32 %v4354_v17, %v2300_v30 }
 0xf8e   :  { %v2321_v27 = vadd.f32 %v4356_v60, %v2320_v59 }
 0xf8f   :  { %v2305_v46 = vsel %vm2304_vm9, %v4354_v17, %v2301_v35 }
 0xf90   :  { %v2310_v15 = vsel %vm2307_vm11, %v2309_v8, %v2305_v46  ;;  %v2325_v49 = vsel %vm2324_vm15, %v4356_v60, %v2321_v27 }
 0xf91   :  { %v2332_v29 = vmul.f32 %v2310_v15, %v1885_v23  ;;  %v2330_v34 = vsel %vm2327_vm10, %v2329_v33, %v2325_v49 }
 0xf92   :  { %v2335_v42 = vsub.f32 1.0, %v2330_v34  ;;  %v2337_v3 = vmul.f32 %v2330_v34, %v5567_v52 }
 0xf93   :  { %v2333_v11 = vadd.f32 %v2332_v29, %v2291_v48 }
 0xf95   :  { %4357 = vtanh.f32 %v2333_v11 }
 0xf9b   :  { %v4358_v32 = vpop.eup %4357 }
 0xf9c   :  { %v2336_v17 = vmul.f32 %v4358_v32, %v2335_v42 }
 0xf9e   :  { %v2338_v55 = vadd.f32 %v2337_v3, %v2336_v17 }
 0xfa0   :  { %2339 = vst [vmem:[%s6104_s13] sm:$0xff] %v2338_v55  ;;  %v2340_v45 = vpack.c.bf16 %v2338_v55, %v2338_v55 }
 0xfa2   :  { %2349 = vmatmul.bf16.vlgmr.msra.gmra.mxu0 %v2340_v45 }
0x101f   :  { %v2350_v14 = vpop.f32.mrf.mxu0 }
0x1020   :  { %v2351_v60 = vadd.f32 %v2350_v14, %v5685_v39 }
0x1022   :  { %v2354_v30 = vadd.f32 %v2351_v60, %v2282_v43 }
0x1023   :  { %2362 = sbr.rel (%p4049_p4) target bundleno = 4632 (0x1218), region = 65 }
0x1024   :  { %v2355_v2 = vadd.f32 %v5312_v38, %v2354_v30 }
0x1026   :  { %4047 = vst [vmem:[%s6103_s12 + $0x18] sm:$0xff] %v2355_v2 }
0x1027   :  { %v2352_v59 = vpop.f32.mrf.mxu0 }
0x1028   :  { %2363 = vmax.xlane.f32.xlu0 %v2355_v2  ;;  %v4251_v39 = vld [vmem:[%s6097_s6 + $0x38] sm:$0xff]  ;;  %v4250_v43 = vld [vmem:[%s6097_s6 + $0x30] sm:$0xff]  ;;  %v4249_v23 = vld [vmem:[%s6097_s6 + $0x28] sm:$0xff]  ;;  %v4437_v3 = vmov 1.0|1.0  }
0x1029   :  { %2449 = vmatpush.bf16.msra.mxu0 %v4251_v39  ;;  %v4248_v46 = vld [vmem:[%s6097_s6 + $0x20] sm:$0xff]  ;;  %v4247_v15 = vld [vmem:[%s6097_s6 + $0x18] sm:$0xff]  ;;  %v4246_v27 = vld [vmem:[%s6097_s6 + $0x10] sm:$0xff] }
0x102a   :  { %v4245_v11 = vld [vmem:[%s6097_s6 + $0x8] sm:$0xff]  ;;  %v4244_v49 = vld [vmem:[%s6097_s6] sm:$0xff] }
0x102d   :  { %2450 = vmatpush.bf16.msra.mxu0 %v4250_v43 }
0x1031   :  { %2451 = vmatpush.bf16.msra.mxu0 %v4249_v23 }
0x1035   :  { %2452 = vmatpush.bf16.msra.mxu0 %v4248_v46 }
0x1039   :  { %2453 = vmatpush.bf16.msra.mxu0 %v4247_v15 }
0x103d   :  { %2454 = vmatpush.bf16.msra.mxu0 %v4246_v27 }
0x1041   :  { %2455 = vmatpush.bf16.msra.mxu0 %v4245_v11 }
0x1045   :  { %2456 = vmatpush.bf16.msra.mxu0 %v4244_v49 }
0x109b   :  { %v2364_v52 = vpop.xlane.xlu0 %2363 }
0x109c   :  { %vm2365_vm13 = vcmp.eq.f32.partialorder %v2355_v2, %v2364_v52 }
0x109d   :  { %v2366_v0 = vsel %vm2365_vm13, %v4658_v26, 128 }
0x109e   :  { %v2368_v35 = vshra.s32 %v2366_v0, 16  ;;  %v2367_v1 = vand.u32 65535, %v2366_v0 }
0x10a0   :  { %v2370_v8 = vcvt.s32.f32 %v2368_v35  ;;  %v2369_v29 = vcvt.s32.f32 %v2367_v1 }
0x10a2   :  { %2371 = vmin.xlane.f32.xlu0 %v2370_v8 }
0x1115   :  { %v2372_v48 = vpop.xlane.xlu0 %2371 }
0x1116   :  { %vm2373_vm9 = vcmp.eq.f32.partialorder %v2370_v8, %v2372_v48  ;;  %v2378_v33 = vcvt.f32.s32 %v2372_v48 }
0x1117   :  { %v2374_v56 = vsel %vm2373_vm9, %v2369_v29, inf }
0x1118   :  { %2375 = vmin.xlane.f32.xlu1 %v2374_v56  ;;  %v2379_v42 = vshll.u32 %v2378_v33, 16 }
0x118b   :  { %v2376_v34 = vpop.xlane.xlu1 %2375 }
0x118c   :  { %v2377_v32 = vcvt.f32.s32 %v2376_v34 }
0x118e   :  { %v2380_v17 = vadd.s32 %v2379_v42, %v2377_v32 }
0x1190   :  { %vm2381_vm11 = vcmp.eq.s32.totalorder %v4658_v26, %v2380_v17 }
0x1191   :  { %vm4083_vm12 = vmpackc.low %vm2381_vm11, %vm2381_vm11 }
0x1192   :  { %4084 = vmatmul.msk.bf16.vlgmr.msra.gmra.mxu0 %vm4083_vm12, %v4437_v3 }
0x120f   :  { %v2458_v55 = vpop.f32.mrf.mxu0 }
0x1210   :  { %v2462_v45 = vpack.c.bf16 %v2458_v55, %v2458_v55 }
0x1212   :  { %2463 = vst.msk [vmem:[#allocation2] sm:$0xf] %vm157_vm0, %v2462_v45 }
0x1217   :  { %v2460_v14 = vpop.f32.mrf.mxu0 }
0x1218 PF:  { %2475 = vmatpush.bf16.msra.mxu0 %v4524_v4  ;;  %2488 = vmatpush.bf16.msra.mxu1 %v4696_v62  ;;  %v5760_v60 = vld [vmem:[%s6104_s13] sm:$0xff]  ;;  %v6362_v59 = vld [vmem:[#allocation16_spill] sm:$0xff]  ;;  %v6364_v0 = vld [vmem:[#allocation19_spill] sm:$0xff]  ;;  %vm6381_vm14 = vcmask 64512   ;;  %s4085_s10 = sld [smem:[#allocation3 + $0x3]] }
0x1219   :  { %2501 = vmatpush.bf16.msra.mxu2 %v4719_v9  ;;  %2514 = vmatpush.bf16.msra.mxu3 %v4724_v12  ;;  %v2465_v30 = vpack.c.bf16 %v5760_v60, %v5760_v60  ;;  %v6361_v2 = vld [vmem:[#allocation17_spill] sm:$0xff]  ;;  %v6363_v52 = vld [vmem:[#allocation18_spill] sm:$0xff]  ;;  %v6365_v35 = vld [vmem:[#allocation20_spill] sm:$0xff]  ;;  %s4106_s30 = sld [smem:[#allocation3 + $0x4]] }
0x121a   :  { %v6366_v8 = vld [vmem:[#allocation21_spill] sm:$0xff]  ;;  %v6367_v39 = vld [vmem:[#allocation22_spill] sm:$0xff]  ;;  %v6368_v43 = vld [vmem:[#allocation23_spill] sm:$0xff] }
0x121b   :  { %v6369_v23 = vld [vmem:[#allocation25_spill] sm:$0xff]  ;;  %v6370_v46 = vld [vmem:[#allocation26_spill] sm:$0xff]  ;;  %v6372_v17 = vld [vmem:[#allocation7_spill] sm:$0xff] }
0x121c   :  { %2476 = vmatpush.bf16.msra.mxu0 %v4534_v7  ;;  %2489 = vmatpush.bf16.msra.mxu1 %v4711_v5  ;;  %v6371_v49 = vld [vmem:[#allocation6_spill] sm:$0xff]  ;;  %v6373_v55 = vld [vmem:[#allocation8_spill] sm:$0xff]  ;;  %vm6382_vm15 = vmmov %vm6381_vm14 }
0x121d   :  { %2502 = vmatpush.bf16.msra.mxu2 %v4736_v18  ;;  %2515 = vmatpush.bf16.msra.mxu3 %v4742_v21  ;;  %vm6383_vm10 = vmmov %vm6381_vm14 }
0x121e   :  { %vm6385_vm13 = vmmov %vm6383_vm10  ;;  %p2467_p5 = scmp.ne.s32.totalorder %s4085_s10, 0 }
0x121f   :  { %vm6386_vm9 = vmmov %vm6383_vm10  ;;  %p4107_p6 = scmp.ne.s32.totalorder %s4106_s30, 0 }
0x1220   :  { %2477 = vmatpush.bf16.msra.mxu0 %v4543_v10  ;;  %2490 = vmatpush.bf16.msra.mxu1 %v4751_v28  ;;  %vm6387_vm11 = vmmov %vm6386_vm9  ;;  %s2471_s26 = scalar_select %p2467_p5, 1, 0 }
0x1221   :  { %2503 = vmatpush.bf16.msra.mxu2 %v4766_v36  ;;  %2516 = vmatpush.bf16.msra.mxu3 %v4769_v37  ;;  %vm6395_vm12 = vmmov %vm6386_vm9 }
0x1224   :  { %2478 = vmatpush.bf16.msra.mxu0 %v4552_v13  ;;  %2491 = vmatpush.bf16.msra.mxu1 %v4778_v40 }
0x1225   :  { %2504 = vmatpush.bf16.msra.mxu2 %v4793_v47  ;;  %2517 = vmatpush.bf16.msra.mxu3 %v4796_v50 }
0x1228   :  { %2479 = vmatpush.bf16.msra.mxu0 %v4561_v16  ;;  %2492 = vmatpush.bf16.msra.mxu1 %v4805_v54 }
0x1229   :  { %2505 = vmatpush.bf16.msra.mxu2 %v4820_v61  ;;  %2518 = vmatpush.bf16.msra.mxu3 %v4823_v63 }
0x122c   :  { %2480 = vmatpush.bf16.msra.mxu0 %v4570_v19  ;;  %2493 = vmatpush.bf16.msra.mxu1 %v4832_v6 }
0x122d   :  { %2506 = vmatpush.bf16.msra.mxu2 %v4848_v20  ;;  %2519 = vmatpush.bf16.msra.mxu3 %v4851_v24 }
0x1230   :  { %2481 = vmatpush.bf16.msra.mxu0 %v4579_v22  ;;  %2494 = vmatpush.bf16.msra.mxu1 %v4860_v31 }
0x1231   :  { %2507 = vmatpush.bf16.msra.mxu2 %v4875_v41  ;;  %2520 = vmatpush.bf16.msra.mxu3 %v4881_v44 }
0x1234   :  { %2482 = vmatpush.bf16.msra.mxu0 %v4588_v25  ;;  %2495 = vmatpush.bf16.msra.mxu1 %v4890_v53 }
0x1235   :  { %2508 = vmatpush.bf16.msra.mxu2 %v4899_v58  ;;  %2521 = vmatpush.bf16.msra.mxu3 %v6361_v2  ;;  %v6374_v2 = vld [vmem:[#allocation9_spill] sm:$0xff] }
0x1237   :  { %2483 = vmatmul.bf16.vlgmr.msra.gmra.mxu0 %v2465_v30  ;;  %2496 = vmatmul.bf16.vlgmr.msra.gmra.mxu1 %v2465_v30 }
0x1238   :  { %2663 = vmatpush.bf16.msrb.mxu1 %v6362_v59  ;;  %2509 = vmatmul.bf16.vlgmr.msra.gmra.mxu2 %v2465_v30 }
0x1239   :  { %2695 = vmatpush.bf16.msrb.mxu2 %v6363_v52  ;;  %2522 = vmatmul.bf16.vlgmr.msra.gmra.mxu3 %v2465_v30 }
0x123a   :  { %2711 = vmatpush.bf16.msrb.mxu3 %v6364_v0  ;;  %2727 = vmatpush.bf16.msrb.mxu0 %v6365_v35  ;;  %v6375_v35 = vld [vmem:[#allocation10_spill] sm:$0xff] }
0x123c   :  { %2679 = vmatpush.bf16.msra.mxu1 %v6366_v8 }
0x123d   :  { %2759 = vmatpush.bf16.msra.mxu2 %v6367_v39  ;;  %v6376_v39 = vld [vmem:[#allocation11_spill] sm:$0xff] }
0x123e   :  { %2775 = vmatpush.bf16.msra.mxu3 %v6368_v43  ;;  %2798 = vmatpush.bf16.msra.mxu0 %v6369_v23 }
0x1242   :  { %2799 = vmatpush.bf16.msra.mxu0 %v6370_v46 }
0x12b4   :  { %v2484_v15 = vpop.f32.mrf.mxu0 }
0x12b5   :  { %v2538_v27 = vperm.slane %v2484_v15, 0  ;;  %v2534_v1 = vrot.slane %v2484_v15, 4  ;;  %v2532_v48 = vrot.slane %v2484_v15, 2  ;;  %v2531_v29 = vrot.slane %v2484_v15, 1 }
0x12b6   :  { %v2535_v56 = vrot.slane %v2484_v15, 5  ;;  %v2533_v11 = vrot.slane %v2484_v15, 3  ;;  %v2536_v52 = vrot.slane %v2484_v15, 6  ;;  %v2537_v23 = vrot.slane %v2484_v15, 7  ;;  %v6379_v15 = vld [vmem:[#allocation14_spill] sm:$0xff] }
0x12b7   :  { %v2554_v33 = vadd.f32 %v2538_v27, %v6371_v49  ;;  %v2542_v34 = vperm.slane %v2534_v1, 0  ;;  %v2540_v42 = vperm.slane %v2532_v48, 0  ;;  %v2539_v32 = vperm.slane %v2531_v29, 0  ;;  %v6377_v1 = vld [vmem:[#allocation12_spill] sm:$0xff] }
0x12b8   :  { %v2543_v14 = vperm.slane %v2535_v56, 0  ;;  %v2541_v30 = vperm.slane %v2533_v11, 0  ;;  %v2544_v27 = vperm.slane %v2536_v52, 0  ;;  %v2545_v49 = vperm.slane %v2537_v23, 0 }
0x12b9   :  { %4359 = vtanh.f32 %v2554_v33  ;;  %v2558_v3 = vadd.f32 %v2542_v34, %v6372_v17  ;;  %v2556_v45 = vadd.f32 %v2540_v42, %v6373_v55  ;;  %v2555_v59 = vadd.f32 %v2539_v32, %v6374_v2  ;;  %v6378_v34 = vld [vmem:[#allocation13_spill] sm:$0xff] }
0x12ba   :  { %v2559_v8 = vadd.f32 %v2543_v14, %v6375_v35  ;;  %v2557_v43 = vadd.f32 %v2541_v30, %v6376_v39  ;;  %v2560_v42 = vadd.f32 %v2544_v27, %v6378_v34  ;;  %v2561_v17 = vadd.f32 %v2545_v49, %v6379_v15 }
0x12bb   :  { %4361 = vtanh.f32 %v2558_v3 }
0x12bc   :  { %v2486_v0 = vpop.f32.mrf.mxu0  ;;  %4363 = vtanh.f32 %v2556_v45 }
0x12bd   :  { %4365 = vtanh.f32 %v2555_v59 }
0x12be   :  { %4367 = vtanh.f32 %v2559_v8 }
0x12bf   :  { %v4360_v46 = vpop.eup %4359  ;;  %4369 = vtanh.f32 %v2557_v43 }
0x12c0   :  { %v2570_v48 = vmul.f32 %v4360_v46, %v6377_v1  ;;  %4371 = vtanh.f32 %v2560_v42 }
0x12c1   :  { %v4362_v29 = vpop.eup %4361  ;;  %4373 = vtanh.f32 %v2561_v17 }
0x12c2   :  { %v4364_v56 = vpop.eup %4363  ;;  %2578 = vadd.xlane.f32.xlu0 %v2570_v48  ;;  %v2574_v11 = vmul.f32 %v4362_v29, %v6377_v1 }
0x12c3   :  { %v2572_v33 = vmul.f32 %v4364_v56, %v6377_v1  ;;  %v4366_v32 = vpop.eup %4365 }
0x12c4   :  { %2586 = vadd.xlane.f32.xlu2 %v2574_v11  ;;  %v4368_v3 = vpop.eup %4367  ;;  %v2571_v45 = vmul.f32 %v4366_v32, %v6377_v1 }
0x12c5   :  { %2582 = vadd.xlane.f32.xlu1 %v2572_v33  ;;  %v4370_v55 = vpop.eup %4369  ;;  %v2575_v14 = vmul.f32 %v4368_v3, %v6377_v1 }
0x12c6   :  { %v2573_v30 = vmul.f32 %v4370_v55, %v6377_v1  ;;  %v4372_v2 = vpop.eup %4371 }
0x12c7   :  { %v4374_v59 = vpop.eup %4373  ;;  %v2576_v52 = vmul.f32 %v4372_v2, %v6377_v1 }
0x12c8   :  { %v2577_v0 = vmul.f32 %v4374_v59, %v6377_v1 }
0x12ca   :  { %2580 = vadd.xlane.f32.xlu0 %v2571_v45 }
0x12cc   :  { %2588 = vadd.xlane.f32.xlu2 %v2575_v14 }
0x12cd   :  { %2584 = vadd.xlane.f32.xlu1 %v2573_v30  ;;  %v6392_v30 = vld [vmem:[#allocation32_spill] sm:$0xff] }
0x12d2   :  { %2590 = vadd.xlane.f32.xlu0 %v2576_v52 }
0x12d5   :  { %2592 = vadd.xlane.f32.xlu1 %v2577_v0 }
0x1335   :  { %v2579_v35 = vpop.xlane.xlu0 %2578 }
0x1336   :  { %v2602_v23 = vperm.slane %v2579_v35, %v4658_v26 }
0x1337   :  { %v2587_v8 = vpop.xlane.xlu2 %2586 }
0x1338   :  { %v2583_v39 = vpop.xlane.xlu1 %2582  ;;  %v2606_v1 = vperm.slane %v2587_v8, %v4658_v26 }
0x1339   :  { %v2604_v27 = vperm.slane %v2583_v39, %v4658_v26 }
0x133d   :  { %v2581_v43 = vpop.xlane.xlu0 %2580 }
0x133e   :  { %v2603_v46 = vperm.slane %v2581_v43, %v4658_v26 }
0x133f   :  { %v2589_v49 = vpop.xlane.xlu2 %2588 }
0x1340   :  { %v2610_v48 = vsel %vm467_vm1, %v2603_v46, %v2602_v23  ;;  %v2585_v29 = vpop.xlane.xlu1 %2584  ;;  %v2607_v42 = vperm.slane %v2589_v49, %v4658_v26 }
0x1341   :  { %v2605_v56 = vperm.slane %v2585_v29, %v4658_v26  ;;  %v2611_v11 = vsel %vm469_vm2, %v2604_v27, %v2610_v48 }
0x1343   :  { %v2612_v33 = vsel %vm471_vm3, %v2605_v56, %v2611_v11 }
0x1344   :  { %v2613_v34 = vsel %vm473_vm4, %v2606_v1, %v2612_v33  ;;  %v5816_v33 = vpop.f32.mrf.mxu1 }
0x1345   :  { %v2591_v32 = vpop.xlane.xlu0 %2590  ;;  %v2614_v17 = vsel %vm475_vm5, %v2607_v42, %v2613_v34  ;;  %v5818_v34 = vpop.f32.mrf.mxu2  ;;  %v6384_v42 = vld [vmem:[#allocation24_spill] sm:$0xff] }
0x1346   :  { %v2608_v15 = vperm.slane %v2591_v32, %v4658_v26  ;;  %v5821_v32 = vpop.f32.mrf.mxu3 }
0x1348   :  { %v2615_v3 = vsel %vm477_vm6, %v2608_v15, %v2614_v17  ;;  %v2593_v55 = vpop.xlane.xlu1 %2592  ;;  %v6388_v15 = vld [vmem:[#allocation28_spill] sm:$0xff]  ;;  %v6389_v17 = vld [vmem:[#allocation29_spill] sm:$0xff] }
0x1349   :  { %v2609_v45 = vperm.slane %v2593_v55, %v4658_v26  ;;  %v6391_v55 = vld [vmem:[#allocation31_spill] sm:$0xff] }
0x134b   :  { %v2616_v14 = vsel %vm479_vm7, %v2609_v45, %v2615_v3  ;;  %v6390_v3 = vld [vmem:[#allocation33_spill] sm:$0xff] }
0x134c   :  { %v2618_v2 = vsel %vm80_vm8, -1e+10, %v2616_v14  ;;  %v2499_v45 = vpop.f32.mrf.mxu1 }
0x134d   :  { %v2619_v59 = vsel %vm6381_vm14, %v2618_v2, -inf  ;;  %v2512_v14 = vpop.f32.mrf.mxu2  ;;  %vm6398_vm14 = vmmov %vm6386_vm9  ;;  %v6408_v45 = vld [vmem:[#allocation48_spill] sm:$0xff] }
0x134e   :  { %2620 = vmax.xlane.f32.xlu2 %v2619_v59  ;;  %v2525_v59 = vpop.f32.mrf.mxu3  ;;  %v6410_v14 = vld [vmem:[#allocation34_spill] sm:$0xff] }
0x134f   :  { %v6413_v59 = vld [vmem:[#allocation46_spill] sm:$0xff] }
0x13c1   :  { %v2621_v52 = vpop.xlane.xlu2 %2620 }
0x13c2   :  { %v2622_v0 = vsub.f32 %v2618_v2, %v2621_v52  ;;  %v6393_v2 = vld [vmem:[#allocation37_spill] sm:$0xff] }
0x13c4   :  { %v2623_v35 = vmul.f32 1.442695, %v2622_v0 }
0x13c6   :  { %4375 = vpow2.f32 %v2623_v35 }
0x13cc   :  { %v4376_v8 = vpop.eup %4375 }
0x13cd   :  { %v2625_v39 = vsel %vm6382_vm15, %v4376_v8, 0.0  ;;  %vm6399_vm15 = vmmov %vm6386_vm9 }
0x13ce   :  { %2626 = vadd.xlane.f32.xlu0 %v2625_v39 }
0x1441   :  { %v2627_v43 = vpop.xlane.xlu0 %2626 }
0x1442   :  { %4377 = vrcp.f32 %v2627_v43 }
0x1448   :  { %v4378_v23 = vpop.eup %4377 }
0x1449   :  { %v2629_v46 = vmul.f32 %v4378_v23, %v4376_v8  ;;  %v6394_v8 = vld [vmem:[#allocation41_spill] sm:$0xff] }
0x144b   :  { %v2645_v27 = vpack.c.bf16 %v2629_v46, %v2629_v46  ;;  %v2632_v48 = vrot.slane %v2629_v46, 2  ;;  %v2633_v29 = vrot.slane %v2629_v46, 3  ;;  %v2634_v56 = vrot.slane %v2629_v46, 4 }
0x144c   :  { %v2631_v52 = vrot.slane %v2629_v46, 1  ;;  %v2636_v0 = vrot.slane %v2629_v46, 6  ;;  %v2637_v35 = vrot.slane %v2629_v46, 7 }
0x144d   :  { %4087 = vmatmul.msk.bf16.vlgmr.msrb.gmra.mxu1 %vm6383_vm10, %v2645_v27  ;;  %v2647_v11 = vpack.c.bf16 %v2632_v48, %v2632_v48  ;;  %v2648_v1 = vpack.c.bf16 %v2633_v29, %v2633_v29  ;;  %v2649_v49 = vpack.c.bf16 %v2634_v56, %v2634_v56  ;;  %v6396_v27 = vld [vmem:[#allocation45_spill] sm:$0xff]  ;;  %v6397_v48 = vld [vmem:[#allocation27_spill] sm:$0xff]  ;;  %v6401_v56 = vld [vmem:[#allocation36_spill] sm:$0xff] }
0x144e   :  { %2743 = vmatpush.bf16.msrb.mxu1 %v6384_v42  ;;  %v2646_v39 = vpack.c.bf16 %v2631_v52, %v2631_v52  ;;  %v2651_v43 = vpack.c.bf16 %v2636_v0, %v2636_v0  ;;  %v2652_v23 = vpack.c.bf16 %v2637_v35, %v2637_v35  ;;  %v6400_v29 = vld [vmem:[#allocation35_spill] sm:$0xff]  ;;  %v2635_v42 = vrot.slane %v2629_v46, 5  ;;  %vm6409_vm10 = vmmov %vm6386_vm9  ;;  %v2470_v0 = vld [vmem:[#allocation2] sm:$0xf] }
0x144f   :  { %4089 = vmatmul.msk.bf16.vlgmr.msrb.gmra.mxu2 %vm6385_vm13, %v2647_v11  ;;  %4090 = vmatmul.msk.bf16.vlgmr.msrb.gmra.mxu3 %vm6386_vm9, %v2648_v1  ;;  %v6402_v11 = vld [vmem:[#allocation30_spill] sm:$0xff]  ;;  %v6403_v1 = vld [vmem:[#allocation39_spill] sm:$0xff]  ;;  %v2472_v46 = vstv %s2471_s26  ;;  %vm6414_vm9 = vcmask 261120  }
0x1450   :  { %4091 = vmatmul.msk.bf16.vlgmr.msrb.gmra.mxu0 %vm6387_vm11, %v2649_v49  ;;  %2824 = vmatpush.bf16.msrb.mxu2 %v6388_v15  ;;  %v6404_v49 = vld [vmem:[#allocation40_spill] sm:$0xff]  ;;  %v6405_v15 = vld [vmem:[#allocation43_spill] sm:$0xff]  ;;  %vm2473_vm13 = vcmp.eq.s32.totalorder %v2472_v46, 1  ;;  %vm6415_vm11 = vmmov %vm6414_vm9 }
0x1451   :  { %2837 = vmatpush.bf16.msrb.mxu3 %v6389_v17  ;;  %2882 = vmatpush.bf16.msrb.mxu0 %v6390_v3  ;;  %v6406_v17 = vld [vmem:[#allocation44_spill] sm:$0xff]  ;;  %v2650_v3 = vpack.c.bf16 %v2635_v42, %v2635_v42  ;;  %v4086_v52 = vld [vmem:[%s6092_s1 + $0xc] sm:$0xf]  ;;  %v6423_v42 = vld [vmem:[#allocation58_spill] sm:$0xff] }
0x1452   :  { %v2474_v35 = vsel %vm2473_vm13, %v4086_v52, %v2470_v0 }
0x1454   :  { %2825 = vmatpush.bf16.msrb.mxu2 %v6391_v55  ;;  %v6407_v55 = vld [vmem:[#allocation47_spill] sm:$0xff] }
0x1455   :  { %2838 = vmatpush.bf16.msrb.mxu3 %v6392_v30  ;;  %2883 = vmatpush.bf16.msrb.mxu0 %v6393_v2  ;;  %v6411_v30 = vld [vmem:[#allocation38_spill] sm:$0xff] }
0x1456   :  { %v6412_v2 = vld [vmem:[#allocation42_spill] sm:$0xff] }
0x1459   :  { %2884 = vmatpush.bf16.msrb.mxu0 %v6394_v8  ;;  %v6418_v8 = vld [vmem:[#allocation49_spill] sm:$0xff] }
0x145d   :  { %4088 = vmatmul.msk.bf16.vlgmr.msra.gmra.mxu1 %vm6395_vm12, %v2646_v39  ;;  %2885 = vmatpush.bf16.msrb.mxu0 %v6396_v27  ;;  %vm6416_vm12 = vmmov %vm6414_vm9  ;;  %v6419_v39 = vld [vmem:[#allocation50_spill] sm:$0xff]  ;;  %v6420_v27 = vld [vmem:[#allocation55_spill] sm:$0xff] }
0x145e   :  { %2811 = vmatpush.bf16.msra.mxu1 %v6397_v48  ;;  %v6421_v48 = vld [vmem:[#allocation56_spill] sm:$0xff] }
0x145f   :  { %4093 = vmatmul.msk.bf16.vlgmr.msra.gmra.mxu2 %vm6398_vm14, %v2651_v43  ;;  %4094 = vmatmul.msk.bf16.vlgmr.msra.gmra.mxu3 %vm6399_vm15, %v2652_v23  ;;  %vm6417_vm14 = vmmov %vm6414_vm9  ;;  %vm6426_vm15 = vcmask 523264  }
0x1460   :  { %2908 = vmatpush.bf16.msra.mxu2 %v6400_v29  ;;  %2921 = vmatpush.bf16.msra.mxu3 %v6401_v56 }
0x1461   :  { %4095 = vmatmul.msk.bf16.vlgmr.msra.gmra.mxu0 %vm6414_vm9, %v2474_v35 }
0x1462   :  { %2812 = vmatpush.bf16.msra.mxu1 %v6402_v11  ;;  %2985 = vmatpush.bf16.msra.mxu0 %v6418_v8 }
0x1464   :  { %2909 = vmatpush.bf16.msra.mxu2 %v6403_v1  ;;  %2922 = vmatpush.bf16.msra.mxu3 %v6404_v49  ;;  %v6422_v49 = vld [vmem:[#allocation57_spill] sm:$0xff] }
0x1466   :  { %2986 = vmatpush.bf16.msra.mxu0 %v6419_v39 }
0x1468   :  { %2910 = vmatpush.bf16.msra.mxu2 %v6405_v15  ;;  %2923 = vmatpush.bf16.msra.mxu3 %v6406_v17 }
0x146a   :  { %2987 = vmatpush.bf16.msra.mxu0 %v6420_v27 }
0x146c   :  { %2911 = vmatpush.bf16.msra.mxu2 %v6407_v55  ;;  %2924 = vmatpush.bf16.msra.mxu3 %v6408_v45  ;;  %v6424_v45 = vld [vmem:[#allocation59_spill] sm:$0xff] }
0x146d   :  { %4092 = vmatmul.msk.bf16.vlgmr.msrb.gmra.mxu1 %vm6409_vm10, %v2650_v3  ;;  %vm6427_vm10 = vmmov %vm6426_vm15 }
0x146e   :  { %2895 = vmatpush.bf16.msrb.mxu1 %v6410_v14  ;;  %2988 = vmatpush.bf16.msra.mxu0 %v6421_v48  ;;  %vm6428_vm13 = vmmov %vm6427_vm10 }
0x146f   :  { %4097 = vmatmul.msk.bf16.vlgmr.msrb.gmra.mxu2 %vm6416_vm12, %v2474_v35  ;;  %4098 = vmatmul.msk.bf16.vlgmr.msrb.gmra.mxu3 %vm6417_vm14, %v2474_v35  ;;  %vm6429_vm9 = vmmov %vm6427_vm10 }
0x1472   :  { %2896 = vmatpush.bf16.msrb.mxu1 %v6411_v30  ;;  %2989 = vmatpush.bf16.msra.mxu0 %v6422_v49 }
0x1476   :  { %2897 = vmatpush.bf16.msrb.mxu1 %v6412_v2  ;;  %2990 = vmatpush.bf16.msra.mxu0 %v6423_v42 }
0x147a   :  { %2898 = vmatpush.bf16.msrb.mxu1 %v6413_v59  ;;  %2991 = vmatpush.bf16.msra.mxu0 %v6424_v45  ;;  %v6425_v59 = vld [vmem:[#allocation60_spill] sm:$0xff] }
0x147d   :  { %4096 = vmatmul.msk.bf16.vlgmr.msra.gmra.mxu1 %vm6415_vm11, %v2474_v35 }
0x147e   :  { %2992 = vmatpush.bf16.msra.mxu0 %v6425_v59 }
0x14ca   :  { %v2665_v43 = vpop.f32.mrf.mxu1 }
0x14cb   :  { %v2781_v2 = vpack.c.bf16 %v2665_v43, %v2665_v43 }
0x14cd   :  { %v2729_v23 = vpop.f32.mrf.mxu0  ;;  %v2852_v27 = vunpack.c.l.b16 %v2781_v2 }
0x14ce   :  { %v2785_v48 = vpack.c.bf16 %v2729_v23, %v2729_v23 }
0x14d2   :  { %v2667_v29 = vpop.f32.mrf.mxu1  ;;  %v2697_v56 = vpop.f32.mrf.mxu2 }
0x14d3   :  { %v2713_v11 = vpop.f32.mrf.mxu3  ;;  %v2783_v30 = vpack.c.bf16 %v2697_v56, %v2697_v56 }
0x14d4   :  { %v2784_v0 = vpack.c.bf16 %v2713_v11, %v2713_v11 }
0x14d5   :  { %v2731_v1 = vpop.f32.mrf.mxu0  ;;  %v2854_v39 = vunpack.c.l.b16 %v2783_v30 }
0x14d6   :  { %v2855_v29 = vunpack.c.l.b16 %v2784_v0 }
0x14d7   :  { %v2862_v49 = vrot.slane %v2854_v39, 6 }
0x14da   :  { %v2681_v15 = vpop.f32.mrf.mxu1  ;;  %v2699_v17 = vpop.f32.mrf.mxu2 }
0x14db   :  { %v2782_v3 = vpack.c.bf16 %v2681_v15, %v2681_v15  ;;  %v2715_v55 = vpop.f32.mrf.mxu3  ;;  %v2856_v17 = vunpack.c.l.b16 %v2785_v48 }
0x14dc   :  { %v2864_v55 = vrot.slane %v2855_v29, 5 }
0x14dd   :  { %v2853_v14 = vunpack.c.l.b16 %v2782_v3  ;;  %v2866_v23 = vrot.slane %v2856_v17, 4 }
0x14df   :  { %v2860_v35 = vrot.slane %v2853_v14, 7 }
0x14e1   :  { %v2861_v1 = vsel %vm467_vm1, %v2860_v35, %v2852_v27 }
0x14e2   :  { %v2683_v46 = vpop.f32.mrf.mxu1  ;;  %v2761_v52 = vpop.f32.mrf.mxu2  ;;  %v2863_v56 = vsel %vm469_vm2, %v2862_v49, %v2861_v1 }
0x14e3   :  { %v2777_v8 = vpop.f32.mrf.mxu3  ;;  %v2787_v42 = vpack.c.bf16 %v2761_v52, %v2761_v52  ;;  %v2865_v30 = vsel %vm471_vm3, %v2864_v55, %v2863_v56  ;;  %v2801_v1 = vpop.f32.mrf.mxu0 }
0x14e4   :  { %v2788_v15 = vpack.c.bf16 %v2777_v8, %v2777_v8  ;;  %v2867_v35 = vsel %vm473_vm4, %v2866_v23, %v2865_v30  ;;  %v6431_v30 = vld [vmem:[#allocation52_spill] sm:$0xff] }
0x14e5   :  { %v2858_v11 = vunpack.c.l.b16 %v2787_v42  ;;  %v2528_v23 = vadd.f32 %v5818_v34, %v6431_v30 }
0x14e6   :  { %v2859_v14 = vunpack.c.l.b16 %v2788_v15 }
0x14e7   :  { %v2870_v0 = vrot.slane %v2858_v11, 2 }
0x14e8   :  { %v2872_v52 = vrot.slane %v2859_v14, 1  ;;  %v6430_v14 = vld [vmem:[#allocation51_spill] sm:$0xff] }
0x14ea   :  { %v2745_v43 = vpop.f32.mrf.mxu1  ;;  %v2763_v3 = vpop.f32.mrf.mxu2 }
0x14eb   :  { %v2786_v45 = vpack.c.bf16 %v2745_v43, %v2745_v43  ;;  %v2779_v59 = vpop.f32.mrf.mxu3  ;;  %v2803_v17 = vpop.f32.mrf.mxu0 }
0x14ed   :  { %v2857_v46 = vunpack.c.l.b16 %v2786_v45 }
0x14ef   :  { %v2868_v2 = vrot.slane %v2857_v46, 3  ;;  %v2527_v46 = vadd.f32 %v5816_v33, %v6430_v14 }
0x14f1   :  { %v2869_v8 = vsel %vm475_vm5, %v2868_v2, %v2867_v35  ;;  %v6432_v2 = vld [vmem:[#allocation53_spill] sm:$0xff]  ;;  %v6433_v35 = vld [vmem:[#allocation54_spill] sm:$0xff] }
0x14f2   :  { %v2871_v39 = vsel %vm477_vm6, %v2870_v0, %v2869_v8  ;;  %v2747_v27 = vpop.f32.mrf.mxu1  ;;  %v2827_v42 = vpop.f32.mrf.mxu2 }
0x14f3   :  { %v2873_v48 = vsel %vm479_vm7, %v2872_v52, %v2871_v39  ;;  %v5878_v15 = vpop.f32.mrf.mxu3 }
0x14f4   :  { %v2874_v29 = vpack.c.b16 %v2873_v48, %v2873_v48 }
0x14f6   :  { %4099 = vmatmul.msk.bf16.vlgmr.msrb.gmra.mxu0 %vm6426_vm15, %v2874_v29  ;;  %4100 = vmatmul.msk.bf16.vlgmr.msrb.gmra.mxu1 %vm6427_vm10, %v2874_v29 }
0x14f7   :  { %4101 = vmatmul.msk.bf16.vlgmr.msra.gmra.mxu2 %vm6428_vm13, %v2874_v29  ;;  %4102 = vmatmul.msk.bf16.vlgmr.msra.gmra.mxu3 %vm6429_vm9, %v2874_v29 }
0x14fa   :  { %v2814_v49 = vpop.f32.mrf.mxu1  ;;  %v2829_v43 = vpop.f32.mrf.mxu2 }
0x14fb   :  { %v2842_v3 = vpop.f32.mrf.mxu3 }
0x1502   :  { %v2816_v56 = vpop.f32.mrf.mxu1 }
0x1573   :  { %v2887_v55 = vpop.f32.mrf.mxu0  ;;  %v2900_v45 = vpop.f32.mrf.mxu1 }
0x1574   :  { %v2930_v59 = vadd.f32 %v2887_v55, %v2801_v1  ;;  %v2931_v11 = vadd.f32 %v2900_v45, %v2814_v49 }
0x1576   :  { %v2933_v0 = vadd.f32 %v2930_v59, %v6432_v2  ;;  %v2934_v52 = vadd.f32 %v2931_v11, %v6433_v35 }
0x1578   :  { %v2936_v8 = vadd.f32 %v2933_v0, %v2527_v46  ;;  %v2956_v39 = vadd.f32 %v2934_v52, %v2528_v23 }
0x157a   :  { %v4103_v27 = vmul.f32 -1.442695, %v2936_v8  ;;  %v4104_v48 = vmul.f32 -1.442695, %v2956_v39  ;;  %v2913_v29 = vpop.f32.mrf.mxu2  ;;  %v2926_v17 = vpop.f32.mrf.mxu3 }
0x157b   :  { %v2889_v56 = vpop.f32.mrf.mxu0  ;;  %v2902_v43 = vpop.f32.mrf.mxu1  ;;  %v2932_v52 = vadd.f32 %v2913_v29, %v2827_v42 }
0x157c   :  { %4379 = vpow2.f32 %v4103_v27  ;;  %v2529_v27 = vadd.f32 %v5821_v32, %v5294_v57 }
0x157d   :  { %4381 = vpow2.f32 %v4104_v48 }
0x1582   :  { %v4380_v1 = vpop.eup %4379  ;;  %v2915_v49 = vpop.f32.mrf.mxu2 }
0x1583   :  { %v2928_v33 = vpop.f32.mrf.mxu3  ;;  %v4382_v3 = vpop.eup %4381  ;;  %v2940_v55 = vadd.f32 1.0, %v4380_v1  ;;  %v2935_v49 = vadd.f32 %v2932_v52, %v5297_v51 }
0x1584   :  { %v2960_v34 = vadd.f32 1.0, %v4382_v3 }
0x1585   :  { %4383 = vrcp.f32 %v2940_v55  ;;  %v2952_v23 = vand.u32 2147483648, %v2940_v55  ;;  %v2950_v0 = vand.u32 2147483647, %v2940_v55  ;;  %vm2946_vm12 = vweird.f32 %v2940_v55 }
0x1586   :  { %4385 = vrcp.f32 %v2960_v34  ;;  %v2972_v1 = vand.u32 2147483648, %v2960_v34  ;;  %vm2966_vm13 = vweird.f32 %v2960_v34  ;;  %v2970_v3 = vand.u32 2147483647, %v2960_v34 }
0x1587   :  { %v2953_v39 = vor.u32 1.1754944e-38, %v2952_v23  ;;  %vm2951_vm15 = vcmp.eq.f32.partialorder %v2950_v0, 8.507059e+37 }
0x158b   :  { %v4384_v45 = vpop.eup %4383 }
0x158c   :  { %v4386_v59 = vpop.eup %4385  ;;  %v2942_v11 = vmul.f32 %v4384_v45, %v2940_v55  ;;  %vm2947_vm11 = vweird.f32 %v4384_v45  ;;  %v2973_v55 = vor.u32 1.1754944e-38, %v2972_v1 }
0x158d   :  { %v2962_v14 = vmul.f32 %v4386_v59, %v2960_v34  ;;  %vm2948_vm14 = vmor %vm2946_vm12, %vm2947_vm11  ;;  %vm2967_vm10 = vweird.f32 %v4386_v59  ;;  %vm2971_vm11 = vcmp.eq.f32.partialorder %v2970_v3, 8.507059e+37 }
0x158e   :  { %v2943_v46 = vsub.f32 1.0, %v2942_v11  ;;  %vm2968_vm9 = vmor %vm2966_vm13, %vm2967_vm10 }
0x158f   :  { %v2963_v30 = vsub.f32 1.0, %v2962_v14 }
0x1590   :  { %v2944_v2 = vmul.f32 %v4384_v45, %v2943_v46 }
0x1591   :  { %v2964_v35 = vmul.f32 %v4386_v59, %v2963_v30 }
0x1592   :  { %v2945_v8 = vadd.f32 %v4384_v45, %v2944_v2 }
0x1593   :  { %v2965_v43 = vadd.f32 %v4386_v59, %v2964_v35 }
0x1594   :  { %v2949_v48 = vsel %vm2948_vm14, %v4384_v45, %v2945_v8 }
0x1595   :  { %v2954_v56 = vsel %vm2951_vm15, %v2953_v39, %v2949_v48  ;;  %v2969_v29 = vsel %vm2968_vm9, %v4386_v59, %v2965_v43 }
0x1596   :  { %v2976_v33 = vmul.f32 %v2954_v56, %v2529_v27  ;;  %v2974_v11 = vsel %vm2971_vm11, %v2973_v55, %v2969_v29 }
0x1597   :  { %v2979_v14 = vsub.f32 1.0, %v2974_v11  ;;  %v2981_v46 = vmul.f32 %v2974_v11, %v5760_v60 }
0x1598   :  { %v2977_v42 = vadd.f32 %v2976_v33, %v2935_v49 }
0x159a   :  { %4387 = vtanh.f32 %v2977_v42 }
0x15a0   :  { %v4388_v32 = vpop.eup %4387 }
0x15a1   :  { %v2980_v45 = vmul.f32 %v4388_v32, %v2979_v14 }
0x15a3   :  { %v2982_v30 = vadd.f32 %v2981_v46, %v2980_v45 }
0x15a5   :  { %2983 = vst [vmem:[%s6104_s13] sm:$0xff] %v2982_v30  ;;  %v2984_v23 = vpack.c.bf16 %v2982_v30, %v2982_v30 }
0x15a7   :  { %2993 = vmatmul.bf16.vlgmr.msra.gmra.mxu0 %v2984_v23 }
0x1624   :  { %v2994_v34 = vpop.f32.mrf.mxu0 }
0x1625   :  { %v2995_v59 = vadd.f32 %v2994_v34, %v5878_v15 }
0x1627   :  { %v2998_v2 = vadd.f32 %v2995_v59, %v2926_v17 }
0x1628   :  { %3006 = sbr.rel (%p4107_p6) target bundleno = 6173 (0x181d), region = 69 }
0x1629   :  { %v2999_v0 = vadd.f32 %v5312_v38, %v2998_v2 }
0x162b   :  { %4105 = vst [vmem:[%s6103_s12 + $0x20] sm:$0xff] %v2999_v0 }
0x162c   :  { %v2996_v35 = vpop.f32.mrf.mxu0 }
0x162d   :  { %3007 = vmax.xlane.f32.xlu0 %v2999_v0  ;;  %v4259_v15 = vld [vmem:[%s6097_s6 + $0x38] sm:$0xff]  ;;  %v4258_v17 = vld [vmem:[%s6097_s6 + $0x30] sm:$0xff]  ;;  %v4257_v27 = vld [vmem:[%s6097_s6 + $0x28] sm:$0xff]  ;;  %v4438_v46 = vmov 1.0|1.0  }
0x162e   :  { %3093 = vmatpush.bf16.msra.mxu0 %v4259_v15  ;;  %v4256_v48 = vld [vmem:[%s6097_s6 + $0x20] sm:$0xff]  ;;  %v4255_v56 = vld [vmem:[%s6097_s6 + $0x18] sm:$0xff]  ;;  %v4254_v43 = vld [vmem:[%s6097_s6 + $0x10] sm:$0xff] }
0x162f   :  { %v4253_v42 = vld [vmem:[%s6097_s6 + $0x8] sm:$0xff]  ;;  %v4252_v29 = vld [vmem:[%s6097_s6] sm:$0xff] }
0x1632   :  { %3094 = vmatpush.bf16.msra.mxu0 %v4258_v17 }
0x1636   :  { %3095 = vmatpush.bf16.msra.mxu0 %v4257_v27 }
0x163a   :  { %3096 = vmatpush.bf16.msra.mxu0 %v4256_v48 }
0x163e   :  { %3097 = vmatpush.bf16.msra.mxu0 %v4255_v56 }
0x1642   :  { %3098 = vmatpush.bf16.msra.mxu0 %v4254_v43 }
0x1646   :  { %3099 = vmatpush.bf16.msra.mxu0 %v4253_v42 }
0x164a   :  { %3100 = vmatpush.bf16.msra.mxu0 %v4252_v29 }
0x16a0   :  { %v3008_v60 = vpop.xlane.xlu0 %3007 }
0x16a1   :  { %vm3009_vm12 = vcmp.eq.f32.partialorder %v2999_v0, %v3008_v60 }
0x16a2   :  { %v3010_v52 = vsel %vm3009_vm12, %v4658_v26, 128 }
0x16a3   :  { %v3012_v8 = vshra.s32 %v3010_v52, 16  ;;  %v3011_v1 = vand.u32 65535, %v3010_v52 }
0x16a5   :  { %v3014_v39 = vcvt.s32.f32 %v3012_v8  ;;  %v3013_v33 = vcvt.s32.f32 %v3011_v1 }
0x16a7   :  { %3015 = vmin.xlane.f32.xlu0 %v3014_v39 }
0x171a   :  { %v3016_v49 = vpop.xlane.xlu0 %3015 }
0x171b   :  { %vm3017_vm14 = vcmp.eq.f32.partialorder %v3014_v39, %v3016_v49  ;;  %v3022_v55 = vcvt.f32.s32 %v3016_v49 }
0x171c   :  { %v3018_v3 = vsel %vm3017_vm14, %v3013_v33, inf }
0x171d   :  { %3019 = vmin.xlane.f32.xlu1 %v3018_v3  ;;  %v3023_v14 = vshll.u32 %v3022_v55, 16 }
0x1790   :  { %v3020_v11 = vpop.xlane.xlu1 %3019 }
0x1791   :  { %v3021_v32 = vcvt.f32.s32 %v3020_v11 }
0x1793   :  { %v3024_v45 = vadd.s32 %v3023_v14, %v3021_v32 }
0x1795   :  { %vm3025_vm15 = vcmp.eq.s32.totalorder %v4658_v26, %v3024_v45 }
0x1796   :  { %vm4141_vm10 = vmpackc.low %vm3025_vm15, %vm3025_vm15 }
0x1797   :  { %4142 = vmatmul.msk.bf16.vlgmr.msra.gmra.mxu0 %vm4141_vm10, %v4438_v46 }
0x1814   :  { %v3102_v30 = vpop.f32.mrf.mxu0 }
0x1815   :  { %v3106_v23 = vpack.c.bf16 %v3102_v30, %v3102_v30 }
0x1817   :  { %3107 = vst.msk [vmem:[#allocation2] sm:$0xf] %vm157_vm0, %v3106_v23 }
0x181c   :  { %v3104_v34 = vpop.f32.mrf.mxu0 }
0x181d PF:  { %3119 = vmatpush.bf16.msra.mxu0 %v4524_v4  ;;  %3132 = vmatpush.bf16.msra.mxu1 %v4696_v62  ;;  %v5953_v4 = vld [vmem:[%s6104_s13] sm:$0xff]  ;;  %v6449_v52 = vld [vmem:[#allocation11_spill] sm:$0xff]  ;;  %v6450_v27 = vld [vmem:[#allocation12_spill] sm:$0xff]  ;;  %vm6454_vm0 = vcmask 64512   ;;  %s4143_s25 = sld [smem:[#allocation3 + $0x4]] }
0x181e   :  { %3145 = vmatpush.bf16.msra.mxu2 %v4719_v9  ;;  %3158 = vmatpush.bf16.msra.mxu3 %v4724_v12  ;;  %v6439_v62 = vld [vmem:[#allocation21_spill] sm:$0xff]  ;;  %v6443_v12 = vld [vmem:[#allocation26_spill] sm:$0xff]  ;;  %vm6455_vm13 = vmmov %vm6454_vm0 }
0x181f   :  { %v6442_v9 = vld [vmem:[#allocation25_spill] sm:$0xff]  ;;  %v6448_v35 = vld [vmem:[#allocation10_spill] sm:$0xff]  ;;  %vm6458_vm9 = vmmov %vm6454_vm0 }
0x1820   :  { %v6451_v3 = vld [vmem:[#allocation13_spill] sm:$0xff]  ;;  %v6452_v55 = vld [vmem:[#allocation14_spill] sm:$0xff]  ;;  %vm6459_vm11 = vmmov %vm6454_vm0 }
0x1821   :  { %3120 = vmatpush.bf16.msra.mxu0 %v4534_v7  ;;  %3133 = vmatpush.bf16.msra.mxu1 %v4711_v5  ;;  %v3109_v7 = vpack.c.bf16 %v5953_v4, %v5953_v4  ;;  %v6441_v5 = vld [vmem:[#allocation23_spill] sm:$0xff]  ;;  %vm6460_vm12 = vmmov %vm6454_vm0 }
0x1822   :  { %3146 = vmatpush.bf16.msra.mxu2 %v4736_v18  ;;  %3159 = vmatpush.bf16.msra.mxu3 %v4742_v21  ;;  %vm6468_vm14 = vmmov %vm6454_vm0 }
0x1823   :  { %vm6471_vm15 = vmmov %vm6454_vm0  ;;  %p3111_p7 = scmp.ne.s32.totalorder %s4143_s25, 0 }
0x1824   :  { %vm6472_vm10 = vmmov %vm6454_vm0 }
0x1825   :  { %3121 = vmatpush.bf16.msra.mxu0 %v4543_v10  ;;  %3134 = vmatpush.bf16.msra.mxu1 %v4751_v28  ;;  %v6434_v10 = vld [vmem:[#allocation17_spill] sm:$0xff]  ;;  %s3115_s10 = scalar_select %p3111_p7, 1, 0 }
0x1826   :  { %3147 = vmatpush.bf16.msra.mxu2 %v4766_v36  ;;  %3160 = vmatpush.bf16.msra.mxu3 %v4769_v37 }
0x1829   :  { %3122 = vmatpush.bf16.msra.mxu0 %v4552_v13  ;;  %3135 = vmatpush.bf16.msra.mxu1 %v4778_v40  ;;  %v6435_v13 = vld [vmem:[#allocation16_spill] sm:$0xff] }
0x182a   :  { %3148 = vmatpush.bf16.msra.mxu2 %v4793_v47  ;;  %3161 = vmatpush.bf16.msra.mxu3 %v4796_v50  ;;  %v6444_v50 = vld [vmem:[#allocation6_spill] sm:$0xff] }
0x182d   :  { %3123 = vmatpush.bf16.msra.mxu0 %v4561_v16  ;;  %3136 = vmatpush.bf16.msra.mxu1 %v4805_v54  ;;  %v6436_v16 = vld [vmem:[#allocation18_spill] sm:$0xff] }
0x182e   :  { %3149 = vmatpush.bf16.msra.mxu2 %v4820_v61  ;;  %3162 = vmatpush.bf16.msra.mxu3 %v4823_v63 }
0x1831   :  { %3124 = vmatpush.bf16.msra.mxu0 %v4570_v19  ;;  %3137 = vmatpush.bf16.msra.mxu1 %v4832_v6  ;;  %v6437_v19 = vld [vmem:[#allocation19_spill] sm:$0xff] }
0x1832   :  { %3150 = vmatpush.bf16.msra.mxu2 %v4848_v20  ;;  %3163 = vmatpush.bf16.msra.mxu3 %v4851_v24  ;;  %v6445_v20 = vld [vmem:[#allocation7_spill] sm:$0xff] }
0x1835   :  { %3125 = vmatpush.bf16.msra.mxu0 %v4579_v22  ;;  %3138 = vmatpush.bf16.msra.mxu1 %v4860_v31  ;;  %v6438_v22 = vld [vmem:[#allocation20_spill] sm:$0xff] }
0x1836   :  { %3151 = vmatpush.bf16.msra.mxu2 %v4875_v41  ;;  %3164 = vmatpush.bf16.msra.mxu3 %v4881_v44  ;;  %v6446_v31 = vld [vmem:[#allocation8_spill] sm:$0xff] }
0x1839   :  { %3126 = vmatpush.bf16.msra.mxu0 %v4588_v25  ;;  %3139 = vmatpush.bf16.msra.mxu1 %v4890_v53  ;;  %v6440_v25 = vld [vmem:[#allocation22_spill] sm:$0xff] }
0x183a   :  { %3152 = vmatpush.bf16.msra.mxu2 %v4899_v58  ;;  %3165 = vmatpush.bf16.msra.mxu3 %v6434_v10  ;;  %v6447_v58 = vld [vmem:[#allocation9_spill] sm:$0xff] }
0x183c   :  { %3127 = vmatmul.bf16.vlgmr.msra.gmra.mxu0 %v3109_v7  ;;  %3140 = vmatmul.bf16.vlgmr.msra.gmra.mxu1 %v3109_v7 }
0x183d   :  { %3307 = vmatpush.bf16.msrb.mxu1 %v6435_v13  ;;  %3153 = vmatmul.bf16.vlgmr.msra.gmra.mxu2 %v3109_v7 }
0x183e   :  { %3339 = vmatpush.bf16.msrb.mxu2 %v6436_v16  ;;  %3166 = vmatmul.bf16.vlgmr.msra.gmra.mxu3 %v3109_v7 }
0x183f   :  { %3355 = vmatpush.bf16.msrb.mxu3 %v6437_v19  ;;  %3371 = vmatpush.bf16.msrb.mxu0 %v6438_v22 }
0x1841   :  { %3323 = vmatpush.bf16.msra.mxu1 %v6439_v62 }
0x1842   :  { %3403 = vmatpush.bf16.msra.mxu2 %v6440_v25 }
0x1843   :  { %3419 = vmatpush.bf16.msra.mxu3 %v6441_v5  ;;  %3442 = vmatpush.bf16.msra.mxu0 %v6442_v9 }
0x1847   :  { %3443 = vmatpush.bf16.msra.mxu0 %v6443_v12 }
0x18b9   :  { %v3128_v18 = vpop.f32.mrf.mxu0 }
0x18ba   :  { %v3182_v21 = vperm.slane %v3128_v18, 0  ;;  %v3178_v28 = vrot.slane %v3128_v18, 4  ;;  %v3176_v36 = vrot.slane %v3128_v18, 2  ;;  %v3175_v37 = vrot.slane %v3128_v18, 1 }
0x18bb   :  { %v3179_v40 = vrot.slane %v3128_v18, 5  ;;  %v3177_v47 = vrot.slane %v3128_v18, 3  ;;  %v3180_v2 = vrot.slane %v3128_v18, 6  ;;  %v3181_v39 = vrot.slane %v3128_v18, 7 }
0x18bc   :  { %v3198_v54 = vadd.f32 %v3182_v21, %v6444_v50  ;;  %v3186_v61 = vperm.slane %v3178_v28, 0  ;;  %v3184_v63 = vperm.slane %v3176_v36, 0  ;;  %v3183_v6 = vperm.slane %v3175_v37, 0 }
0x18bd   :  { %v3187_v44 = vperm.slane %v3179_v40, 0  ;;  %v3185_v53 = vperm.slane %v3177_v47, 0  ;;  %v3188_v17 = vperm.slane %v3180_v2, 0  ;;  %v3189_v49 = vperm.slane %v3181_v39, 0 }
0x18be   :  { %4389 = vtanh.f32 %v3198_v54  ;;  %v3202_v24 = vadd.f32 %v3186_v61, %v6445_v20  ;;  %v3200_v41 = vadd.f32 %v3184_v63, %v6446_v31  ;;  %v3199_v59 = vadd.f32 %v3183_v6, %v6447_v58  ;;  %v6491_v31 = vld [vmem:[#allocation50_spill] sm:$0xff] }
0x18bf   :  { %v3203_v60 = vadd.f32 %v3187_v44, %v6448_v35  ;;  %v3201_v8 = vadd.f32 %v3185_v53, %v6449_v52  ;;  %v3204_v42 = vadd.f32 %v3188_v17, %v6451_v3  ;;  %v3205_v11 = vadd.f32 %v3189_v49, %v6452_v55  ;;  %v6462_v3 = vld [vmem:[#allocation29_spill] sm:$0xff] }
0x18c0   :  { %4391 = vtanh.f32 %v3202_v24 }
0x18c1   :  { %v3130_v0 = vpop.f32.mrf.mxu0  ;;  %4393 = vtanh.f32 %v3200_v41  ;;  %v6014_v49 = vpop.f32.mrf.mxu3 }
0x18c2   :  { %4395 = vtanh.f32 %v3199_v59 }
0x18c3   :  { %4397 = vtanh.f32 %v3203_v60 }
0x18c4   :  { %v4390_v15 = vpop.eup %4389  ;;  %4399 = vtanh.f32 %v3201_v8 }
0x18c5   :  { %v3214_v48 = vmul.f32 %v4390_v15, %v6450_v27  ;;  %4401 = vtanh.f32 %v3204_v42  ;;  %v6463_v42 = vld [vmem:[#allocation33_spill] sm:$0xff] }
0x18c6   :  { %v4392_v56 = vpop.eup %4391  ;;  %4403 = vtanh.f32 %v3205_v11 }
0x18c7   :  { %v4394_v43 = vpop.eup %4393  ;;  %3222 = vadd.xlane.f32.xlu0 %v3214_v48  ;;  %v3218_v1 = vmul.f32 %v4392_v56, %v6450_v27  ;;  %v6009_v56 = vpop.f32.mrf.mxu1 }
0x18c8   :  { %v3216_v33 = vmul.f32 %v4394_v43, %v6450_v27  ;;  %v4396_v29 = vpop.eup %4395  ;;  %v6011_v43 = vpop.f32.mrf.mxu2 }
0x18c9   :  { %3230 = vadd.xlane.f32.xlu2 %v3218_v1  ;;  %v4398_v14 = vpop.eup %4397  ;;  %v3215_v45 = vmul.f32 %v4396_v29, %v6450_v27  ;;  %v6457_v1 = vld [vmem:[#allocation24_spill] sm:$0xff]  ;;  %v6464_v29 = vld [vmem:[#allocation31_spill] sm:$0xff] }
0x18ca   :  { %3226 = vadd.xlane.f32.xlu1 %v3216_v33  ;;  %v4400_v32 = vpop.eup %4399  ;;  %v3219_v46 = vmul.f32 %v4398_v14, %v6450_v27  ;;  %v6461_v33 = vld [vmem:[#allocation28_spill] sm:$0xff] }
0x18cb   :  { %v3217_v30 = vmul.f32 %v4400_v32, %v6450_v27  ;;  %v4402_v23 = vpop.eup %4401  ;;  %v6465_v14 = vld [vmem:[#allocation32_spill] sm:$0xff]  ;;  %v6466_v32 = vld [vmem:[#allocation37_spill] sm:$0xff] }
0x18cc   :  { %v4404_v34 = vpop.eup %4403  ;;  %v3220_v7 = vmul.f32 %v4402_v23, %v6450_v27 }
0x18cd   :  { %v3221_v10 = vmul.f32 %v4404_v34, %v6450_v27  ;;  %v6467_v34 = vld [vmem:[#allocation41_spill] sm:$0xff] }
0x18cf   :  { %3224 = vadd.xlane.f32.xlu0 %v3215_v45  ;;  %v3143_v55 = vpop.f32.mrf.mxu1  ;;  %v3169_v45 = vpop.f32.mrf.mxu3 }
0x18d0   :  { %v3156_v11 = vpop.f32.mrf.mxu2 }
0x18d1   :  { %3232 = vadd.xlane.f32.xlu2 %v3219_v46 }
0x18d2   :  { %3228 = vadd.xlane.f32.xlu1 %v3217_v30 }
0x18d7   :  { %3234 = vadd.xlane.f32.xlu0 %v3220_v7 }
0x18da   :  { %3236 = vadd.xlane.f32.xlu1 %v3221_v10 }
0x193a   :  { %v3223_v13 = vpop.xlane.xlu0 %3222 }
0x193b   :  { %v3246_v62 = vperm.slane %v3223_v13, %v4658_v26 }
0x193c   :  { %v3231_v16 = vpop.xlane.xlu2 %3230 }
0x193d   :  { %v3227_v19 = vpop.xlane.xlu1 %3226  ;;  %v3250_v28 = vperm.slane %v3231_v16, %v4658_v26  ;;  %v6469_v16 = vld [vmem:[#allocation45_spill] sm:$0xff] }
0x193e   :  { %v3248_v5 = vperm.slane %v3227_v19, %v4658_v26  ;;  %v6470_v19 = vld [vmem:[#allocation27_spill] sm:$0xff] }
0x1942   :  { %v3225_v22 = vpop.xlane.xlu0 %3224 }
0x1943   :  { %v3247_v25 = vperm.slane %v3225_v22, %v4658_v26  ;;  %v6473_v22 = vld [vmem:[#allocation35_spill] sm:$0xff] }
0x1944   :  { %v3233_v36 = vpop.xlane.xlu2 %3232 }
0x1945   :  { %v3254_v9 = vsel %vm467_vm1, %v3247_v25, %v3246_v62  ;;  %v3229_v12 = vpop.xlane.xlu1 %3228  ;;  %v3251_v47 = vperm.slane %v3233_v36, %v4658_v26  ;;  %v6474_v62 = vld [vmem:[#allocation36_spill] sm:$0xff]  ;;  %v6475_v25 = vld [vmem:[#allocation30_spill] sm:$0xff]  ;;  %v6480_v36 = vld [vmem:[#allocation47_spill] sm:$0xff] }
0x1946   :  { %v3249_v18 = vperm.slane %v3229_v12, %v4658_v26  ;;  %v3255_v21 = vsel %vm469_vm2, %v3248_v5, %v3254_v9  ;;  %v6476_v5 = vld [vmem:[#allocation39_spill] sm:$0xff]  ;;  %v6477_v9 = vld [vmem:[#allocation40_spill] sm:$0xff] }
0x1948   :  { %v3256_v37 = vsel %vm471_vm3, %v3249_v18, %v3255_v21  ;;  %v6478_v18 = vld [vmem:[#allocation43_spill] sm:$0xff]  ;;  %v6479_v21 = vld [vmem:[#allocation44_spill] sm:$0xff] }
0x1949   :  { %v3257_v40 = vsel %vm473_vm4, %v3250_v28, %v3256_v37  ;;  %v6481_v37 = vld [vmem:[#allocation48_spill] sm:$0xff] }
0x194a   :  { %v3235_v50 = vpop.xlane.xlu0 %3234  ;;  %v3258_v61 = vsel %vm475_vm5, %v3251_v47, %v3257_v40  ;;  %v6482_v40 = vld [vmem:[#allocation34_spill] sm:$0xff] }
0x194b   :  { %v3252_v54 = vperm.slane %v3235_v50, %v4658_v26  ;;  %v6483_v47 = vld [vmem:[#allocation38_spill] sm:$0xff] }
0x194c   :  { %v6484_v50 = vld [vmem:[#allocation42_spill] sm:$0xff] }
0x194d   :  { %v3259_v63 = vsel %vm477_vm6, %v3252_v54, %v3258_v61  ;;  %v3237_v6 = vpop.xlane.xlu1 %3236  ;;  %v6485_v54 = vld [vmem:[#allocation46_spill] sm:$0xff]  ;;  %v3116_v61 = vstv %s3115_s10 }
0x194e   :  { %v3253_v20 = vperm.slane %v3237_v6, %v4658_v26  ;;  %v3114_v6 = vld [vmem:[#allocation2] sm:$0xf] }
0x1950   :  { %v3260_v24 = vsel %vm479_vm7, %v3253_v20, %v3259_v63  ;;  %v4144_v63 = vld [vmem:[%s6092_s1 + $0x10] sm:$0xf] }
0x1951   :  { %v3262_v41 = vsel %vm80_vm8, -1e+10, %v3260_v24  ;;  %vm6456_vm8 = vmmov %vm6454_vm0  ;;  %v6490_v24 = vld [vmem:[#allocation49_spill] sm:$0xff] }
0x1952   :  { %v3263_v44 = vsel %vm6454_vm0, %v3262_v41, -inf }
0x1953   :  { %3264 = vmax.xlane.f32.xlu2 %v3263_v44 }
0x19c6   :  { %v3265_v53 = vpop.xlane.xlu2 %3264 }
0x19c7   :  { %v3266_v58 = vsub.f32 %v3262_v41, %v3265_v53  ;;  %v6492_v53 = vld [vmem:[#allocation55_spill] sm:$0xff] }
0x19c9   :  { %v3267_v59 = vmul.f32 1.442695, %v3266_v58  ;;  %v6493_v58 = vld [vmem:[#allocation56_spill] sm:$0xff] }
0x19cb   :  { %4405 = vpow2.f32 %v3267_v59 }
0x19d1   :  { %v4406_v2 = vpop.eup %4405 }
0x19d2   :  { %v3269_v0 = vsel %vm6455_vm13, %v4406_v2, 0.0  ;;  %vm3117_vm13 = vcmp.eq.s32.totalorder %v3116_v61, 1 }
0x19d3   :  { %3270 = vadd.xlane.f32.xlu0 %v3269_v0  ;;  %v3118_v20 = vsel %vm3117_vm13, %v4144_v63, %v3114_v6 }
0x1a46   :  { %v3271_v35 = vpop.xlane.xlu0 %3270 }
0x1a47   :  { %4407 = vrcp.f32 %v3271_v35 }
0x1a4d   :  { %v4408_v60 = vpop.eup %4407 }
0x1a4e   :  { %v3273_v26 = vmul.f32 %v4408_v60, %v4406_v2  ;;  %v6494_v60 = vld [vmem:[#allocation57_spill] sm:$0xff] }
0x1a50   :  { %v3289_v52 = vpack.c.bf16 %v3273_v26, %v3273_v26  ;;  %v3276_v8 = vrot.slane %v3273_v26, 2  ;;  %v3277_v39 = vrot.slane %v3273_v26, 3  ;;  %v3278_v15 = vrot.slane %v3273_v26, 4 }
0x1a51   :  { %v3275_v46 = vrot.slane %v3273_v26, 1  ;;  %v3280_v30 = vrot.slane %v3273_v26, 6  ;;  %v3281_v23 = vrot.slane %v3273_v26, 7  ;;  %v3279_v12 = vrot.slane %v3273_v26, 5  ;;  %v6495_v26 = vld [vmem:[#allocation58_spill] sm:$0xff] }
0x1a52   :  { %4145 = vmatmul.msk.bf16.vlgmr.msrb.gmra.mxu1 %vm6456_vm8, %v3289_v52  ;;  %v3291_v17 = vpack.c.bf16 %v3276_v8, %v3276_v8  ;;  %v3292_v27 = vpack.c.bf16 %v3277_v39, %v3277_v39  ;;  %v3293_v48 = vpack.c.bf16 %v3278_v15, %v3278_v15  ;;  %vm6486_vm8 = vcmask 261120  }
0x1a53   :  { %3387 = vmatpush.bf16.msrb.mxu1 %v6457_v1  ;;  %v3290_v7 = vpack.c.bf16 %v3275_v46, %v3275_v46  ;;  %v3295_v10 = vpack.c.bf16 %v3280_v30, %v3280_v30  ;;  %v3296_v13 = vpack.c.bf16 %v3281_v23, %v3281_v23  ;;  %v3294_v28 = vpack.c.bf16 %v3279_v12, %v3279_v12 }
0x1a54   :  { %4147 = vmatmul.msk.bf16.vlgmr.msrb.gmra.mxu2 %vm6458_vm9, %v3291_v17  ;;  %4148 = vmatmul.msk.bf16.vlgmr.msrb.gmra.mxu3 %vm6459_vm11, %v3292_v27  ;;  %vm6487_vm9 = vmmov %vm6486_vm8  ;;  %v6496_v17 = vld [vmem:[#allocation59_spill] sm:$0xff] }
0x1a55   :  { %4149 = vmatmul.msk.bf16.vlgmr.msrb.gmra.mxu0 %vm6460_vm12, %v3293_v48  ;;  %3468 = vmatpush.bf16.msrb.mxu2 %v6461_v33  ;;  %vm6488_vm11 = vmmov %vm6486_vm8  ;;  %v6497_v33 = vld [vmem:[#allocation60_spill] sm:$0xff] }
0x1a56   :  { %3481 = vmatpush.bf16.msrb.mxu3 %v6462_v3  ;;  %3526 = vmatpush.bf16.msrb.mxu0 %v6463_v42  ;;  %vm6489_vm12 = vmmov %vm6486_vm8 }
0x1a59   :  { %3469 = vmatpush.bf16.msrb.mxu2 %v6464_v29 }
0x1a5a   :  { %3482 = vmatpush.bf16.msrb.mxu3 %v6465_v14  ;;  %3527 = vmatpush.bf16.msrb.mxu0 %v6466_v32 }
0x1a5e   :  { %3528 = vmatpush.bf16.msrb.mxu0 %v6467_v34 }
0x1a62   :  { %4146 = vmatmul.msk.bf16.vlgmr.msra.gmra.mxu1 %vm6468_vm14, %v3290_v7  ;;  %3529 = vmatpush.bf16.msrb.mxu0 %v6469_v16 }
0x1a63   :  { %3455 = vmatpush.bf16.msra.mxu1 %v6470_v19 }
0x1a64   :  { %4151 = vmatmul.msk.bf16.vlgmr.msra.gmra.mxu2 %vm6471_vm15, %v3295_v10  ;;  %4152 = vmatmul.msk.bf16.vlgmr.msra.gmra.mxu3 %vm6472_vm10, %v3296_v13 }
0x1a65   :  { %3552 = vmatpush.bf16.msra.mxu2 %v6473_v22  ;;  %3565 = vmatpush.bf16.msra.mxu3 %v6474_v62 }
0x1a66   :  { %4153 = vmatmul.msk.bf16.vlgmr.msra.gmra.mxu0 %vm6486_vm8, %v3118_v20 }
0x1a67   :  { %3456 = vmatpush.bf16.msra.mxu1 %v6475_v25  ;;  %3629 = vmatpush.bf16.msra.mxu0 %v6490_v24 }
0x1a69   :  { %3553 = vmatpush.bf16.msra.mxu2 %v6476_v5  ;;  %3566 = vmatpush.bf16.msra.mxu3 %v6477_v9 }
0x1a6b   :  { %3630 = vmatpush.bf16.msra.mxu0 %v6491_v31 }
0x1a6d   :  { %3554 = vmatpush.bf16.msra.mxu2 %v6478_v18  ;;  %3567 = vmatpush.bf16.msra.mxu3 %v6479_v21 }
0x1a6f   :  { %3631 = vmatpush.bf16.msra.mxu0 %v6492_v53 }
0x1a71   :  { %3555 = vmatpush.bf16.msra.mxu2 %v6480_v36  ;;  %3568 = vmatpush.bf16.msra.mxu3 %v6481_v37 }
0x1a72   :  { %4150 = vmatmul.msk.bf16.vlgmr.msrb.gmra.mxu1 %vm6454_vm0, %v3294_v28 }
0x1a73   :  { %3539 = vmatpush.bf16.msrb.mxu1 %v6482_v40  ;;  %3632 = vmatpush.bf16.msra.mxu0 %v6493_v58 }
0x1a74   :  { %4155 = vmatmul.msk.bf16.vlgmr.msrb.gmra.mxu2 %vm6488_vm11, %v3118_v20  ;;  %4156 = vmatmul.msk.bf16.vlgmr.msrb.gmra.mxu3 %vm6489_vm12, %v3118_v20 }
0x1a77   :  { %3540 = vmatpush.bf16.msrb.mxu1 %v6483_v47  ;;  %3633 = vmatpush.bf16.msra.mxu0 %v6494_v60  ;;  %v6502_v60 = vld [vmem:[#allocation51_spill] sm:$0xff] }
0x1a7b   :  { %3541 = vmatpush.bf16.msrb.mxu1 %v6484_v50  ;;  %3634 = vmatpush.bf16.msra.mxu0 %v6495_v26  ;;  %v3171_v26 = vadd.f32 %v6009_v56, %v6502_v60 }
0x1a7f   :  { %3542 = vmatpush.bf16.msrb.mxu1 %v6485_v54  ;;  %3635 = vmatpush.bf16.msra.mxu0 %v6496_v17  ;;  %v6505_v17 = vld [vmem:[#allocation54_spill] sm:$0xff] }
0x1a82   :  { %4154 = vmatmul.msk.bf16.vlgmr.msra.gmra.mxu1 %vm6487_vm9, %v3118_v20 }
0x1a83   :  { %3636 = vmatpush.bf16.msra.mxu0 %v6497_v33 }
0x1acf   :  { %v3309_v41 = vpop.f32.mrf.mxu1 }
0x1ad0   :  { %v3425_v1 = vpack.c.bf16 %v3309_v41, %v3309_v41 }
0x1ad2   :  { %v3373_v44 = vpop.f32.mrf.mxu0  ;;  %v3496_v32 = vunpack.c.l.b16 %v3425_v1 }
0x1ad3   :  { %v3429_v45 = vpack.c.bf16 %v3373_v44, %v3373_v44 }
0x1ad5   :  { %v3500_v10 = vunpack.c.l.b16 %v3429_v45 }
0x1ad7   :  { %v3311_v59 = vpop.f32.mrf.mxu1  ;;  %v3341_v2 = vpop.f32.mrf.mxu2  ;;  %v3510_v21 = vrot.slane %v3500_v10, 4 }
0x1ad8   :  { %v3357_v0 = vpop.f32.mrf.mxu3  ;;  %v3427_v48 = vpack.c.bf16 %v3341_v2, %v3341_v2 }
0x1ad9   :  { %v3428_v29 = vpack.c.bf16 %v3357_v0, %v3357_v0 }
0x1ada   :  { %v3375_v35 = vpop.f32.mrf.mxu0  ;;  %v3498_v14 = vunpack.c.l.b16 %v3427_v48 }
0x1adb   :  { %v3499_v46 = vunpack.c.l.b16 %v3428_v29 }
0x1adc   :  { %v3506_v23 = vrot.slane %v3498_v14, 6 }
0x1add   :  { %v3508_v22 = vrot.slane %v3499_v46, 5 }
0x1adf   :  { %v3325_v52 = vpop.f32.mrf.mxu1  ;;  %v3343_v8 = vpop.f32.mrf.mxu2 }
0x1ae0   :  { %v3426_v39 = vpack.c.bf16 %v3325_v52, %v3325_v52  ;;  %v3359_v15 = vpop.f32.mrf.mxu3  ;;  %v6503_v52 = vld [vmem:[#allocation52_spill] sm:$0xff] }
0x1ae1   :  { %v3172_v8 = vadd.f32 %v6011_v43, %v6503_v52 }
0x1ae2   :  { %v3497_v27 = vunpack.c.l.b16 %v3426_v39  ;;  %v6504_v39 = vld [vmem:[#allocation53_spill] sm:$0xff] }
0x1ae3   :  { %v3445_v6 = vpop.f32.mrf.mxu0 }
0x1ae4   :  { %v3504_v55 = vrot.slane %v3497_v27, 7 }
0x1ae6   :  { %v3505_v30 = vsel %vm467_vm1, %v3504_v55, %v3496_v32  ;;  %vm6498_vm1 = vcmask 523264  }
0x1ae7   :  { %v3327_v3 = vpop.f32.mrf.mxu1  ;;  %v3405_v42 = vpop.f32.mrf.mxu2  ;;  %v3507_v13 = vsel %vm469_vm2, %v3506_v23, %v3505_v30  ;;  %vm6499_vm2 = vmmov %vm6498_vm1 }
0x1ae8   :  { %v3421_v11 = vpop.f32.mrf.mxu3  ;;  %v3431_v34 = vpack.c.bf16 %v3405_v42, %v3405_v42  ;;  %v3509_v18 = vsel %vm471_vm3, %v3508_v22, %v3507_v13  ;;  %vm6500_vm14 = vmmov %vm6498_vm1 }
0x1ae9   :  { %v3432_v7 = vpack.c.bf16 %v3421_v11, %v3421_v11  ;;  %v3511_v37 = vsel %vm473_vm4, %v3510_v21, %v3509_v18  ;;  %vm6501_vm3 = vmmov %vm6498_vm1 }
0x1aea   :  { %v3502_v5 = vunpack.c.l.b16 %v3431_v34 }
0x1aeb   :  { %v3503_v9 = vunpack.c.l.b16 %v3432_v7  ;;  %v3447_v41 = vpop.f32.mrf.mxu0 }
0x1aec   :  { %v3514_v36 = vrot.slane %v3502_v5, 2 }
0x1aed   :  { %v3516_v40 = vrot.slane %v3503_v9, 1 }
0x1aef   :  { %v3389_v16 = vpop.f32.mrf.mxu1  ;;  %v3407_v19 = vpop.f32.mrf.mxu2 }
0x1af0   :  { %v3430_v62 = vpack.c.bf16 %v3389_v16, %v3389_v16  ;;  %v3423_v25 = vpop.f32.mrf.mxu3 }
0x1af2   :  { %v3501_v12 = vunpack.c.l.b16 %v3430_v62 }
0x1af4   :  { %v3512_v28 = vrot.slane %v3501_v12, 3  ;;  %v3173_v12 = vadd.f32 %v6014_v49, %v5294_v57 }
0x1af6   :  { %v3513_v47 = vsel %vm475_vm5, %v3512_v28, %v3511_v37 }
0x1af7   :  { %v3515_v50 = vsel %vm477_vm6, %v3514_v36, %v3513_v47  ;;  %v3391_v54 = vpop.f32.mrf.mxu1  ;;  %v3471_v24 = vpop.f32.mrf.mxu2 }
0x1af8   :  { %v3517_v61 = vsel %vm479_vm7, %v3516_v40, %v3515_v50  ;;  %v6071_v31 = vpop.f32.mrf.mxu3 }
0x1af9   :  { %v3518_v63 = vpack.c.b16 %v3517_v61, %v3517_v61 }
0x1afb   :  { %4157 = vmatmul.msk.bf16.vlgmr.msrb.gmra.mxu0 %vm6498_vm1, %v3518_v63  ;;  %4158 = vmatmul.msk.bf16.vlgmr.msrb.gmra.mxu1 %vm6499_vm2, %v3518_v63 }
0x1afc   :  { %4159 = vmatmul.msk.bf16.vlgmr.msra.gmra.mxu2 %vm6500_vm14, %v3518_v63  ;;  %4160 = vmatmul.msk.bf16.vlgmr.msra.gmra.mxu3 %vm6501_vm3, %v3518_v63 }
0x1aff   :  { %v3458_v20 = vpop.f32.mrf.mxu1  ;;  %v3473_v53 = vpop.f32.mrf.mxu2 }
0x1b00   :  { %v3486_v58 = vpop.f32.mrf.mxu3 }
0x1b07   :  { %v3460_v44 = vpop.f32.mrf.mxu1 }
0x1b78   :  { %v3531_v59 = vpop.f32.mrf.mxu0  ;;  %v3544_v2 = vpop.f32.mrf.mxu1 }
0x1b79   :  { %v3574_v0 = vadd.f32 %v3531_v59, %v3445_v6  ;;  %v3575_v35 = vadd.f32 %v3544_v2, %v3458_v20 }
0x1b7b   :  { %v3577_v15 = vadd.f32 %v3574_v0, %v6504_v39  ;;  %v3578_v27 = vadd.f32 %v3575_v35, %v6505_v17 }
0x1b7d   :  { %v3580_v48 = vadd.f32 %v3577_v15, %v3171_v26  ;;  %v3600_v1 = vadd.f32 %v3578_v27, %v3172_v8 }
0x1b7f   :  { %v4161_v33 = vmul.f32 -1.442695, %v3580_v48  ;;  %v4162_v3 = vmul.f32 -1.442695, %v3600_v1  ;;  %v3557_v42 = vpop.f32.mrf.mxu2  ;;  %v3570_v29 = vpop.f32.mrf.mxu3 }
0x1b80   :  { %v3533_v55 = vpop.f32.mrf.mxu0  ;;  %v3546_v11 = vpop.f32.mrf.mxu1  ;;  %v3576_v25 = vadd.f32 %v3557_v42, %v3471_v24 }
0x1b81   :  { %4409 = vpow2.f32 %v4161_v33 }
0x1b82   :  { %4411 = vpow2.f32 %v4162_v3  ;;  %v3579_v37 = vadd.f32 %v3576_v25, %v5297_v51 }
0x1b87   :  { %v4410_v14 = vpop.eup %4409  ;;  %v3559_v32 = vpop.f32.mrf.mxu2 }
0x1b88   :  { %v3572_v56 = vpop.f32.mrf.mxu3  ;;  %v4412_v45 = vpop.eup %4411  ;;  %v3584_v46 = vadd.f32 1.0, %v4410_v14 }
0x1b89   :  { %v3604_v43 = vadd.f32 1.0, %v4412_v45 }
0x1b8a   :  { %4413 = vrcp.f32 %v3584_v46  ;;  %v3596_v16 = vand.u32 2147483648, %v3584_v46  ;;  %v3594_v22 = vand.u32 2147483647, %v3584_v46  ;;  %vm3590_vm5 = vweird.f32 %v3584_v46 }
0x1b8b   :  { %4415 = vrcp.f32 %v3604_v43  ;;  %v3616_v36 = vand.u32 2147483648, %v3604_v43  ;;  %vm3610_vm10 = vweird.f32 %v3604_v43  ;;  %v3614_v47 = vand.u32 2147483647, %v3604_v43 }
0x1b8c   :  { %v3597_v9 = vor.u32 1.1754944e-38, %v3596_v16  ;;  %vm3595_vm7 = vcmp.eq.f32.partialorder %v3594_v22, 8.507059e+37 }
0x1b8d   :  { %v3617_v61 = vor.u32 1.1754944e-38, %v3616_v36  ;;  %vm3615_vm13 = vcmp.eq.f32.partialorder %v3614_v47, 8.507059e+37 }
0x1b90   :  { %v4414_v30 = vpop.eup %4413 }
0x1b91   :  { %v4416_v23 = vpop.eup %4415  ;;  %v3586_v34 = vmul.f32 %v4414_v30, %v3584_v46  ;;  %vm3591_vm4 = vweird.f32 %v4414_v30 }
0x1b92   :  { %v3606_v7 = vmul.f32 %v4416_v23, %v3604_v43  ;;  %vm3592_vm6 = vmor %vm3590_vm5, %vm3591_vm4  ;;  %vm3611_vm15 = vweird.f32 %v4416_v23 }
0x1b93   :  { %v3587_v10 = vsub.f32 1.0, %v3586_v34  ;;  %vm3612_vm0 = vmor %vm3610_vm10, %vm3611_vm15 }
0x1b94   :  { %v3607_v13 = vsub.f32 1.0, %v3606_v7 }
0x1b95   :  { %v3588_v19 = vmul.f32 %v4414_v30, %v3587_v10 }
0x1b96   :  { %v3608_v62 = vmul.f32 %v4416_v23, %v3607_v13 }
0x1b97   :  { %v3589_v5 = vadd.f32 %v4414_v30, %v3588_v19 }
0x1b98   :  { %v3609_v28 = vadd.f32 %v4416_v23, %v3608_v62 }
0x1b99   :  { %v3593_v18 = vsel %vm3592_vm6, %v4414_v30, %v3589_v5 }
0x1b9a   :  { %v3598_v21 = vsel %vm3595_vm7, %v3597_v9, %v3593_v18  ;;  %v3613_v54 = vsel %vm3612_vm0, %v4416_v23, %v3609_v28 }
0x1b9b   :  { %v3620_v40 = vmul.f32 %v3598_v21, %v3173_v12  ;;  %v3618_v63 = vsel %vm3615_vm13, %v3617_v61, %v3613_v54 }
0x1b9c   :  { %v3623_v6 = vsub.f32 1.0, %v3618_v63  ;;  %v3625_v20 = vmul.f32 %v3618_v63, %v5953_v4 }
0x1b9d   :  { %v3621_v50 = vadd.f32 %v3620_v40, %v3579_v37 }
0x1b9f   :  { %4417 = vtanh.f32 %v3621_v50 }
0x1ba5   :  { %v4418_v57 = vpop.eup %4417 }
0x1ba6   :  { %v3624_v49 = vmul.f32 %v4418_v57, %v3623_v6 }
0x1ba8   :  { %v3626_v24 = vadd.f32 %v3625_v20, %v3624_v49 }
0x1baa   :  { %3627 = vst [vmem:[%s6104_s13] sm:$0xff] %v3626_v24  ;;  %v3628_v51 = vpack.c.bf16 %v3626_v24, %v3626_v24 }
0x1bac   :  { %3637 = vmatmul.bf16.vlgmr.msra.gmra.mxu0 %v3628_v51 }
0x1c29   :  { %v3638_v41 = vpop.f32.mrf.mxu0 }
0x1c2a   :  { %v3639_v44 = vadd.f32 %v3638_v41, %v6071_v31 }
0x1c2c   :  { %v3642_v53 = vadd.f32 %v3639_v44, %v3570_v29 }
0x1c2e   :  { %v3643_v58 = vadd.f32 %v5312_v38, %v3642_v53 }
0x1c30   :  { %4163 = vst [vmem:[%s6103_s12 + $0x28] sm:$0xff] %v3643_v58 }
0x1c31   :  { %v3640_v59 = vpop.f32.mrf.mxu0 }
0x1c32   :  { %3654 = vsyncpa [#allocation4], 1 }

</bundles_post_ra>
